<compile_context>
chip_gen: v7x
topology: tpu7x:2x2x1
jax: 0.10.0
libtpu: 0.0.40
codegen_flags: <defaults>
</compile_context>

<pallas_src>
import functools

import jax
import jax.numpy as jnp
from jax.experimental import pallas as pl
from jax.experimental.pallas import tpu as pltpu

EPS = 1e-5
LANE = 128          # all channel dims padded to a multiple of the lane width
TM_TARGET = 256     # M (row) tile size


def _round_up(x, m):
    return (x + m - 1) // m * m


# ----------------------------- Pallas kernel ------------------------------- #

def _fused_mm_bn_kernel(*refs, relu, has_res, m_valid, tm, mask_rows):
    """Fused  y = x @ w ; BatchNorm(batch stats) ; [+residual] ; [ReLU].

    grid = (C-tiles, phase, M-tiles).  Phase 0 accumulates per-channel
    sum / sum(y^2) into VMEM scratch while streaming M-tiles; phase 1 folds the
    stats into a scale/shift and applies them (recomputing the matmul so the
    un-normalized activation never hits HBM).
    """
    if has_res:
        x_ref, w_ref, g_ref, b_ref, r_ref, o_ref, s0_ref, s1_ref = refs
    else:
        x_ref, w_ref, g_ref, b_ref, o_ref, s0_ref, s1_ref = refs
        r_ref = None

    p = pl.program_id(1)   # phase: 0 = statistics, 1 = normalize/write
    m = pl.program_id(2)   # M-tile index

    # Zero the per-channel accumulators at the start of each C-tile's phase 0.
    @pl.when(jnp.logical_and(p == 0, m == 0))
    def _():
        s0_ref[...] = jnp.zeros_like(s0_ref)
        s1_ref[...] = jnp.zeros_like(s1_ref)

    # bf16 x bf16 -> f32 on the MXU.
    y = jnp.dot(x_ref[...], w_ref[...], preferred_element_type=jnp.float32)

    @pl.when(p == 0)
    def _():
        s0_ref[...] += jnp.sum(y, axis=0, keepdims=True)
        s1_ref[...] += jnp.sum(y * y, axis=0, keepdims=True)

    # First phase-1 step: fold stats into (scale, shift).  rsqrt -> EUP slot.
    @pl.when(jnp.logical_and(p == 1, m == 0))
    def _():
        inv_m = jnp.float32(1.0 / m_valid)
        mean = s0_ref[...] * inv_m
        var = jnp.maximum(s1_ref[...] * inv_m - mean * mean, 0.0)
        scale = g_ref[...] * jax.lax.rsqrt(var + EPS)
        s1_ref[...] = b_ref[...] - mean * scale      # shift
        s0_ref[...] = scale                          # scale

    @pl.when(p == 1)
    def _():
        out = y * s0_ref[...] + s1_ref[...]          # per-channel FMA
        if has_res:
            out = out + r_ref[...].astype(jnp.float32)
        if relu:
            out = jnp.maximum(out, 0.0)
        if mask_rows:
            # Zero padded rows so they never pollute downstream BN statistics.
            rows = jax.lax.broadcasted_iota(jnp.int32, out.shape, 0) + m * tm
            out = jnp.where(rows < m_valid, out, 0.0)
        o_ref[...] = out.astype(o_ref.dtype)


def fused_matmul_bn(x, w, gamma, beta, *, residual=None, relu=True,
                    m_valid, out_dtype=jnp.bfloat16):
    """(M_pad,K) @ (K,C) -> BN over the first m_valid rows -> [+res] -> [relu].

    K and C must be lane-padded; rows >= m_valid of `x` must be zero (their
    outputs are re-zeroed so chained stages keep correct statistics).
    """
    M_pad, K = x.shape
    C = w.shape[1]
    TM = min(M_pad, TM_TARGET)
    TC = min(C, LANE)
    assert M_pad % TM == 0 and C % TC == 0 and K % 8 == 0
    nm, nc = M_pad // TM, C // TC

    xb = x.astype(jnp.bfloat16)
    wb = w.astype(jnp.bfloat16)
    g2 = gamma.reshape(1, C).astype(jnp.float32)
    b2 = beta.reshape(1, C).astype(jnp.float32)

    has_res = residual is not None
    args = [xb, wb, g2, b2]
    in_specs = [
        pl.BlockSpec((TM, K), lambda c, p, m: (m, 0)),    # streamed M-tiles
        pl.BlockSpec((K, TC), lambda c, p, m: (0, c)),    # weight slab per C-tile
        pl.BlockSpec((1, TC), lambda c, p, m: (0, c)),    # gamma (fetched once/C)
        pl.BlockSpec((1, TC), lambda c, p, m: (0, c)),    # beta
    ]
    if has_res:
        args.append(residual.astype(jnp.bfloat16))
        # p*m -> only streamed during phase 1 (block index constant in phase 0)
        in_specs.append(pl.BlockSpec((TM, TC), lambda c, p, m: (p * m, c)))

    kernel = functools.partial(
        _fused_mm_bn_kernel, relu=relu, has_res=has_res,
        m_valid=m_valid, tm=TM, mask_rows=(M_pad > m_valid))

    out_bytes = jnp.dtype(out_dtype).itemsize
    cost = pl.CostEstimate(
        flops=2 * 2 * M_pad * K * C,                # matmul runs in both phases
        transcendentals=C,
        bytes_accessed=(2 * M_pad * K * 2 + K * C * 2
                        + (M_pad * C * 2 if has_res else 0)
                        + M_pad * C * out_bytes))

    return pl.pallas_call(
        kernel,
        out_shape=jax.ShapeDtypeStruct((M_pad, C), out_dtype),
        grid=(nc, 2, nm),
        in_specs=in_specs,
        out_specs=pl.BlockSpec((TM, TC), lambda c, p, m: (p * m, c)),
        scratch_shapes=[pltpu.VMEM((1, TC), jnp.float32),   # sum   -> scale
                        pltpu.VMEM((1, TC), jnp.float32)],  # sumsq -> shift
        compiler_params=pltpu.CompilerParams(
            dimension_semantics=("parallel", "arbitrary", "arbitrary"),
            vmem_limit_bytes=32 * 1024 * 1024),
        cost_estimate=cost,
    )(*args)


# ------------------------------ JAX-side glue ------------------------------ #

def _pad_rows(x):
    m = x.shape[0]
    m_pad = _round_up(m, TM_TARGET) if m >= TM_TARGET else _round_up(m, 8)
    if m_pad != m:
        x = jnp.pad(x, ((0, m_pad - m), (0, 0)))
    return x, m_pad


def im2col_3x3(x_nhwc, stride):
    """3x3 / pad=1 patches. Column order of the 9*C block: (dy, dx, cin)."""
    N, H, W, C = x_nhwc.shape
    Ho = (H + 2 - 3) // stride + 1
    Wo = (W + 2 - 3) // stride + 1
    xp = jnp.pad(x_nhwc, ((0, 0), (1, 1), (1, 1), (0, 0)))
    cols = [xp[:, dy:dy + stride * (Ho - 1) + 1:stride,
               dx:dx + stride * (Wo - 1) + 1:stride, :]
            for dy in range(3) for dx in range(3)]
    patches = jnp.concatenate(cols, axis=-1)          # (N, Ho, Wo, 9*C)
    return patches.reshape(N * Ho * Wo, 9 * C), Ho, Wo


def _pad2(w, rows, cols):
    return jnp.zeros((rows, cols), w.dtype).at[:w.shape[0], :w.shape[1]].set(w)


def _pad1(v, n):
    return jnp.zeros((n,), v.dtype).at[:v.shape[0]].set(v)


class BottleneckPallas:
    expansion = 4

    def __init__(self, in_planes, planes, stride=1, key=jax.random.PRNGKey(0)):
        self.in_planes, self.planes, self.stride = in_planes, planes, stride
        out_planes = self.expansion * planes
        self.out_planes = out_planes
        self.cin_p = _round_up(in_planes, LANE)
        self.pl_p = _round_up(planes, LANE)
        self.cout_p = _round_up(out_planes, LANE)
        k1, k2, k3, k4 = jax.random.split(key, 4)

        # ---- real (unpadded f32) parameters: used by the pure-JAX reference --
        self.w1 = 0.1 * jax.random.normal(k1, (in_planes, planes), jnp.float32)
        self.w2_oihw = 0.1 * jax.random.normal(k2, (planes, planes, 3, 3), jnp.float32)
        self.w3 = 0.1 * jax.random.normal(k3, (planes, out_planes), jnp.float32)
        self.g1 = jnp.ones((planes,), jnp.float32); self.b1 = jnp.zeros((planes,), jnp.float32)
        self.g2 = jnp.ones((planes,), jnp.float32); self.b2 = jnp.zeros((planes,), jnp.float32)
        self.g3 = jnp.ones((out_planes,), jnp.float32); self.b3 = jnp.zeros((out_planes,), jnp.float32)

        self.has_shortcut = (stride != 1) or (in_planes != out_planes)
        if self.has_shortcut:
            self.w_sc = 0.1 * jax.random.normal(k4, (in_planes, out_planes), jnp.float32)
            self.g_sc = jnp.ones((out_planes,), jnp.float32)
            self.b_sc = jnp.zeros((out_planes,), jnp.float32)

        # ---- kernel-side parameters: lane-padded channels, bf16 weights ------
        self.w1_p = _pad2(self.w1, self.cin_p, self.pl_p).astype(jnp.bfloat16)
        w2_hwio = jnp.transpose(self.w2_oihw, (2, 3, 1, 0))          # (3,3,in,out)
        w2_hwio_p = jnp.zeros((3, 3, self.pl_p, self.pl_p), jnp.float32)
        w2_hwio_p = w2_hwio_p.at[:, :, :planes, :planes].set(w2_hwio)
        self.w2_p = w2_hwio_p.reshape(9 * self.pl_p, self.pl_p).astype(jnp.bfloat16)
        self.w3_p = _pad2(self.w3, self.pl_p, self.cout_p).astype(jnp.bfloat16)
        self.g1_p = _pad1(self.g1, self.pl_p); self.b1_p = _pad1(self.b1, self.pl_p)
        self.g2_p = _pad1(self.g2, self.pl_p); self.b2_p = _pad1(self.b2, self.pl_p)
        self.g3_p = _pad1(self.g3, self.cout_p); self.b3_p = _pad1(self.b3, self.cout_p)
        if self.has_shortcut:
            self.wsc_p = _pad2(self.w_sc, self.cin_p, self.cout_p).astype(jnp.bfloat16)
            self.gsc_p = _pad1(self.g_sc, self.cout_p)
            self.bsc_p = _pad1(self.b_sc, self.cout_p)

    def __call__(self, x_nchw):
        N, Cin, H, W = x_nchw.shape
        s = self.stride

        # NCHW -> NHWC, zero-pad channels to a lane multiple, bf16 activations.
        x = jnp.transpose(x_nchw, (0, 2, 3, 1))
        x = jnp.pad(x, ((0, 0), (0, 0), (0, 0), (0, self.cin_p - Cin)))
        x = x.astype(jnp.bfloat16)

        # conv1 (1x1) + bn1 + relu
        M1 = N * H * W
        x_mat, _ = _pad_rows(x.reshape(M1, self.cin_p))
        out1 = fused_matmul_bn(x_mat, self.w1_p, self.g1_p, self.b1_p,
                               relu=True, m_valid=M1)
        out1_nhwc = out1[:M1].reshape(N, H, W, self.pl_p)

        # conv2 (3x3, stride, pad=1) + bn2 + relu  (im2col -> fused kernel)
        patches, Ho, Wo = im2col_3x3(out1_nhwc, s)
        M2 = N * Ho * Wo
        patches, _ = _pad_rows(patches)
        out2 = fused_matmul_bn(patches, self.w2_p, self.g2_p, self.b2_p,
                               relu=True, m_valid=M2)

        # shortcut branch
        if self.has_shortcut:
            xs, _ = _pad_rows(x[:, ::s, ::s, :].reshape(M2, self.cin_p))
            sc = fused_matmul_bn(xs, self.wsc_p, self.gsc_p, self.bsc_p,
                                 relu=False, m_valid=M2)
        else:
            sc = x_mat          # identity: stride==1 and cin_p == cout_p

        # conv3 (1x1) + bn3 + residual add + relu  (f32 public output)
        out3 = fused_matmul_bn(out2, self.w3_p, self.g3_p, self.b3_p,
                               residual=sc, relu=True, m_valid=M2,
                               out_dtype=jnp.float32)

        out = out3[:M2, :self.out_planes].reshape(N, Ho, Wo, self.out_planes)
        return jnp.transpose(out, (0, 3, 1, 2))      # NHWC -> NCHW


# --------------------------- pure-JAX reference ----------------------------- #

def _bn_ref(y_nhwc, g, b):
    mean = jnp.mean(y_nhwc, axis=(0, 1, 2), keepdims=True)
    var = jnp.mean((y_nhwc - mean) ** 2, axis=(0, 1, 2), keepdims=True)
    return (y_nhwc - mean) / jnp.sqrt(var + EPS) * g + b


def _conv_ref(x_nhwc, w_oihw, stride, padding):
    return jax.lax.conv_general_dilated(
        x_nhwc, w_oihw, (stride, stride), padding,
        dimension_numbers=("NHWC", "OIHW", "NHWC"))


def bottleneck_ref(block, x_nchw):
    x = jnp.transpose(x_nchw, (0, 2, 3, 1))
    w1 = block.w1.T[:, :, None, None]
    w3 = block.w3.T[:, :, None, None]
    out = jax.nn.relu(_bn_ref(_conv_ref(x, w1, 1, "VALID"), block.g1, block.b1))
    out = jax.nn.relu(_bn_ref(_conv_ref(out, block.w2_oihw, block.stride,
                                        [(1, 1), (1, 1)]), block.g2, block.b2))
    out = _bn_ref(_conv_ref(out, w3, 1, "VALID"), block.g3, block.b3)
    if block.has_shortcut:
        w_sc = block.w_sc.T[:, :, None, None]
        sc = _bn_ref(_conv_ref(x, w_sc, block.stride, "VALID"), block.g_sc, block.b_sc)
    else:
        sc = x
    out = jax.nn.relu(out + sc)
    return jnp.transpose(out, (0, 3, 1, 2))


# ---------------------------------- main ------------------------------------ #

if __name__ == "__main__":
    key = jax.random.PRNGKey(0)
    kx, kp = jax.random.split(key)

    N, Cin, H, W = 2, 4, 16, 16
    planes, stride = 4, 1
    x = jax.random.normal(kx, (N, Cin, H, W), jnp.float32)

    block = BottleneckPallas(Cin, planes, stride=stride, key=kp)
    fwd = jax.jit(block.__call__)

    out = jax.block_until_ready(fwd(x))
    ref = jax.block_until_ready(bottleneck_ref(block, x))

    assert out.shape == (N, block.expansion * planes, H // stride, W // stride), out.shape
    err = float(jnp.max(jnp.abs(out - ref)))
    # bf16 MXU inputs / bf16 intermediates through three chained matmul+BN
    # stages -> per-element error ~1% of the (unit) BN scale; f32 reference.
    assert jnp.allclose(out, ref, atol=5e-2, rtol=5e-2), err

    print("KERNEL_OK")
</pallas_src>

<mosaic_0001>
module attributes {stable_mosaic.version = 11 : i64} {
  func.func @_fused_mm_bn_kernel(%arg0: i32, %arg1: i32, %arg2: i32, %arg3: memref<256x128xbf16, #tpu.memory_space<vmem>>, %arg4: memref<128x128xbf16, #tpu.memory_space<vmem>>, %arg5: memref<1x128xf32, #tpu.memory_space<vmem>>, %arg6: memref<1x128xf32, #tpu.memory_space<vmem>>, %arg7: memref<256x128xbf16, #tpu.memory_space<vmem>>, %arg8: memref<1x128xf32, #tpu.memory_space<vmem>>, %arg9: memref<1x128xf32, #tpu.memory_space<vmem>>) attributes {dimension_semantics = [#tpu.dimension_semantics<parallel>, #tpu.dimension_semantics<arbitrary>, #tpu.dimension_semantics<arbitrary>], iteration_bounds = array<i64: 1, 2, 2>, scalar_prefetch = 0 : i64, scratch_operands = 2 : i64, tpu.core_type = #tpu.core_type<tc>, window_params = [{transform_indices = @transform_0, window_bounds = array<i64: 256, 128>}, {transform_indices = @transform_1, window_bounds = array<i64: 128, 128>}, {transform_indices = @transform_2, window_bounds = array<i64: 1, 128>}, {transform_indices = @transform_3, window_bounds = array<i64: 1, 128>}, {transform_indices = @transform_4, window_bounds = array<i64: 256, 128>}]} {
    %c0_i32 = arith.constant 0 : i32
    %0 = arith.cmpi eq, %arg1, %c0_i32 : i32
    %c0_i32_0 = arith.constant 0 : i32
    %1 = arith.cmpi eq, %arg2, %c0_i32_0 : i32
    %2 = arith.andi %0, %1 : i1
    %3 = arith.extui %2 : i1 to i32
    %c0_i32_1 = arith.constant 0 : i32
    %4 = arith.cmpi ne, %3, %c0_i32_1 : i32
    scf.if %4 {
      %cst_11 = arith.constant 0.000000e+00 : f32
      %19 = vector.broadcast %cst_11 : f32 to vector<1x128xf32>
      %c0_12 = arith.constant 0 : index
      %c0_13 = arith.constant 0 : index
      %20 = vector.load %arg8[%c0_12, %c0_13] : memref<1x128xf32, #tpu.memory_space<vmem>>, vector<1x128xf32>
      tpu.vector_store %arg8[%c0_12, %c0_13], %19 {strides = array<i32>} : memref<1x128xf32, #tpu.memory_space<vmem>>, vector<1x128xf32>,
      %cst_14 = arith.constant 0.000000e+00 : f32
      %21 = vector.broadcast %cst_14 : f32 to vector<1x128xf32>
      %c0_15 = arith.constant 0 : index
      %c0_16 = arith.constant 0 : index
      %22 = vector.load %arg9[%c0_15, %c0_16] : memref<1x128xf32, #tpu.memory_space<vmem>>, vector<1x128xf32>
      tpu.vector_store %arg9[%c0_15, %c0_16], %21 {strides = array<i32>} : memref<1x128xf32, #tpu.memory_space<vmem>>, vector<1x128xf32>,
    } else {
    }
    %c0 = arith.constant 0 : index
    %c0_2 = arith.constant 0 : index
    %5 = vector.load %arg3[%c0, %c0_2] : memref<256x128xbf16, #tpu.memory_space<vmem>>, vector<256x128xbf16>
    %c0_3 = arith.constant 0 : index
    %c0_4 = arith.constant 0 : index
    %6 = vector.load %arg4[%c0_3, %c0_4] : memref<128x128xbf16, #tpu.memory_space<vmem>>, vector<128x128xbf16>
    %cst = arith.constant dense<0.000000e+00> : vector<256x128xf32>
    %7 = tpu.matmul %5, %6, %cst {dimension_numbers = #tpu.dot_dimension_numbers<[1], [0], [0], [1], [0, 0, 1, 1], [], []>} : vector<256x128xbf16>, vector<128x128xbf16>, vector<256x128xf32> -> vector<256x128xf32>
    %c0_i32_5 = arith.constant 0 : i32
    %8 = arith.cmpi eq, %arg1, %c0_i32_5 : i32
    %9 = arith.extui %8 : i1 to i32
    %c0_i32_6 = arith.constant 0 : i32
    %10 = arith.cmpi ne, %9, %c0_i32_6 : i32
    scf.if %10 {
      %c0_11 = arith.constant 0 : index
      %c0_12 = arith.constant 0 : index
      %19 = vector.load %arg8[%c0_11, %c0_12] : memref<1x128xf32, #tpu.memory_space<vmem>>, vector<1x128xf32>
      %cst_13 = arith.constant dense<0.000000e+00> : vector<128xf32>
      %20 = vector.multi_reduction <add>, %7, %cst_13 [0] : vector<256x128xf32> to vector<128xf32>
      %21 = vector.shape_cast %20 : vector<128xf32> to vector<1x128xf32>
      %22 = arith.addf %19, %21 : vector<1x128xf32>
      %c0_14 = arith.constant 0 : index
      %c0_15 = arith.constant 0 : index
      %23 = vector.load %arg8[%c0_14, %c0_15] : memref<1x128xf32, #tpu.memory_space<vmem>>, vector<1x128xf32>
      tpu.vector_store %arg8[%c0_14, %c0_15], %22 {strides = array<i32>} : memref<1x128xf32, #tpu.memory_space<vmem>>, vector<1x128xf32>,
      %c0_16 = arith.constant 0 : index
      %c0_17 = arith.constant 0 : index
      %24 = vector.load %arg9[%c0_16, %c0_17] : memref<1x128xf32, #tpu.memory_space<vmem>>, vector<1x128xf32>
      %25 = arith.mulf %7, %7 : vector<256x128xf32>
      %cst_18 = arith.constant dense<0.000000e+00> : vector<128xf32>
      %26 = vector.multi_reduction <add>, %25, %cst_18 [0] : vector<256x128xf32> to vector<128xf32>
      %27 = vector.shape_cast %26 : vector<128xf32> to vector<1x128xf32>
      %28 = arith.addf %24, %27 : vector<1x128xf32>
      %c0_19 = arith.constant 0 : index
      %c0_20 = arith.constant 0 : index
      %29 = vector.load %arg9[%c0_19, %c0_20] : memref<1x128xf32, #tpu.memory_space<vmem>>, vector<1x128xf32>
      tpu.vector_store %arg9[%c0_19, %c0_20], %28 {strides = array<i32>} : memref<1x128xf32, #tpu.memory_space<vmem>>, vector<1x128xf32>,
    } else {
    }
    %c1_i32 = arith.constant 1 : i32
    %11 = arith.cmpi eq, %arg1, %c1_i32 : i32
    %c0_i32_7 = arith.constant 0 : i32
    %12 = arith.cmpi eq, %arg2, %c0_i32_7 : i32
    %13 = arith.andi %11, %12 : i1
    %14 = arith.extui %13 : i1 to i32
    %c0_i32_8 = arith.constant 0 : i32
    %15 = arith.cmpi ne, %14, %c0_i32_8 : i32
    scf.if %15 {
      %c0_11 = arith.constant 0 : index
      %c0_12 = arith.constant 0 : index
      %19 = vector.load %arg8[%c0_11, %c0_12] : memref<1x128xf32, #tpu.memory_space<vmem>>, vector<1x128xf32>
      %cst_13 = arith.constant 0.001953125 : f32
      %20 = vector.broadcast %cst_13 : f32 to vector<1x128xf32>
      %21 = arith.mulf %19, %20 : vector<1x128xf32>
      %c0_14 = arith.constant 0 : index
      %c0_15 = arith.constant 0 : index
      %22 = vector.load %arg9[%c0_14, %c0_15] : memref<1x128xf32, #tpu.memory_space<vmem>>, vector<1x128xf32>
      %cst_16 = arith.constant 0.001953125 : f32
      %23 = vector.broadcast %cst_16 : f32 to vector<1x128xf32>
      %24 = arith.mulf %22, %23 : vector<1x128xf32>
      %25 = arith.mulf %21, %21 : vector<1x128xf32>
      %26 = arith.subf %24, %25 : vector<1x128xf32>
      %cst_17 = arith.constant 0.000000e+00 : f32
      %27 = vector.broadcast %cst_17 : f32 to vector<1x128xf32>
      %28 = arith.maximumf %26, %27 : vector<1x128xf32>
      %c0_18 = arith.constant 0 : index
      %c0_19 = arith.constant 0 : index
      %29 = vector.load %arg5[%c0_18, %c0_19] : memref<1x128xf32, #tpu.memory_space<vmem>>, vector<1x128xf32>
      %cst_20 = arith.constant 9.99999974E-6 : f32
      %30 = vector.broadcast %cst_20 : f32 to vector<1x128xf32>
      %31 = arith.addf %28, %30 : vector<1x128xf32>
      %32 = math.rsqrt %31 : vector<1x128xf32>
      %33 = arith.mulf %29, %32 : vector<1x128xf32>
      %c0_21 = arith.constant 0 : index
      %c0_22 = arith.constant 0 : index
      %34 = vector.load %arg6[%c0_21, %c0_22] : memref<1x128xf32, #tpu.memory_space<vmem>>, vector<1x128xf32>
      %35 = arith.mulf %21, %33 : vector<1x128xf32>
      %36 = arith.subf %34, %35 : vector<1x128xf32>
      %c0_23 = arith.constant 0 : index
      %c0_24 = arith.constant 0 : index
      %37 = vector.load %arg9[%c0_23, %c0_24] : memref<1x128xf32, #tpu.memory_space<vmem>>, vector<1x128xf32>
      tpu.vector_store %arg9[%c0_23, %c0_24], %36 {strides = array<i32>} : memref<1x128xf32, #tpu.memory_space<vmem>>, vector<1x128xf32>,
      %c0_25 = arith.constant 0 : index
      %c0_26 = arith.constant 0 : index
      %38 = vector.load %arg8[%c0_25, %c0_26] : memref<1x128xf32, #tpu.memory_space<vmem>>, vector<1x128xf32>
      tpu.vector_store %arg8[%c0_25, %c0_26], %33 {strides = array<i32>} : memref<1x128xf32, #tpu.memory_space<vmem>>, vector<1x128xf32>,
    } else {
    }
    %c1_i32_9 = arith.constant 1 : i32
    %16 = arith.cmpi eq, %arg1, %c1_i32_9 : i32
    %17 = arith.extui %16 : i1 to i32
    %c0_i32_10 = arith.constant 0 : i32
    %18 = arith.cmpi ne, %17, %c0_i32_10 : i32
    scf.if %18 {
      %c0_11 = arith.constant 0 : index
      %c0_12 = arith.constant 0 : index
      %19 = vector.load %arg8[%c0_11, %c0_12] : memref<1x128xf32, #tpu.memory_space<vmem>>, vector<1x128xf32>
      %20 = vector.broadcast %19 : vector<1x128xf32> to vector<256x128xf32>
      %21 = arith.mulf %7, %20 : vector<256x128xf32>
      %c0_13 = arith.constant 0 : index
      %c0_14 = arith.constant 0 : index
      %22 = vector.load %arg9[%c0_13, %c0_14] : memref<1x128xf32, #tpu.memory_space<vmem>>, vector<1x128xf32>
      %23 = vector.broadcast %22 : vector<1x128xf32> to vector<256x128xf32>
      %24 = arith.addf %21, %23 : vector<256x128xf32>
      %cst_15 = arith.constant 0.000000e+00 : f32
      %25 = vector.broadcast %cst_15 : f32 to vector<256x128xf32>
      %26 = arith.maximumf %24, %25 : vector<256x128xf32>
      %27 = arith.truncf %26 : vector<256x128xf32> to vector<256x128xbf16>
      %c0_16 = arith.constant 0 : index
      %c0_17 = arith.constant 0 : index
      %28 = vector.load %arg7[%c0_16, %c0_17] : memref<256x128xbf16, #tpu.memory_space<vmem>>, vector<256x128xbf16>
      tpu.vector_store %arg7[%c0_16, %c0_17], %27 {strides = array<i32>} : memref<256x128xbf16, #tpu.memory_space<vmem>>, vector<256x128xbf16>,
    } else {
    }
    return
  }
  func.func @transform_0(%arg0: i32, %arg1: i32, %arg2: i32) -> (i32, i32) {
    %c0_i32 = arith.constant 0 : i32
    %c0_i32_0 = arith.constant 0 : i32
    return %arg2, %c0_i32 : i32, i32
  }
  func.func @transform_1(%arg0: i32, %arg1: i32, %arg2: i32) -> (i32, i32) {
    %c0_i32 = arith.constant 0 : i32
    %c0_i32_0 = arith.constant 0 : i32
    return %c0_i32, %arg0 : i32, i32
  }
  func.func @transform_2(%arg0: i32, %arg1: i32, %arg2: i32) -> (i32, i32) {
    %c0_i32 = arith.constant 0 : i32
    %c0_i32_0 = arith.constant 0 : i32
    return %c0_i32, %arg0 : i32, i32
  }
  func.func @transform_3(%arg0: i32, %arg1: i32, %arg2: i32) -> (i32, i32) {
    %c0_i32 = arith.constant 0 : i32
    %c0_i32_0 = arith.constant 0 : i32
    return %c0_i32, %arg0 : i32, i32
  }
  func.func @transform_4(%arg0: i32, %arg1: i32, %arg2: i32) -> (i32, i32) {
    %0 = arith.muli %arg1, %arg2 : i32
    %c0_i32 = arith.constant 0 : i32
    return %0, %arg0 : i32, i32
  }
}

module attributes {stable_mosaic.version = 11 : i64} {
  func.func @_fused_mm_bn_kernel(%arg0: i32, %arg1: i32, %arg2: i32, %arg3: memref<256x128xbf16, #tpu.memory_space<vmem>>, %arg4: memref<128x128xbf16, #tpu.memory_space<vmem>>, %arg5: memref<1x128xf32, #tpu.memory_space<vmem>>, %arg6: memref<1x128xf32, #tpu.memory_space<vmem>>, %arg7: memref<256x128xbf16, #tpu.memory_space<vmem>>, %arg8: memref<1x128xf32, #tpu.memory_space<vmem>>, %arg9: memref<1x128xf32, #tpu.memory_space<vmem>>) attributes {dimension_semantics = [#tpu.dimension_semantics<parallel>, #tpu.dimension_semantics<arbitrary>, #tpu.dimension_semantics<arbitrary>], iteration_bounds = array<i64: 1, 2, 2>, scalar_prefetch = 0 : i64, scratch_operands = 2 : i64, tpu.core_type = #tpu.core_type<tc>, window_params = [{transform_indices = @transform_0, window_bounds = array<i64: 256, 128>}, {transform_indices = @transform_1, window_bounds = array<i64: 128, 128>}, {transform_indices = @transform_2, window_bounds = array<i64: 1, 128>}, {transform_indices = @transform_3, window_bounds = array<i64: 1, 128>}, {transform_indices = @transform_4, window_bounds = array<i64: 256, 128>}]} {
    %c0_i32 = arith.constant 0 : i32
    %0 = arith.cmpi eq, %arg1, %c0_i32 : i32
    %c0_i32_0 = arith.constant 0 : i32
    %1 = arith.cmpi eq, %arg2, %c0_i32_0 : i32
    %2 = arith.andi %0, %1 : i1
    %3 = arith.extui %2 : i1 to i32
    %c0_i32_1 = arith.constant 0 : i32
    %4 = arith.cmpi ne, %3, %c0_i32_1 : i32
    scf.if %4 {
      %cst_11 = arith.constant 0.000000e+00 : f32
      %19 = vector.broadcast %cst_11 : f32 to vector<1x128xf32>
      %c0_12 = arith.constant 0 : index
      %c0_13 = arith.constant 0 : index
      %20 = vector.load %arg8[%c0_12, %c0_13] : memref<1x128xf32, #tpu.memory_space<vmem>>, vector<1x128xf32>
      tpu.vector_store %arg8[%c0_12, %c0_13], %19 {strides = array<i32>} : memref<1x128xf32, #tpu.memory_space<vmem>>, vector<1x128xf32>,
      %cst_14 = arith.constant 0.000000e+00 : f32
      %21 = vector.broadcast %cst_14 : f32 to vector<1x128xf32>
      %c0_15 = arith.constant 0 : index
      %c0_16 = arith.constant 0 : index
      %22 = vector.load %arg9[%c0_15, %c0_16] : memref<1x128xf32, #tpu.memory_space<vmem>>, vector<1x128xf32>
      tpu.vector_store %arg9[%c0_15, %c0_16], %21 {strides = array<i32>} : memref<1x128xf32, #tpu.memory_space<vmem>>, vector<1x128xf32>,
    } else {
    }
    %c0 = arith.constant 0 : index
    %c0_2 = arith.constant 0 : index
    %5 = vector.load %arg3[%c0, %c0_2] : memref<256x128xbf16, #tpu.memory_space<vmem>>, vector<256x128xbf16>
    %c0_3 = arith.constant 0 : index
    %c0_4 = arith.constant 0 : index
    %6 = vector.load %arg4[%c0_3, %c0_4] : memref<128x128xbf16, #tpu.memory_space<vmem>>, vector<128x128xbf16>
    %cst = arith.constant dense<0.000000e+00> : vector<256x128xf32>
    %7 = tpu.matmul %5, %6, %cst {dimension_numbers = #tpu.dot_dimension_numbers<[1], [0], [0], [1], [0, 0, 1, 1], [], []>} : vector<256x128xbf16>, vector<128x128xbf16>, vector<256x128xf32> -> vector<256x128xf32>
    %c0_i32_5 = arith.constant 0 : i32
    %8 = arith.cmpi eq, %arg1, %c0_i32_5 : i32
    %9 = arith.extui %8 : i1 to i32
    %c0_i32_6 = arith.constant 0 : i32
    %10 = arith.cmpi ne, %9, %c0_i32_6 : i32
    scf.if %10 {
      %c0_11 = arith.constant 0 : index
      %c0_12 = arith.constant 0 : index
      %19 = vector.load %arg8[%c0_11, %c0_12] : memref<1x128xf32, #tpu.memory_space<vmem>>, vector<1x128xf32>
      %cst_13 = arith.constant dense<0.000000e+00> : vector<128xf32>
      %20 = vector.multi_reduction <add>, %7, %cst_13 [0] : vector<256x128xf32> to vector<128xf32>
      %21 = vector.shape_cast %20 : vector<128xf32> to vector<1x128xf32>
      %22 = arith.addf %19, %21 : vector<1x128xf32>
      %c0_14 = arith.constant 0 : index
      %c0_15 = arith.constant 0 : index
      %23 = vector.load %arg8[%c0_14, %c0_15] : memref<1x128xf32, #tpu.memory_space<vmem>>, vector<1x128xf32>
      tpu.vector_store %arg8[%c0_14, %c0_15], %22 {strides = array<i32>} : memref<1x128xf32, #tpu.memory_space<vmem>>, vector<1x128xf32>,
      %c0_16 = arith.constant 0 : index
      %c0_17 = arith.constant 0 : index
      %24 = vector.load %arg9[%c0_16, %c0_17] : memref<1x128xf32, #tpu.memory_space<vmem>>, vector<1x128xf32>
      %25 = arith.mulf %7, %7 : vector<256x128xf32>
      %cst_18 = arith.constant dense<0.000000e+00> : vector<128xf32>
      %26 = vector.multi_reduction <add>, %25, %cst_18 [0] : vector<256x128xf32> to vector<128xf32>
      %27 = vector.shape_cast %26 : vector<128xf32> to vector<1x128xf32>
      %28 = arith.addf %24, %27 : vector<1x128xf32>
      %c0_19 = arith.constant 0 : index
      %c0_20 = arith.constant 0 : index
      %29 = vector.load %arg9[%c0_19, %c0_20] : memref<1x128xf32, #tpu.memory_space<vmem>>, vector<1x128xf32>
      tpu.vector_store %arg9[%c0_19, %c0_20], %28 {strides = array<i32>} : memref<1x128xf32, #tpu.memory_space<vmem>>, vector<1x128xf32>,
    } else {
    }
    %c1_i32 = arith.constant 1 : i32
    %11 = arith.cmpi eq, %arg1, %c1_i32 : i32
    %c0_i32_7 = arith.constant 0 : i32
    %12 = arith.cmpi eq, %arg2, %c0_i32_7 : i32
    %13 = arith.andi %11, %12 : i1
    %14 = arith.extui %13 : i1 to i32
    %c0_i32_8 = arith.constant 0 : i32
    %15 = arith.cmpi ne, %14, %c0_i32_8 : i32
    scf.if %15 {
      %c0_11 = arith.constant 0 : index
      %c0_12 = arith.constant 0 : index
      %19 = vector.load %arg8[%c0_11, %c0_12] : memref<1x128xf32, #tpu.memory_space<vmem>>, vector<1x128xf32>
      %cst_13 = arith.constant 0.001953125 : f32
      %20 = vector.broadcast %cst_13 : f32 to vector<1x128xf32>
      %21 = arith.mulf %19, %20 : vector<1x128xf32>
      %c0_14 = arith.constant 0 : index
      %c0_15 = arith.constant 0 : index
      %22 = vector.load %arg9[%c0_14, %c0_15] : memref<1x128xf32, #tpu.memory_space<vmem>>, vector<1x128xf32>
      %cst_16 = arith.constant 0.001953125 : f32
      %23 = vector.broadcast %cst_16 : f32 to vector<1x128xf32>
      %24 = arith.mulf %22, %23 : vector<1x128xf32>
      %25 = arith.mulf %21, %21 : vector<1x128xf32>
      %26 = arith.subf %24, %25 : vector<1x128xf32>
      %cst_17 = arith.constant 0.000000e+00 : f32
      %27 = vector.broadcast %cst_17 : f32 to vector<1x128xf32>
      %28 = arith.maximumf %26, %27 : vector<1x128xf32>
      %c0_18 = arith.constant 0 : index
      %c0_19 = arith.constant 0 : index
      %29 = vector.load %arg5[%c0_18, %c0_19] : memref<1x128xf32, #tpu.memory_space<vmem>>, vector<1x128xf32>
      %cst_20 = arith.constant 9.99999974E-6 : f32
      %30 = vector.broadcast %cst_20 : f32 to vector<1x128xf32>
      %31 = arith.addf %28, %30 : vector<1x128xf32>
      %32 = math.rsqrt %31 : vector<1x128xf32>
      %33 = arith.mulf %29, %32 : vector<1x128xf32>
      %c0_21 = arith.constant 0 : index
      %c0_22 = arith.constant 0 : index
      %34 = vector.load %arg6[%c0_21, %c0_22] : memref<1x128xf32, #tpu.memory_space<vmem>>, vector<1x128xf32>
      %35 = arith.mulf %21, %33 : vector<1x128xf32>
      %36 = arith.subf %34, %35 : vector<1x128xf32>
      %c0_23 = arith.constant 0 : index
      %c0_24 = arith.constant 0 : index
      %37 = vector.load %arg9[%c0_23, %c0_24] : memref<1x128xf32, #tpu.memory_space<vmem>>, vector<1x128xf32>
      tpu.vector_store %arg9[%c0_23, %c0_24], %36 {strides = array<i32>} : memref<1x128xf32, #tpu.memory_space<vmem>>, vector<1x128xf32>,
      %c0_25 = arith.constant 0 : index
      %c0_26 = arith.constant 0 : index
      %38 = vector.load %arg8[%c0_25, %c0_26] : memref<1x128xf32, #tpu.memory_space<vmem>>, vector<1x128xf32>
      tpu.vector_store %arg8[%c0_25, %c0_26], %33 {strides = array<i32>} : memref<1x128xf32, #tpu.memory_space<vmem>>, vector<1x128xf32>,
    } else {
    }
    %c1_i32_9 = arith.constant 1 : i32
    %16 = arith.cmpi eq, %arg1, %c1_i32_9 : i32
    %17 = arith.extui %16 : i1 to i32
    %c0_i32_10 = arith.constant 0 : i32
    %18 = arith.cmpi ne, %17, %c0_i32_10 : i32
    scf.if %18 {
      %c0_11 = arith.constant 0 : index
      %c0_12 = arith.constant 0 : index
      %19 = vector.load %arg8[%c0_11, %c0_12] : memref<1x128xf32, #tpu.memory_space<vmem>>, vector<1x128xf32>
      %20 = vector.broadcast %19 : vector<1x128xf32> to vector<256x128xf32>
      %21 = arith.mulf %7, %20 : vector<256x128xf32>
      %c0_13 = arith.constant 0 : index
      %c0_14 = arith.constant 0 : index
      %22 = vector.load %arg9[%c0_13, %c0_14] : memref<1x128xf32, #tpu.memory_space<vmem>>, vector<1x128xf32>
      %23 = vector.broadcast %22 : vector<1x128xf32> to vector<256x128xf32>
      %24 = arith.addf %21, %23 : vector<256x128xf32>
      %25 = arith.truncf %24 : vector<256x128xf32> to vector<256x128xbf16>
      %c0_15 = arith.constant 0 : index
      %c0_16 = arith.constant 0 : index
      %26 = vector.load %arg7[%c0_15, %c0_16] : memref<256x128xbf16, #tpu.memory_space<vmem>>, vector<256x128xbf16>
      tpu.vector_store %arg7[%c0_15, %c0_16], %25 {strides = array<i32>} : memref<256x128xbf16, #tpu.memory_space<vmem>>, vector<256x128xbf16>,
    } else {
    }
    return
  }
  func.func @transform_0(%arg0: i32, %arg1: i32, %arg2: i32) -> (i32, i32) {
    %c0_i32 = arith.constant 0 : i32
    %c0_i32_0 = arith.constant 0 : i32
    return %arg2, %c0_i32 : i32, i32
  }
  func.func @transform_1(%arg0: i32, %arg1: i32, %arg2: i32) -> (i32, i32) {
    %c0_i32 = arith.constant 0 : i32
    %c0_i32_0 = arith.constant 0 : i32
    return %c0_i32, %arg0 : i32, i32
  }
  func.func @transform_2(%arg0: i32, %arg1: i32, %arg2: i32) -> (i32, i32) {
    %c0_i32 = arith.constant 0 : i32
    %c0_i32_0 = arith.constant 0 : i32
    return %c0_i32, %arg0 : i32, i32
  }
  func.func @transform_3(%arg0: i32, %arg1: i32, %arg2: i32) -> (i32, i32) {
    %c0_i32 = arith.constant 0 : i32
    %c0_i32_0 = arith.constant 0 : i32
    return %c0_i32, %arg0 : i32, i32
  }
  func.func @transform_4(%arg0: i32, %arg1: i32, %arg2: i32) -> (i32, i32) {
    %0 = arith.muli %arg1, %arg2 : i32
    %c0_i32 = arith.constant 0 : i32
    return %0, %arg0 : i32, i32
  }
}

module attributes {stable_mosaic.version = 11 : i64} {
  func.func @_fused_mm_bn_kernel(%arg0: i32, %arg1: i32, %arg2: i32, %arg3: memref<256x1152xbf16, #tpu.memory_space<vmem>>, %arg4: memref<1152x128xbf16, #tpu.memory_space<vmem>>, %arg5: memref<1x128xf32, #tpu.memory_space<vmem>>, %arg6: memref<1x128xf32, #tpu.memory_space<vmem>>, %arg7: memref<256x128xbf16, #tpu.memory_space<vmem>>, %arg8: memref<1x128xf32, #tpu.memory_space<vmem>>, %arg9: memref<1x128xf32, #tpu.memory_space<vmem>>) attributes {dimension_semantics = [#tpu.dimension_semantics<parallel>, #tpu.dimension_semantics<arbitrary>, #tpu.dimension_semantics<arbitrary>], iteration_bounds = array<i64: 1, 2, 2>, scalar_prefetch = 0 : i64, scratch_operands = 2 : i64, tpu.core_type = #tpu.core_type<tc>, window_params = [{transform_indices = @transform_0, window_bounds = array<i64: 256, 1152>}, {transform_indices = @transform_1, window_bounds = array<i64: 1152, 128>}, {transform_indices = @transform_2, window_bounds = array<i64: 1, 128>}, {transform_indices = @transform_3, window_bounds = array<i64: 1, 128>}, {transform_indices = @transform_4, window_bounds = array<i64: 256, 128>}]} {
    %c0_i32 = arith.constant 0 : i32
    %0 = arith.cmpi eq, %arg1, %c0_i32 : i32
    %c0_i32_0 = arith.constant 0 : i32
    %1 = arith.cmpi eq, %arg2, %c0_i32_0 : i32
    %2 = arith.andi %0, %1 : i1
    %3 = arith.extui %2 : i1 to i32
    %c0_i32_1 = arith.constant 0 : i32
    %4 = arith.cmpi ne, %3, %c0_i32_1 : i32
    scf.if %4 {
      %cst_11 = arith.constant 0.000000e+00 : f32
      %19 = vector.broadcast %cst_11 : f32 to vector<1x128xf32>
      %c0_12 = arith.constant 0 : index
      %c0_13 = arith.constant 0 : index
      %20 = vector.load %arg8[%c0_12, %c0_13] : memref<1x128xf32, #tpu.memory_space<vmem>>, vector<1x128xf32>
      tpu.vector_store %arg8[%c0_12, %c0_13], %19 {strides = array<i32>} : memref<1x128xf32, #tpu.memory_space<vmem>>, vector<1x128xf32>,
      %cst_14 = arith.constant 0.000000e+00 : f32
      %21 = vector.broadcast %cst_14 : f32 to vector<1x128xf32>
      %c0_15 = arith.constant 0 : index
      %c0_16 = arith.constant 0 : index
      %22 = vector.load %arg9[%c0_15, %c0_16] : memref<1x128xf32, #tpu.memory_space<vmem>>, vector<1x128xf32>
      tpu.vector_store %arg9[%c0_15, %c0_16], %21 {strides = array<i32>} : memref<1x128xf32, #tpu.memory_space<vmem>>, vector<1x128xf32>,
    } else {
    }
    %c0 = arith.constant 0 : index
    %c0_2 = arith.constant 0 : index
    %5 = vector.load %arg3[%c0, %c0_2] : memref<256x1152xbf16, #tpu.memory_space<vmem>>, vector<256x1152xbf16>
    %c0_3 = arith.constant 0 : index
    %c0_4 = arith.constant 0 : index
    %6 = vector.load %arg4[%c0_3, %c0_4] : memref<1152x128xbf16, #tpu.memory_space<vmem>>, vector<1152x128xbf16>
    %cst = arith.constant dense<0.000000e+00> : vector<256x128xf32>
    %7 = tpu.matmul %5, %6, %cst {dimension_numbers = #tpu.dot_dimension_numbers<[1], [0], [0], [1], [0, 0, 1, 1], [], []>} : vector<256x1152xbf16>, vector<1152x128xbf16>, vector<256x128xf32> -> vector<256x128xf32>
    %c0_i32_5 = arith.constant 0 : i32
    %8 = arith.cmpi eq, %arg1, %c0_i32_5 : i32
    %9 = arith.extui %8 : i1 to i32
    %c0_i32_6 = arith.constant 0 : i32
    %10 = arith.cmpi ne, %9, %c0_i32_6 : i32
    scf.if %10 {
      %c0_11 = arith.constant 0 : index
      %c0_12 = arith.constant 0 : index
      %19 = vector.load %arg8[%c0_11, %c0_12] : memref<1x128xf32, #tpu.memory_space<vmem>>, vector<1x128xf32>
      %cst_13 = arith.constant dense<0.000000e+00> : vector<128xf32>
      %20 = vector.multi_reduction <add>, %7, %cst_13 [0] : vector<256x128xf32> to vector<128xf32>
      %21 = vector.shape_cast %20 : vector<128xf32> to vector<1x128xf32>
      %22 = arith.addf %19, %21 : vector<1x128xf32>
      %c0_14 = arith.constant 0 : index
      %c0_15 = arith.constant 0 : index
      %23 = vector.load %arg8[%c0_14, %c0_15] : memref<1x128xf32, #tpu.memory_space<vmem>>, vector<1x128xf32>
      tpu.vector_store %arg8[%c0_14, %c0_15], %22 {strides = array<i32>} : memref<1x128xf32, #tpu.memory_space<vmem>>, vector<1x128xf32>,
      %c0_16 = arith.constant 0 : index
      %c0_17 = arith.constant 0 : index
      %24 = vector.load %arg9[%c0_16, %c0_17] : memref<1x128xf32, #tpu.memory_space<vmem>>, vector<1x128xf32>
      %25 = arith.mulf %7, %7 : vector<256x128xf32>
      %cst_18 = arith.constant dense<0.000000e+00> : vector<128xf32>
      %26 = vector.multi_reduction <add>, %25, %cst_18 [0] : vector<256x128xf32> to vector<128xf32>
      %27 = vector.shape_cast %26 : vector<128xf32> to vector<1x128xf32>
      %28 = arith.addf %24, %27 : vector<1x128xf32>
      %c0_19 = arith.constant 0 : index
      %c0_20 = arith.constant 0 : index
      %29 = vector.load %arg9[%c0_19, %c0_20] : memref<1x128xf32, #tpu.memory_space<vmem>>, vector<1x128xf32>
      tpu.vector_store %arg9[%c0_19, %c0_20], %28 {strides = array<i32>} : memref<1x128xf32, #tpu.memory_space<vmem>>, vector<1x128xf32>,
    } else {
    }
    %c1_i32 = arith.constant 1 : i32
    %11 = arith.cmpi eq, %arg1, %c1_i32 : i32
    %c0_i32_7 = arith.constant 0 : i32
    %12 = arith.cmpi eq, %arg2, %c0_i32_7 : i32
    %13 = arith.andi %11, %12 : i1
    %14 = arith.extui %13 : i1 to i32
    %c0_i32_8 = arith.constant 0 : i32
    %15 = arith.cmpi ne, %14, %c0_i32_8 : i32
    scf.if %15 {
      %c0_11 = arith.constant 0 : index
      %c0_12 = arith.constant 0 : index
      %19 = vector.load %arg8[%c0_11, %c0_12] : memref<1x128xf32, #tpu.memory_space<vmem>>, vector<1x128xf32>
      %cst_13 = arith.constant 0.001953125 : f32
      %20 = vector.broadcast %cst_13 : f32 to vector<1x128xf32>
      %21 = arith.mulf %19, %20 : vector<1x128xf32>
      %c0_14 = arith.constant 0 : index
      %c0_15 = arith.constant 0 : index
      %22 = vector.load %arg9[%c0_14, %c0_15] : memref<1x128xf32, #tpu.memory_space<vmem>>, vector<1x128xf32>
      %cst_16 = arith.constant 0.001953125 : f32
      %23 = vector.broadcast %cst_16 : f32 to vector<1x128xf32>
      %24 = arith.mulf %22, %23 : vector<1x128xf32>
      %25 = arith.mulf %21, %21 : vector<1x128xf32>
      %26 = arith.subf %24, %25 : vector<1x128xf32>
      %cst_17 = arith.constant 0.000000e+00 : f32
      %27 = vector.broadcast %cst_17 : f32 to vector<1x128xf32>
      %28 = arith.maximumf %26, %27 : vector<1x128xf32>
      %c0_18 = arith.constant 0 : index
      %c0_19 = arith.constant 0 : index
      %29 = vector.load %arg5[%c0_18, %c0_19] : memref<1x128xf32, #tpu.memory_space<vmem>>, vector<1x128xf32>
      %cst_20 = arith.constant 9.99999974E-6 : f32
      %30 = vector.broadcast %cst_20 : f32 to vector<1x128xf32>
      %31 = arith.addf %28, %30 : vector<1x128xf32>
      %32 = math.rsqrt %31 : vector<1x128xf32>
      %33 = arith.mulf %29, %32 : vector<1x128xf32>
      %c0_21 = arith.constant 0 : index
      %c0_22 = arith.constant 0 : index
      %34 = vector.load %arg6[%c0_21, %c0_22] : memref<1x128xf32, #tpu.memory_space<vmem>>, vector<1x128xf32>
      %35 = arith.mulf %21, %33 : vector<1x128xf32>
      %36 = arith.subf %34, %35 : vector<1x128xf32>
      %c0_23 = arith.constant 0 : index
      %c0_24 = arith.constant 0 : index
      %37 = vector.load %arg9[%c0_23, %c0_24] : memref<1x128xf32, #tpu.memory_space<vmem>>, vector<1x128xf32>
      tpu.vector_store %arg9[%c0_23, %c0_24], %36 {strides = array<i32>} : memref<1x128xf32, #tpu.memory_space<vmem>>, vector<1x128xf32>,
      %c0_25 = arith.constant 0 : index
      %c0_26 = arith.constant 0 : index
      %38 = vector.load %arg8[%c0_25, %c0_26] : memref<1x128xf32, #tpu.memory_space<vmem>>, vector<1x128xf32>
      tpu.vector_store %arg8[%c0_25, %c0_26], %33 {strides = array<i32>} : memref<1x128xf32, #tpu.memory_space<vmem>>, vector<1x128xf32>,
    } else {
    }
    %c1_i32_9 = arith.constant 1 : i32
    %16 = arith.cmpi eq, %arg1, %c1_i32_9 : i32
    %17 = arith.extui %16 : i1 to i32
    %c0_i32_10 = arith.constant 0 : i32
    %18 = arith.cmpi ne, %17, %c0_i32_10 : i32
    scf.if %18 {
      %c0_11 = arith.constant 0 : index
      %c0_12 = arith.constant 0 : index
      %19 = vector.load %arg8[%c0_11, %c0_12] : memref<1x128xf32, #tpu.memory_space<vmem>>, vector<1x128xf32>
      %20 = vector.broadcast %19 : vector<1x128xf32> to vector<256x128xf32>
      %21 = arith.mulf %7, %20 : vector<256x128xf32>
      %c0_13 = arith.constant 0 : index
      %c0_14 = arith.constant 0 : index
      %22 = vector.load %arg9[%c0_13, %c0_14] : memref<1x128xf32, #tpu.memory_space<vmem>>, vector<1x128xf32>
      %23 = vector.broadcast %22 : vector<1x128xf32> to vector<256x128xf32>
      %24 = arith.addf %21, %23 : vector<256x128xf32>
      %cst_15 = arith.constant 0.000000e+00 : f32
      %25 = vector.broadcast %cst_15 : f32 to vector<256x128xf32>
      %26 = arith.maximumf %24, %25 : vector<256x128xf32>
      %27 = arith.truncf %26 : vector<256x128xf32> to vector<256x128xbf16>
      %c0_16 = arith.constant 0 : index
      %c0_17 = arith.constant 0 : index
      %28 = vector.load %arg7[%c0_16, %c0_17] : memref<256x128xbf16, #tpu.memory_space<vmem>>, vector<256x128xbf16>
      tpu.vector_store %arg7[%c0_16, %c0_17], %27 {strides = array<i32>} : memref<256x128xbf16, #tpu.memory_space<vmem>>, vector<256x128xbf16>,
    } else {
    }
    return
  }
  func.func @transform_0(%arg0: i32, %arg1: i32, %arg2: i32) -> (i32, i32) {
    %c0_i32 = arith.constant 0 : i32
    %c0_i32_0 = arith.constant 0 : i32
    return %arg2, %c0_i32 : i32, i32
  }
  func.func @transform_1(%arg0: i32, %arg1: i32, %arg2: i32) -> (i32, i32) {
    %c0_i32 = arith.constant 0 : i32
    %c0_i32_0 = arith.constant 0 : i32
    return %c0_i32, %arg0 : i32, i32
  }
  func.func @transform_2(%arg0: i32, %arg1: i32, %arg2: i32) -> (i32, i32) {
    %c0_i32 = arith.constant 0 : i32
    %c0_i32_0 = arith.constant 0 : i32
    return %c0_i32, %arg0 : i32, i32
  }
  func.func @transform_3(%arg0: i32, %arg1: i32, %arg2: i32) -> (i32, i32) {
    %c0_i32 = arith.constant 0 : i32
    %c0_i32_0 = arith.constant 0 : i32
    return %c0_i32, %arg0 : i32, i32
  }
  func.func @transform_4(%arg0: i32, %arg1: i32, %arg2: i32) -> (i32, i32) {
    %0 = arith.muli %arg1, %arg2 : i32
    %c0_i32 = arith.constant 0 : i32
    return %0, %arg0 : i32, i32
  }
}

module attributes {stable_mosaic.version = 11 : i64} {
  func.func @_fused_mm_bn_kernel(%arg0: i32, %arg1: i32, %arg2: i32, %arg3: memref<256x128xbf16, #tpu.memory_space<vmem>>, %arg4: memref<128x128xbf16, #tpu.memory_space<vmem>>, %arg5: memref<1x128xf32, #tpu.memory_space<vmem>>, %arg6: memref<1x128xf32, #tpu.memory_space<vmem>>, %arg7: memref<256x128xbf16, #tpu.memory_space<vmem>>, %arg8: memref<256x128xf32, #tpu.memory_space<vmem>>, %arg9: memref<1x128xf32, #tpu.memory_space<vmem>>, %arg10: memref<1x128xf32, #tpu.memory_space<vmem>>) attributes {dimension_semantics = [#tpu.dimension_semantics<parallel>, #tpu.dimension_semantics<arbitrary>, #tpu.dimension_semantics<arbitrary>], iteration_bounds = array<i64: 1, 2, 2>, scalar_prefetch = 0 : i64, scratch_operands = 2 : i64, tpu.core_type = #tpu.core_type<tc>, window_params = [{transform_indices = @transform_0, window_bounds = array<i64: 256, 128>}, {transform_indices = @transform_1, window_bounds = array<i64: 128, 128>}, {transform_indices = @transform_2, window_bounds = array<i64: 1, 128>}, {transform_indices = @transform_3, window_bounds = array<i64: 1, 128>}, {transform_indices = @transform_4, window_bounds = array<i64: 256, 128>}, {transform_indices = @transform_5, window_bounds = array<i64: 256, 128>}]} {
    %c0_i32 = arith.constant 0 : i32
    %0 = arith.cmpi eq, %arg1, %c0_i32 : i32
    %c0_i32_0 = arith.constant 0 : i32
    %1 = arith.cmpi eq, %arg2, %c0_i32_0 : i32
    %2 = arith.andi %0, %1 : i1
    %3 = arith.extui %2 : i1 to i32
    %c0_i32_1 = arith.constant 0 : i32
    %4 = arith.cmpi ne, %3, %c0_i32_1 : i32
    scf.if %4 {
      %cst_11 = arith.constant 0.000000e+00 : f32
      %19 = vector.broadcast %cst_11 : f32 to vector<1x128xf32>
      %c0_12 = arith.constant 0 : index
      %c0_13 = arith.constant 0 : index
      %20 = vector.load %arg9[%c0_12, %c0_13] : memref<1x128xf32, #tpu.memory_space<vmem>>, vector<1x128xf32>
      tpu.vector_store %arg9[%c0_12, %c0_13], %19 {strides = array<i32>} : memref<1x128xf32, #tpu.memory_space<vmem>>, vector<1x128xf32>,
      %cst_14 = arith.constant 0.000000e+00 : f32
      %21 = vector.broadcast %cst_14 : f32 to vector<1x128xf32>
      %c0_15 = arith.constant 0 : index
      %c0_16 = arith.constant 0 : index
      %22 = vector.load %arg10[%c0_15, %c0_16] : memref<1x128xf32, #tpu.memory_space<vmem>>, vector<1x128xf32>
      tpu.vector_store %arg10[%c0_15, %c0_16], %21 {strides = array<i32>} : memref<1x128xf32, #tpu.memory_space<vmem>>, vector<1x128xf32>,
    } else {
    }
    %c0 = arith.constant 0 : index
    %c0_2 = arith.constant 0 : index
    %5 = vector.load %arg3[%c0, %c0_2] : memref<256x128xbf16, #tpu.memory_space<vmem>>, vector<256x128xbf16>
    %c0_3 = arith.constant 0 : index
    %c0_4 = arith.constant 0 : index
    %6 = vector.load %arg4[%c0_3, %c0_4] : memref<128x128xbf16, #tpu.memory_space<vmem>>, vector<128x128xbf16>
    %cst = arith.constant dense<0.000000e+00> : vector<256x128xf32>
    %7 = tpu.matmul %5, %6, %cst {dimension_numbers = #tpu.dot_dimension_numbers<[1], [0], [0], [1], [0, 0, 1, 1], [], []>} : vector<256x128xbf16>, vector<128x128xbf16>, vector<256x128xf32> -> vector<256x128xf32>
    %c0_i32_5 = arith.constant 0 : i32
    %8 = arith.cmpi eq, %arg1, %c0_i32_5 : i32
    %9 = arith.extui %8 : i1 to i32
    %c0_i32_6 = arith.constant 0 : i32
    %10 = arith.cmpi ne, %9, %c0_i32_6 : i32
    scf.if %10 {
      %c0_11 = arith.constant 0 : index
      %c0_12 = arith.constant 0 : index
      %19 = vector.load %arg9[%c0_11, %c0_12] : memref<1x128xf32, #tpu.memory_space<vmem>>, vector<1x128xf32>
      %cst_13 = arith.constant dense<0.000000e+00> : vector<128xf32>
      %20 = vector.multi_reduction <add>, %7, %cst_13 [0] : vector<256x128xf32> to vector<128xf32>
      %21 = vector.shape_cast %20 : vector<128xf32> to vector<1x128xf32>
      %22 = arith.addf %19, %21 : vector<1x128xf32>
      %c0_14 = arith.constant 0 : index
      %c0_15 = arith.constant 0 : index
      %23 = vector.load %arg9[%c0_14, %c0_15] : memref<1x128xf32, #tpu.memory_space<vmem>>, vector<1x128xf32>
      tpu.vector_store %arg9[%c0_14, %c0_15], %22 {strides = array<i32>} : memref<1x128xf32, #tpu.memory_space<vmem>>, vector<1x128xf32>,
      %c0_16 = arith.constant 0 : index
      %c0_17 = arith.constant 0 : index
      %24 = vector.load %arg10[%c0_16, %c0_17] : memref<1x128xf32, #tpu.memory_space<vmem>>, vector<1x128xf32>
      %25 = arith.mulf %7, %7 : vector<256x128xf32>
      %cst_18 = arith.constant dense<0.000000e+00> : vector<128xf32>
      %26 = vector.multi_reduction <add>, %25, %cst_18 [0] : vector<256x128xf32> to vector<128xf32>
      %27 = vector.shape_cast %26 : vector<128xf32> to vector<1x128xf32>
      %28 = arith.addf %24, %27 : vector<1x128xf32>
      %c0_19 = arith.constant 0 : index
      %c0_20 = arith.constant 0 : index
      %29 = vector.load %arg10[%c0_19, %c0_20] : memref<1x128xf32, #tpu.memory_space<vmem>>, vector<1x128xf32>
      tpu.vector_store %arg10[%c0_19, %c0_20], %28 {strides = array<i32>} : memref<1x128xf32, #tpu.memory_space<vmem>>, vector<1x128xf32>,
    } else {
    }
    %c1_i32 = arith.constant 1 : i32
    %11 = arith.cmpi eq, %arg1, %c1_i32 : i32
    %c0_i32_7 = arith.constant 0 : i32
    %12 = arith.cmpi eq, %arg2, %c0_i32_7 : i32
    %13 = arith.andi %11, %12 : i1
    %14 = arith.extui %13 : i1 to i32
    %c0_i32_8 = arith.constant 0 : i32
    %15 = arith.cmpi ne, %14, %c0_i32_8 : i32
    scf.if %15 {
      %c0_11 = arith.constant 0 : index
      %c0_12 = arith.constant 0 : index
      %19 = vector.load %arg9[%c0_11, %c0_12] : memref<1x128xf32, #tpu.memory_space<vmem>>, vector<1x128xf32>
      %cst_13 = arith.constant 0.001953125 : f32
      %20 = vector.broadcast %cst_13 : f32 to vector<1x128xf32>
      %21 = arith.mulf %19, %20 : vector<1x128xf32>
      %c0_14 = arith.constant 0 : index
      %c0_15 = arith.constant 0 : index
      %22 = vector.load %arg10[%c0_14, %c0_15] : memref<1x128xf32, #tpu.memory_space<vmem>>, vector<1x128xf32>
      %cst_16 = arith.constant 0.001953125 : f32
      %23 = vector.broadcast %cst_16 : f32 to vector<1x128xf32>
      %24 = arith.mulf %22, %23 : vector<1x128xf32>
      %25 = arith.mulf %21, %21 : vector<1x128xf32>
      %26 = arith.subf %24, %25 : vector<1x128xf32>
      %cst_17 = arith.constant 0.000000e+00 : f32
      %27 = vector.broadcast %cst_17 : f32 to vector<1x128xf32>
      %28 = arith.maximumf %26, %27 : vector<1x128xf32>
      %c0_18 = arith.constant 0 : index
      %c0_19 = arith.constant 0 : index
      %29 = vector.load %arg5[%c0_18, %c0_19] : memref<1x128xf32, #tpu.memory_space<vmem>>, vector<1x128xf32>
      %cst_20 = arith.constant 9.99999974E-6 : f32
      %30 = vector.broadcast %cst_20 : f32 to vector<1x128xf32>
      %31 = arith.addf %28, %30 : vector<1x128xf32>
      %32 = math.rsqrt %31 : vector<1x128xf32>
      %33 = arith.mulf %29, %32 : vector<1x128xf32>
      %c0_21 = arith.constant 0 : index
      %c0_22 = arith.constant 0 : index
      %34 = vector.load %arg6[%c0_21, %c0_22] : memref<1x128xf32, #tpu.memory_space<vmem>>, vector<1x128xf32>
      %35 = arith.mulf %21, %33 : vector<1x128xf32>
      %36 = arith.subf %34, %35 : vector<1x128xf32>
      %c0_23 = arith.constant 0 : index
      %c0_24 = arith.constant 0 : index
      %37 = vector.load %arg10[%c0_23, %c0_24] : memref<1x128xf32, #tpu.memory_space<vmem>>, vector<1x128xf32>
      tpu.vector_store %arg10[%c0_23, %c0_24], %36 {strides = array<i32>} : memref<1x128xf32, #tpu.memory_space<vmem>>, vector<1x128xf32>,
      %c0_25 = arith.constant 0 : index
      %c0_26 = arith.constant 0 : index
      %38 = vector.load %arg9[%c0_25, %c0_26] : memref<1x128xf32, #tpu.memory_space<vmem>>, vector<1x128xf32>
      tpu.vector_store %arg9[%c0_25, %c0_26], %33 {strides = array<i32>} : memref<1x128xf32, #tpu.memory_space<vmem>>, vector<1x128xf32>,
    } else {
    }
    %c1_i32_9 = arith.constant 1 : i32
    %16 = arith.cmpi eq, %arg1, %c1_i32_9 : i32
    %17 = arith.extui %16 : i1 to i32
    %c0_i32_10 = arith.constant 0 : i32
    %18 = arith.cmpi ne, %17, %c0_i32_10 : i32
    scf.if %18 {
      %c0_11 = arith.constant 0 : index
      %c0_12 = arith.constant 0 : index
      %19 = vector.load %arg9[%c0_11, %c0_12] : memref<1x128xf32, #tpu.memory_space<vmem>>, vector<1x128xf32>
      %20 = vector.broadcast %19 : vector<1x128xf32> to vector<256x128xf32>
      %21 = arith.mulf %7, %20 : vector<256x128xf32>
      %c0_13 = arith.constant 0 : index
      %c0_14 = arith.constant 0 : index
      %22 = vector.load %arg10[%c0_13, %c0_14] : memref<1x128xf32, #tpu.memory_space<vmem>>, vector<1x128xf32>
      %23 = vector.broadcast %22 : vector<1x128xf32> to vector<256x128xf32>
      %24 = arith.addf %21, %23 : vector<256x128xf32>
      %c0_15 = arith.constant 0 : index
      %c0_16 = arith.constant 0 : index
      %25 = vector.load %arg7[%c0_15, %c0_16] : memref<256x128xbf16, #tpu.memory_space<vmem>>, vector<256x128xbf16>
      %26 = arith.extf %25 : vector<256x128xbf16> to vector<256x128xf32>
      %27 = arith.addf %24, %26 : vector<256x128xf32>
      %cst_17 = arith.constant 0.000000e+00 : f32
      %28 = vector.broadcast %cst_17 : f32 to vector<256x128xf32>
      %29 = arith.maximumf %27, %28 : vector<256x128xf32>
      %c0_18 = arith.constant 0 : index
      %c0_19 = arith.constant 0 : index
      %30 = vector.load %arg8[%c0_18, %c0_19] : memref<256x128xf32, #tpu.memory_space<vmem>>, vector<256x128xf32>
      tpu.vector_store %arg8[%c0_18, %c0_19], %29 {strides = array<i32>} : memref<256x128xf32, #tpu.memory_space<vmem>>, vector<256x128xf32>,
    } else {
    }
    return
  }
  func.func @transform_0(%arg0: i32, %arg1: i32, %arg2: i32) -> (i32, i32) {
    %c0_i32 = arith.constant 0 : i32
    %c0_i32_0 = arith.constant 0 : i32
    return %arg2, %c0_i32 : i32, i32
  }
  func.func @transform_1(%arg0: i32, %arg1: i32, %arg2: i32) -> (i32, i32) {
    %c0_i32 = arith.constant 0 : i32
    %c0_i32_0 = arith.constant 0 : i32
    return %c0_i32, %arg0 : i32, i32
  }
  func.func @transform_2(%arg0: i32, %arg1: i32, %arg2: i32) -> (i32, i32) {
    %c0_i32 = arith.constant 0 : i32
    %c0_i32_0 = arith.constant 0 : i32
    return %c0_i32, %arg0 : i32, i32
  }
  func.func @transform_3(%arg0: i32, %arg1: i32, %arg2: i32) -> (i32, i32) {
    %c0_i32 = arith.constant 0 : i32
    %c0_i32_0 = arith.constant 0 : i32
    return %c0_i32, %arg0 : i32, i32
  }
  func.func @transform_4(%arg0: i32, %arg1: i32, %arg2: i32) -> (i32, i32) {
    %0 = arith.muli %arg1, %arg2 : i32
    %c0_i32 = arith.constant 0 : i32
    return %0, %arg0 : i32, i32
  }
  func.func @transform_5(%arg0: i32, %arg1: i32, %arg2: i32) -> (i32, i32) {
    %0 = arith.muli %arg1, %arg2 : i32
    %c0_i32 = arith.constant 0 : i32
    return %0, %arg0 : i32, i32
  }
}

</mosaic_0001>

<bundles_post_ra>
// kernel: a_call__.4
= control target key start
LH: loop header
LB: loop body
LE: loop exit
PB: predicated region body
PF: predicated region fallthrough
CT: control target
= control target key end

     0   :  { %9 = vsyncpa [#allocation5], 0  ;;  %s2132_s0 = inlined_call_operand.vmem [shape: bf16[512,128], index: 0, kind: input, shape index: {}]   ;;  %s2133_s1 = inlined_call_operand.hbm [shape: bf16[128,128], index: 1, kind: input, shape index: {}]   ;;  %s2134_s2 = inlined_call_operand.hbm [shape: f32[1,128], index: 2, kind: input, shape index: {}]   ;;  %s2135_s3 = inlined_call_operand.vmem [shape: f32[1,128], index: 3, kind: input, shape index: {}]   ;;  %s2136_s4 = inlined_call_operand.vmem [shape: bf16[512,128], index: 4, kind: output, shape index: {}]  }
   0x1   :  { %10 = vsyncpa [#allocation7], 0  ;;  %s1697_s15 = smov 0   ;;  %s1699_s16 = smov 0  }
   0x2   :  { %s1701_s17 = smov 0   ;;  %s1703_s18 = smov 0  }
   0x3   :  { %s1705_s19 = smov 0  }
   0x4 LB: > { %s1182_s20 = sadd.s32 4294967295, %s1665_s19   ;;  %s28_s21 = sadd.s32 1, %s1657_s17  ;;  %s1665_s19 = sphi %s1705_s19, %s16_s19   ;;  %s1661_s18 = sphi %s1703_s18, %s2148_s18   ;;  %s1657_s17 = sphi %s1701_s17, %s2147_s17   ;;  %s1653_s16 = sphi %s1699_s16, %s2146_s16   ;;  %s1649_s15 = sphi %s1697_s15, %s2145_s15  }
   0x5   : > { %p29_p0 = scmp.ge.s32.totalorder %s28_s21, 2  ;;  %s31_s22 = sadd.s32 1, %s1661_s18 }
   0x6   : > { %p1184_p1 = scmp.ge.s32.totalorder %s1665_s19, 1  ;;  %p174_p2 = scmp.lt.s32.totalorder %s1665_s19, 5 }
   0x7   : > { %s2150_s21 = smov (%p29_p0, %s28_s21), 0  ;;  %s2152_s22 = smov (!%p29_p0, %s31_s22), %s1661_s18 }
   0x8   : > { %p1730_p3 = pnand %p1184_p1, %p174_p2  ;;  %p33_p4 = scmp.ge.s32.totalorder %s2152_s22, 2 }
   0x9   : > { %p1734_p5 = scmp.eq.s32.totalorder %s1182_s20, 0  ;;  %s1667_s25 = smov [#allocation4]  }
   0xa   : > { %s2140_s23 = scalar_select %p1730_p3, 1, 0 }
   0xb   : > { %s2141_s24 = scalar_select %p1734_p5, 1, 0 }
   0xc   : > { %p1481_p6 = pneg %p1730_p3  ;;  %s2154_s22 = smov (%p33_p4, %s2152_s22), 0 }
   0xd   : > { %s188_s26 = sshll.u32 %s1667_s25, 4  ;;  %s1563_s30 = scalar_lea.hbm %s2133_s1, 1024  ;;  %s189_s26 = int_to_ptr.vmem [resolvable:$true] %s188_s26 }
   0xe   : > { %p1744_p7 = pnand %p1734_p5, %p1481_p6  ;;  %p1564_p8 = scmp.ne.s32.totalorder %s2133_s1, %s1563_s30 }
   0xf   : > { %p1570_p12 = scmp.lt.u32.totalorder %s1563_s30, %s2133_s1 }
  0x10   : > { %p1565_p9 = pneg %p1744_p7 }
  0x12   : > { %p1566_p10 = pnand %p1565_p9, %p1564_p8 }
  0x14   : > { %p1567_p11 = pneg %p1566_p10 }
  0x16   : > { %p1572_p13 = pnand %p1570_p12, %p1567_p11 }
  0x18   : > { %1575 = shalt.err (!%p1572_p13)
}
  0x19   : > { %s1576_s9 = scalar_lea.vmem %s189_s26, 1024  ;;  %p1584_p4 = scmp.lt.s32.totalorder %s189_s26, %s189_s26 }
  0x1a   : > { %p1577_p0 = scmp.ne.s32.totalorder %s189_s26, %s1576_s9  ;;  %p1585_p6 = scmp.lt.s32.totalorder %s1576_s9, %s1576_s9 }
  0x1c   : > { %p1579_p1 = pnand %p1577_p0, %p1565_p9  ;;  %p1586_p5 = por %p1585_p6, %p1584_p4 }
  0x1e   : > { %p1580_p2 = pneg %p1579_p1 }
  0x20   : > { %p1587_p3 = pnand %p1586_p5, %p1580_p2 }
  0x22   : > { %1590 = shalt.err (!%p1587_p3)
}
  0x23   : > { %s1668_s10 = smov 64   ;;  %s1669_s11 = smov 4  }
  0x24   : > { %1484 = dma.hbm_to_vmem [thread:$0]  (!%p1744_p7), %s2133_s1, 1024, %s189_s26, [#allocation5], %s1668_s10, %s1668_s10, %s1669_s11  }
  0x25   : > { %s1670_s14 = smov [#allocation6]   ;;  %s1591_s29 = scalar_lea.hbm %s2134_s2, 16 }
  0x26   : > { %s204_s20 = sshll.u32 %s1670_s14, 4  ;;  %p1592_p3 = scmp.ne.s32.totalorder %s2134_s2, %s1591_s29  ;;  %s205_s20 = int_to_ptr.vmem [resolvable:$true] %s204_s20 }
  0x27   : > { %p1598_p10 = scmp.lt.u32.totalorder %s1591_s29, %s2134_s2 }
  0x28   : > { %p1594_p5 = pnand %p1592_p3, %p1565_p9 }
  0x2a   : > { %p1595_p8 = pneg %p1594_p5 }
  0x2c   : > { %p1600_p11 = pnand %p1598_p10, %p1595_p8 }
  0x2e   : > { %1603 = shalt.err (!%p1600_p11)
}
  0x2f   : > { %s1604_s26 = scalar_lea.vmem %s205_s20, 16  ;;  %s1611_s8 = scalar_lea.vmem %s205_s20, 32 }
  0x30   : > { %p1605_p12 = scmp.ne.s32.totalorder %s205_s20, %s1604_s26  ;;  %p1612_p1 = scmp.lt.s32.totalorder %s205_s20, %s205_s20 }
  0x31   : > { %p1613_p2 = scmp.lt.s32.totalorder %s1611_s8, %s1604_s26 }
  0x32   : > { %p1607_p13 = pnand %p1605_p12, %p1565_p9 }
  0x33   : > { %p1614_p4 = por %p1613_p2, %p1612_p1 }
  0x34   : > { %p1608_p0 = pneg %p1607_p13 }
  0x36   : > { %p1615_p6 = pnand %p1614_p4, %p1608_p0 }
  0x38   : > { %1618 = shalt.err (!%p1615_p6)
}
  0x39   : > { %1487 = dma.hbm_to_vmem [thread:$0]  (!%p1744_p7), %s2134_s2, 16, %s205_s20, [#allocation7]  }
  0x3a   : > { %p2143_p3 = scmp.ne.s32.totalorder %s2140_s23, 0 }
  0x3b   : > { %p2144_p5 = scmp.ne.s32.totalorder (!%p2143_p3), %s2141_s24, 0 }
  0x3c   : > { %232 = sbr.rel (%p2143_p3) target bundleno = 479 (0x1df), region = 36 }
  0x43   : > { %1640 = dma.done.wait (%p2144_p5), [#allocation5], 1024  }
  0x44   : > { %1642 = vsyncadd (%p2144_p5), [#allocation5], 4294966272 }
  0x45   : > { %1644 = dma.done.wait (%p2144_p5), [#allocation7], 16  }
  0x46   : > { %1646 = vsyncadd (%p2144_p5), [#allocation7], 4294967280  ;;  %s1192_s23 = sshll.u32 %s1649_s15, 5  ;;  %s278_s27 = smul.u32 %s1649_s15, %s1653_s16 }
  0x47   : > { %p270_p7 = scmp.lt.s32.totalorder %s1192_s23, 63  ;;  %p290_p9 = scmp.eq.s32.totalorder %s1653_s16, 0 }
  0x48   : > { %s1194_s11 = sshll.u32 %s278_s27, 5  ;;  %p291_p8 = scmp.eq.s32.totalorder %s1649_s15, 0 }
  0x49   : > { %s2156_s23 = smov (!%p270_p7, %s1192_s23), 63  ;;  %p280_p10 = scmp.lt.s32.totalorder %s1194_s11, 63 }
  0x4a   : > { %p292_p11 = pnand %p291_p8, %p290_p9  ;;  %s1193_s12 = sshll.u32 %s2156_s23, 2 }
  0x4b   : > { %s1810_s14 = scalar_lea.vmem %s2132_s0, %s1193_s12  ;;  %s2158_s11 = smov (!%p280_p10, %s1194_s11), 63  ;;  %v1671_v0 = vmov (!%p292_p11), 0.0  }
  0x4c   : > { %s1195_s20 = sshll.u32 %s2158_s11, 2  ;;  %295 = sbr.rel (%p292_p11) target bundleno = 83 (0x53), region = 48  ;;  %296 = vst [vmem:[#allocation2] sm:$0x1] (!%p292_p11), %v1671_v0  ;;  %297 = vst [vmem:[#allocation3] sm:$0x1] (!%p292_p11), %v1671_v0 }
  0x4d   : > { %s1815_s29 = scalar_lea.vmem %s2136_s4, %s1195_s20 }
  0x53 PF: > { %v1537_v1 = vld [vmem:[#allocation4] sm:$0xff]   ;;  %v1538_v2 = vld [vmem:[#allocation4 + $0x8] sm:$0xff]   ;;  %v1539_v3 = vld [vmem:[#allocation4 + $0x10] sm:$0xff]   ;;  %p1220_p12 = scmp.ne.s32.totalorder %s1653_s16, 0 }
  0x54   : > { %1409 = vmatprep.subr.bf16.mxu0 %v1537_v1  ;;  %1457 = vmatprep.subr.bf16.mxu1 %v1537_v1  ;;  %v1540_v4 = vld [vmem:[#allocation4 + $0x18] sm:$0xff]   ;;  %v1541_v7 = vld [vmem:[#allocation4 + $0x20] sm:$0xff]   ;;  %v1542_v8 = vld [vmem:[#allocation4 + $0x28] sm:$0xff]  }
  0x55   : > { %1410 = vmatpush3.bf16.msra.mxu0 %v1537_v1  ;;  %1465 = vmatpush3.bf16.msra.mxu1 %v1537_v1  ;;  %v1545_v5 = vld [vmem:[%s1810_s14] sm:$0xff]   ;;  %v1543_v9 = vld [vmem:[#allocation4 + $0x30] sm:$0xff]   ;;  %v1547_v11 = vld [vmem:[%s1810_s14 + $0x8] sm:$0xff]  }
  0x56   : > { %1411 = vmatprep.subr.bf16.mxu0 %v1538_v2  ;;  %1458 = vmatprep.subr.bf16.mxu1 %v1538_v2  ;;  %v1546_v6 = vld [vmem:[%s1810_s14 + $0x40] sm:$0xff]   ;;  %v1548_v12 = vld [vmem:[%s1810_s14 + $0x48] sm:$0xff]   ;;  %v1549_v13 = vld [vmem:[%s1810_s14 + $0x10] sm:$0xff]  }
  0x57   : > { %1425 = vmatprep.mubr.bf16.mxu0 %v1545_v5  ;;  %1441 = vmatprep.mubr.bf16.mxu1 %v1546_v6  ;;  %v1544_v10 = vld [vmem:[#allocation4 + $0x38] sm:$0xff]   ;;  %v1550_v14 = vld [vmem:[%s1810_s14 + $0x50] sm:$0xff]   ;;  %v1555_v19 = vld [vmem:[%s1810_s14 + $0x28] sm:$0xff]  }
  0x58   : > { %v1551_v15 = vld [vmem:[%s1810_s14 + $0x18] sm:$0xff]   ;;  %v1553_v17 = vld [vmem:[%s1810_s14 + $0x20] sm:$0xff]   ;;  %v1556_v20 = vld [vmem:[%s1810_s14 + $0x68] sm:$0xff]  }
  0x59   : > { %1412 = vmatpush3.bf16.msra.mxu0 %v1538_v2  ;;  %1466 = vmatpush3.bf16.msra.mxu1 %v1538_v2  ;;  %v1552_v16 = vld [vmem:[%s1810_s14 + $0x58] sm:$0xff]   ;;  %v1554_v18 = vld [vmem:[%s1810_s14 + $0x60] sm:$0xff]   ;;  %v1557_v21 = vld [vmem:[%s1810_s14 + $0x30] sm:$0xff]  }
  0x5a   : > { %1413 = vmatprep.subr.bf16.mxu0 %v1539_v3  ;;  %1459 = vmatprep.subr.bf16.mxu1 %v1539_v3  ;;  %v1558_v22 = vld [vmem:[%s1810_s14 + $0x70] sm:$0xff]   ;;  %v1559_v23 = vld [vmem:[%s1810_s14 + $0x38] sm:$0xff]  }
  0x5b   : > { %v1560_v24 = vld [vmem:[%s1810_s14 + $0x78] sm:$0xff]  }
  0x5d   : > { %1414 = vmatpush3.bf16.msra.mxu0 %v1539_v3  ;;  %1467 = vmatpush3.bf16.msra.mxu1 %v1539_v3 }
  0x5e   : > { %1415 = vmatprep.subr.bf16.mxu0 %v1540_v4  ;;  %1460 = vmatprep.subr.bf16.mxu1 %v1540_v4 }
  0x61   : > { %1416 = vmatpush3.bf16.msra.mxu0 %v1540_v4  ;;  %1468 = vmatpush3.bf16.msra.mxu1 %v1540_v4 }
  0x62   : > { %1417 = vmatprep.subr.bf16.mxu0 %v1541_v7  ;;  %1461 = vmatprep.subr.bf16.mxu1 %v1541_v7 }
  0x65   : > { %1418 = vmatpush3.bf16.msra.mxu0 %v1541_v7  ;;  %1469 = vmatpush3.bf16.msra.mxu1 %v1541_v7 }
  0x66   : > { %1419 = vmatprep.subr.bf16.mxu0 %v1542_v8  ;;  %1462 = vmatprep.subr.bf16.mxu1 %v1542_v8 }
  0x69   : > { %1420 = vmatpush3.bf16.msra.mxu0 %v1542_v8  ;;  %1470 = vmatpush3.bf16.msra.mxu1 %v1542_v8 }
  0x6a   : > { %1421 = vmatprep.subr.bf16.mxu0 %v1543_v9  ;;  %1463 = vmatprep.subr.bf16.mxu1 %v1543_v9 }
  0x6d   : > { %1422 = vmatpush3.bf16.msra.mxu0 %v1543_v9  ;;  %1471 = vmatpush3.bf16.msra.mxu1 %v1543_v9 }
  0x6e   : > { %1423 = vmatprep.subr.bf16.mxu0 %v1544_v10  ;;  %1464 = vmatprep.subr.bf16.mxu1 %v1544_v10 }
  0x71   : > { %1424 = vmatpush3.bf16.msra.mxu0 %v1544_v10  ;;  %1472 = vmatpush3.bf16.msra.mxu1 %v1544_v10 }
  0x74   : > { %1426 = vmatmul.mubr.bf16.vlgmr.msra.gmra.mrb[0].mxu0 %v1547_v11  ;;  %1442 = vmatmul.mubr.bf16.vlgmr.msra.gmra.mrb[0].mxu1 %v1548_v12 }
  0x75   : > { %1429 = vmatprep.mubr.bf16.mxu0 %v1549_v13  ;;  %1445 = vmatprep.mubr.bf16.mxu1 %v1550_v14 }
  0x7c   : > { %1430 = vmatmul.mubr.bf16.gmra.mrb[4].mxu0 %v1551_v15  ;;  %1446 = vmatmul.mubr.bf16.gmra.mrb[4].mxu1 %v1552_v16 }
  0x7d   : > { %1433 = vmatprep.mubr.bf16.mxu0 %v1553_v17  ;;  %1449 = vmatprep.mubr.bf16.mxu1 %v1554_v18 }
  0x84   : > { %1434 = vmatmul.mubr.bf16.gmra.mrb[8].mxu0 %v1555_v19  ;;  %1450 = vmatmul.mubr.bf16.gmra.mrb[8].mxu1 %v1556_v20 }
  0x85   : > { %1437 = vmatprep.mubr.bf16.mxu0 %v1557_v21  ;;  %1453 = vmatprep.mubr.bf16.mxu1 %v1558_v22 }
  0x8c   : > { %1438 = vmatmul.mubr.bf16.gmra.mrb[12].mxu0 %v1559_v23  ;;  %1454 = vmatmul.mubr.bf16.gmra.mrb[12].mxu1 %v1560_v24 }
 0x147   : > { %v1833_v25 = vpop.f32.mrb[0].mxu0  ;;  %v1835_v26 = vpop.f32.mrb[0].mxu1 }
 0x148   : > { %v1837_v27 = vpop.f32.mrb[1].mxu0  ;;  %v1839_v28 = vpop.f32.mrb[1].mxu1  ;;  %v697_v63 = vmul.f32 (!%p1220_p12), %v1833_v25, %v1833_v25 }
 0x149   : > { %v1841_v29 = vpop.f32.mrb[2].mxu0  ;;  %v1843_v30 = vpop.f32.mrb[2].mxu1  ;;  %v695_v60 = vmul.f32 (!%p1220_p12), %v1837_v27, %v1837_v27 }
 0x14a   : > { %v1845_v31 = vpop.f32.mrb[3].mxu0  ;;  %v1847_v32 = vpop.f32.mrb[3].mxu1  ;;  %v698_v1 = vmul.f32 (!%p1220_p12), %v1841_v29, %v1841_v29 }
 0x14b   : > { %v655_v57 = vadd.f32 (!%p1220_p12), %v1845_v31, %v1837_v27  ;;  %v696_v61 = vmul.f32 (!%p1220_p12), %v1845_v31, %v1845_v31 }
 0x14d   : > { %v656_v58 = vadd.f32 (!%p1220_p12), %v1833_v25, %v655_v57  ;;  %v727_v2 = vadd.f32 (!%p1220_p12), %v696_v61, %v695_v60 }
 0x14f   : > { %v1849_v33 = vpop.f32.mrb[4].mxu0  ;;  %v1851_v34 = vpop.f32.mrb[4].mxu1  ;;  %v657_v59 = vadd.f32 (!%p1220_p12), %v1841_v29, %v656_v58  ;;  %v728_v5 = vadd.f32 (!%p1220_p12), %v727_v2, %v697_v63 }
 0x150   : > { %v1853_v35 = vpop.f32.mrb[5].mxu0  ;;  %v1855_v36 = vpop.f32.mrb[5].mxu1  ;;  %v701_v10 = vmul.f32 (!%p1220_p12), %v1849_v33, %v1849_v33 }
 0x151   : > { %v1857_v37 = vpop.f32.mrb[6].mxu0  ;;  %v1859_v38 = vpop.f32.mrb[6].mxu1  ;;  %v658_v62 = vadd.f32 (!%p1220_p12), %v657_v59, %v1853_v35  ;;  %v699_v4 = vmul.f32 (!%p1220_p12), %v1853_v35, %v1853_v35  ;;  %v729_v8 = vadd.f32 (!%p1220_p12), %v728_v5, %v698_v1 }
 0x152   : > { %v1861_v39 = vpop.f32.mrb[7].mxu0  ;;  %v1863_v40 = vpop.f32.mrb[7].mxu1  ;;  %v702_v13 = vmul.f32 (!%p1220_p12), %v1857_v37, %v1857_v37 }
 0x153   : > { %v659_v0 = vadd.f32 (!%p1220_p12), %v658_v62, %v1861_v39  ;;  %v700_v7 = vmul.f32 (!%p1220_p12), %v1861_v39, %v1861_v39  ;;  %v730_v11 = vadd.f32 (!%p1220_p12), %v729_v8, %v699_v4  ;;  %v711_v8 = vmul.f32 (!%p1220_p12), %v1839_v28, %v1839_v28 }
 0x155   : > { %v660_v3 = vadd.f32 (!%p1220_p12), %v1849_v33, %v659_v0  ;;  %v731_v14 = vadd.f32 (!%p1220_p12), %v730_v11, %v700_v7  ;;  %v712_v11 = vmul.f32 (!%p1220_p12), %v1847_v32, %v1847_v32 }
 0x157   : > { %v1865_v41 = vpop.f32.mrb[8].mxu0  ;;  %v1867_v42 = vpop.f32.mrb[8].mxu1  ;;  %v661_v6 = vadd.f32 (!%p1220_p12), %v1857_v37, %v660_v3  ;;  %v732_v17 = vadd.f32 (!%p1220_p12), %v731_v14, %v701_v10  ;;  %v713_v14 = vmul.f32 (!%p1220_p12), %v1835_v26, %v1835_v26 }
 0x158   : > { %v1869_v43 = vpop.f32.mrb[9].mxu0  ;;  %v1871_v44 = vpop.f32.mrb[9].mxu1  ;;  %v705_v22 = vmul.f32 (!%p1220_p12), %v1865_v41, %v1865_v41 }
 0x159   : > { %v1873_v45 = vpop.f32.mrb[10].mxu0  ;;  %v1875_v46 = vpop.f32.mrb[10].mxu1  ;;  %v662_v9 = vadd.f32 (!%p1220_p12), %v661_v6, %v1869_v43  ;;  %v703_v16 = vmul.f32 (!%p1220_p12), %v1869_v43, %v1869_v43  ;;  %v733_v20 = vadd.f32 (!%p1220_p12), %v732_v17, %v702_v13  ;;  %v714_v17 = vmul.f32 (!%p1220_p12), %v1843_v30, %v1843_v30 }
 0x15a   : > { %v1877_v47 = vpop.f32.mrb[11].mxu0  ;;  %v1879_v48 = vpop.f32.mrb[11].mxu1  ;;  %v706_v57 = vmul.f32 (!%p1220_p12), %v1873_v45, %v1873_v45 }
 0x15b   : > { %v663_v12 = vadd.f32 (!%p1220_p12), %v662_v9, %v1877_v47  ;;  %v704_v19 = vmul.f32 (!%p1220_p12), %v1877_v47, %v1877_v47  ;;  %v734_v23 = vadd.f32 (!%p1220_p12), %v733_v20, %v703_v16  ;;  %v715_v20 = vmul.f32 (!%p1220_p12), %v1855_v36, %v1855_v36 }
 0x15c   : > { %653 = sbr.rel (%p1220_p12) target bundleno = 410 (0x19a), region = 52 }
 0x15d   : > { %v664_v15 = vadd.f32 (!%p1220_p12), %v1865_v41, %v663_v12  ;;  %v735_v58 = vadd.f32 (!%p1220_p12), %v734_v23, %v704_v19  ;;  %v716_v23 = vmul.f32 (!%p1220_p12), %v1863_v40, %v1863_v40 }
 0x15f   : > { %v1881_v49 = vpop.f32.mrb[12].mxu0  ;;  %v1883_v50 = vpop.f32.mrb[12].mxu1  ;;  %v665_v18 = vadd.f32 (!%p1220_p12), %v1873_v45, %v664_v15  ;;  %v736_v61 = vadd.f32 (!%p1220_p12), %v735_v58, %v705_v22  ;;  %v717_v58 = vmul.f32 (!%p1220_p12), %v1851_v34, %v1851_v34 }
 0x160   : > { %v1885_v51 = vpop.f32.mrb[13].mxu0  ;;  %v1887_v52 = vpop.f32.mrb[13].mxu1  ;;  %v709_v2 = vmul.f32 (!%p1220_p12), %v1881_v49, %v1881_v49 }
 0x161   : > { %v1889_v53 = vpop.f32.mrb[14].mxu0  ;;  %v1891_v54 = vpop.f32.mrb[14].mxu1  ;;  %v666_v21 = vadd.f32 (!%p1220_p12), %v665_v18, %v1885_v51  ;;  %v707_v60 = vmul.f32 (!%p1220_p12), %v1885_v51, %v1885_v51  ;;  %v737_v0 = vadd.f32 (!%p1220_p12), %v736_v61, %v706_v57  ;;  %v718_v61 = vmul.f32 (!%p1220_p12), %v1859_v38, %v1859_v38 }
 0x162   : > { %v1893_v55 = vpop.f32.mrb[15].mxu0  ;;  %v1895_v56 = vpop.f32.mrb[15].mxu1  ;;  %v710_v5 = vmul.f32 (!%p1220_p12), %v1889_v53, %v1889_v53 }
 0x163   : > { %v667_v24 = vadd.f32 %v666_v21, %v1893_v55  ;;  %v708_v63 = vmul.f32 %v1893_v55, %v1893_v55  ;;  %v738_v3 = vadd.f32 %v737_v0, %v707_v60  ;;  %v719_v0 = vmul.f32 %v1871_v44, %v1871_v44 }
 0x165   : > { %v668_v59 = vadd.f32 %v1881_v49, %v667_v24  ;;  %v739_v6 = vadd.f32 %v738_v3, %v708_v63  ;;  %v720_v3 = vmul.f32 %v1879_v48, %v1879_v48 }
 0x167   : > { %v669_v62 = vadd.f32 %v1889_v53, %v668_v59  ;;  %v740_v9 = vadd.f32 %v739_v6, %v709_v2  ;;  %v721_v6 = vmul.f32 %v1867_v42, %v1867_v42 }
 0x169   : > { %v670_v1 = vadd.f32 %v669_v62, %v1839_v28  ;;  %v741_v12 = vadd.f32 %v740_v9, %v710_v5  ;;  %v722_v9 = vmul.f32 %v1875_v46, %v1875_v46 }
 0x16b   : > { %v671_v4 = vadd.f32 %v670_v1, %v1847_v32  ;;  %v742_v15 = vadd.f32 %v741_v12, %v711_v8  ;;  %v723_v12 = vmul.f32 %v1887_v52, %v1887_v52 }
 0x16d   : > { %v672_v7 = vadd.f32 %v1835_v26, %v671_v4  ;;  %v743_v18 = vadd.f32 %v742_v15, %v712_v11  ;;  %v724_v15 = vmul.f32 %v1895_v56, %v1895_v56 }
 0x16f   : > { %v673_v10 = vadd.f32 %v1843_v30, %v672_v7  ;;  %v744_v21 = vadd.f32 %v743_v18, %v713_v14  ;;  %v725_v18 = vmul.f32 %v1883_v50, %v1883_v50 }
 0x171   : > { %v674_v13 = vadd.f32 %v673_v10, %v1855_v36  ;;  %v745_v24 = vadd.f32 %v744_v21, %v714_v17  ;;  %v726_v21 = vmul.f32 %v1891_v54, %v1891_v54 }
 0x173   : > { %v675_v16 = vadd.f32 %v674_v13, %v1863_v40  ;;  %v746_v59 = vadd.f32 %v745_v24, %v715_v20 }
 0x175   : > { %v676_v19 = vadd.f32 %v1851_v34, %v675_v16  ;;  %v747_v62 = vadd.f32 %v746_v59, %v716_v23 }
 0x177   : > { %v677_v22 = vadd.f32 %v1859_v38, %v676_v19  ;;  %v748_v1 = vadd.f32 %v747_v62, %v717_v58 }
 0x179   : > { %v678_v57 = vadd.f32 %v677_v22, %v1871_v44  ;;  %v749_v4 = vadd.f32 %v748_v1, %v718_v61 }
 0x17b   : > { %v679_v60 = vadd.f32 %v678_v57, %v1879_v48  ;;  %v750_v7 = vadd.f32 %v749_v4, %v719_v0  ;;  %v694_v4 = vld [vmem:[#allocation3] sm:$0x1] }
 0x17d   : > { %v680_v63 = vadd.f32 %v1867_v42, %v679_v60  ;;  %v751_v10 = vadd.f32 %v750_v7, %v720_v3  ;;  %v654_v60 = vld [vmem:[#allocation2] sm:$0x1] }
 0x17f   : > { %v681_v2 = vadd.f32 %v1875_v46, %v680_v63  ;;  %v752_v13 = vadd.f32 %v751_v10, %v721_v6 }
 0x181   : > { %v682_v5 = vadd.f32 %v681_v2, %v1887_v52  ;;  %v753_v16 = vadd.f32 %v752_v13, %v722_v9 }
 0x183   : > { %v683_v8 = vadd.f32 %v682_v5, %v1895_v56  ;;  %v754_v19 = vadd.f32 %v753_v16, %v723_v12 }
 0x185   : > { %v684_v11 = vadd.f32 %v1883_v50, %v683_v8  ;;  %v755_v22 = vadd.f32 %v754_v19, %v724_v15 }
 0x187   : > { %v685_v14 = vadd.f32 %v1891_v54, %v684_v11  ;;  %v756_v24 = vadd.f32 %v755_v22, %v725_v18 }
 0x189   : > { %v686_v17 = vrot.slane %v685_v14, 4  ;;  %v757_v58 = vadd.f32 %v756_v24, %v726_v21 }
 0x18b   : > { %v687_v20 = vadd.f32 %v686_v17, %v685_v14  ;;  %v758_v61 = vrot.slane %v757_v58, 4 }
 0x18d   : > { %v688_v23 = vrot.slane %v687_v20, 2  ;;  %v759_v63 = vadd.f32 %v758_v61, %v757_v58 }
 0x18f   : > { %v689_v57 = vadd.f32 %v688_v23, %v687_v20  ;;  %v760_v1 = vrot.slane %v759_v63, 2 }
 0x191   : > { %v690_v59 = vrot.slane %v689_v57, 1  ;;  %v761_v2 = vadd.f32 %v760_v1, %v759_v63 }
 0x193   : > { %v691_v62 = vadd.f32 %v690_v59, %v689_v57  ;;  %v762_v3 = vrot.slane %v761_v2, 1 }
 0x195   : > { %v692_v0 = vadd.f32 %v691_v62, %v654_v60  ;;  %v763_v5 = vadd.f32 %v762_v3, %v761_v2 }
 0x197   : > { %693 = vst [vmem:[#allocation2] sm:$0x1] %v692_v0  ;;  %v764_v6 = vadd.f32 %v763_v5, %v694_v4 }
 0x199   : > { %765 = vst [vmem:[#allocation3] sm:$0x1] %v764_v6 }
 0x19a PF: > { %p766_p13 = scmp.eq.s32.totalorder %s1653_s16, 1 }
 0x19c   : > { %p767_p0 = pnand %p766_p13, %p291_p8 }
 0x19d   : > { %v778_v15 = vld [vmem:[#allocation6] sm:$0x1] (!%p767_p0)  ;;  %v782_v18 = vld [vmem:[%s2135_s3] sm:$0x1] (!%p767_p0) }
 0x19e   : > { %770 = sbr.rel (%p767_p0) target bundleno = 443 (0x1bb), region = 56  ;;  %v771_v7 = vld [vmem:[#allocation2] sm:$0x1] (!%p767_p0) }
 0x19f   : > { %v772_v9 = vmul.f32 (!%p767_p0), 0.001953125, %v771_v7 }
 0x1a0   : > { %v773_v8 = vld [vmem:[#allocation3] sm:$0x1] (!%p767_p0) }
 0x1a1   : > { %v774_v10 = vmul.f32 (!%p767_p0), 0.001953125, %v773_v8  ;;  %v775_v11 = vmul.f32 (!%p767_p0), %v772_v9, %v772_v9 }
 0x1a3   : > { %v776_v12 = vsub.f32 (!%p767_p0), %v774_v10, %v775_v11 }
 0x1a5   : > { %v777_v13 = vmax.f32 %v776_v12, 0.0 }
 0x1a7   : > { %v779_v14 = vadd.f32 1e-05, %v777_v13 }
 0x1a9   : > { %1561 = vrsqrt.f32 %v779_v14 }
 0x1b3   : > { %v1562_v16 = vpop.eup %1561 }
 0x1b4   : > { %v781_v17 = vmul.f32 %v1562_v16, %v778_v15 }
 0x1b6   : > { %v783_v19 = vmul.f32 %v781_v17, %v772_v9  ;;  %786 = vst [vmem:[#allocation2] sm:$0x1] %v781_v17 }
 0x1b8   : > { %v784_v20 = vsub.f32 %v782_v18, %v783_v19 }
 0x1ba   : > { %785 = vst [vmem:[#allocation3] sm:$0x1] %v784_v20 }
 0x1bb PF: > { %p1221_p1 = scmp.ne.s32.totalorder %s1653_s16, 1 }
 0x1bd   : > { %789 = sbr.rel (%p1221_p1) target bundleno = 479 (0x1df), region = 60  ;;  %v2001_v21 = vld [vmem:[#allocation2] ss:$0 sm:$0xff] (!%p1221_p1) }
 0x1be   : > { %v797_v23 = vmul.f32 (!%p1221_p1), %v2001_v21, %v1837_v27  ;;  %v798_v24 = vmul.f32 (!%p1221_p1), %v2001_v21, %v1845_v31  ;;  %v799_v57 = vmul.f32 (!%p1221_p1), %v1833_v25, %v2001_v21  ;;  %v800_v58 = vmul.f32 (!%p1221_p1), %v1841_v29, %v2001_v21 }
 0x1bf   : > { %v801_v59 = vmul.f32 (!%p1221_p1), %v2001_v21, %v1853_v35  ;;  %v802_v60 = vmul.f32 (!%p1221_p1), %v2001_v21, %v1861_v39  ;;  %v803_v61 = vmul.f32 (!%p1221_p1), %v1849_v33, %v2001_v21  ;;  %v804_v27 = vmul.f32 (!%p1221_p1), %v1857_v37, %v2001_v21 }
 0x1c0   : > { %v805_v9 = vmul.f32 (!%p1221_p1), %v2001_v21, %v1869_v43  ;;  %v806_v10 = vmul.f32 (!%p1221_p1), %v2001_v21, %v1877_v47  ;;  %v807_v13 = vmul.f32 (!%p1221_p1), %v1865_v41, %v2001_v21  ;;  %v808_v14 = vmul.f32 (!%p1221_p1), %v1873_v45, %v2001_v21 }
 0x1c1   : > { %v2003_v22 = vld [vmem:[#allocation3] ss:$0 sm:$0xff] (!%p1221_p1)  ;;  %v809_v43 = vmul.f32 (!%p1221_p1), %v2001_v21, %v1885_v51  ;;  %v810_v47 = vmul.f32 (!%p1221_p1), %v2001_v21, %v1893_v55  ;;  %v811_v45 = vmul.f32 (!%p1221_p1), %v1881_v49, %v2001_v21  ;;  %v812_v18 = vmul.f32 (!%p1221_p1), %v1889_v53, %v2001_v21 }
 0x1c2   : > { %v836_v31 = vadd.f32 (!%p1221_p1), %v2003_v22, %v797_v23  ;;  %v837_v62 = vadd.f32 (!%p1221_p1), %v2003_v22, %v798_v24  ;;  %v838_v25 = vadd.f32 (!%p1221_p1), %v2003_v22, %v799_v57  ;;  %v839_v29 = vadd.f32 (!%p1221_p1), %v2003_v22, %v800_v58 }
 0x1c3   : > { %v840_v63 = vadd.f32 (!%p1221_p1), %v2003_v22, %v801_v59  ;;  %v841_v35 = vadd.f32 (!%p1221_p1), %v2003_v22, %v802_v60  ;;  %v842_v39 = vadd.f32 (!%p1221_p1), %v2003_v22, %v803_v61  ;;  %v843_v0 = vadd.f32 (!%p1221_p1), %v2003_v22, %v804_v27 }
 0x1c4   : > { %v868_v33 = vmax.f32 %v836_v31, 0.0  ;;  %v869_v1 = vmax.f32 %v837_v62, 0.0  ;;  %v870_v37 = vmax.f32 %v838_v25, 0.0  ;;  %v871_v2 = vmax.f32 %v839_v29, 0.0 }
 0x1c5   : > { %v872_v3 = vmax.f32 %v840_v63, 0.0  ;;  %v873_v4 = vmax.f32 %v841_v35, 0.0  ;;  %v874_v5 = vmax.f32 %v842_v39, 0.0  ;;  %v875_v6 = vmax.f32 %v843_v0, 0.0 }
 0x1c6   : > { %v1293_v7 = vpack.c.bf16 %v869_v1, %v868_v33  ;;  %v1298_v8 = vpack.c.bf16 %v871_v2, %v870_v37  ;;  %v844_v15 = vadd.f32 %v2003_v22, %v805_v9  ;;  %v845_v16 = vadd.f32 %v2003_v22, %v806_v10 }
 0x1c7   : > { %v1303_v11 = vpack.c.bf16 %v873_v4, %v872_v3  ;;  %v1308_v12 = vpack.c.bf16 %v875_v6, %v874_v5  ;;  %v846_v17 = vadd.f32 %v2003_v22, %v807_v13  ;;  %v847_v41 = vadd.f32 %v2003_v22, %v808_v14 }
 0x1c8   : > { %1294 = vst [vmem:[%s1815_s29] sm:$0xff] %v1293_v7   ;;  %1370 = vst [vmem:[%s1815_s29 + $0x8] sm:$0xff] %v1298_v8   ;;  %v876_v19 = vmax.f32 %v844_v15, 0.0  ;;  %v877_v20 = vmax.f32 %v845_v16, 0.0  ;;  %v848_v51 = vadd.f32 %v2003_v22, %v809_v43  ;;  %v849_v23 = vadd.f32 %v2003_v22, %v810_v47 }
 0x1c9   : > { %1371 = vst [vmem:[%s1815_s29 + $0x10] sm:$0xff] %v1303_v11   ;;  %1372 = vst [vmem:[%s1815_s29 + $0x18] sm:$0xff] %v1308_v12   ;;  %v878_v55 = vmax.f32 %v846_v17, 0.0  ;;  %v879_v24 = vmax.f32 %v847_v41, 0.0  ;;  %v850_v57 = vadd.f32 %v2003_v22, %v811_v45  ;;  %v851_v58 = vadd.f32 %v2003_v22, %v812_v18 }
 0x1ca   : > { %v1313_v59 = vpack.c.bf16 %v877_v20, %v876_v19  ;;  %v880_v60 = vmax.f32 %v848_v51, 0.0  ;;  %v881_v49 = vmax.f32 %v849_v23, 0.0  ;;  %v813_v53 = vmul.f32 %v2001_v21, %v1839_v28 }
 0x1cb   : > { %v1318_v61 = vpack.c.bf16 %v879_v24, %v878_v55  ;;  %v882_v27 = vmax.f32 %v850_v57, 0.0  ;;  %v883_v31 = vmax.f32 %v851_v58, 0.0  ;;  %v814_v62 = vmul.f32 %v2001_v21, %v1847_v32 }
 0x1cc   : > { %1373 = vst [vmem:[%s1815_s29 + $0x20] sm:$0xff] %v1313_v59   ;;  %v1323_v25 = vpack.c.bf16 %v881_v49, %v880_v60  ;;  %v852_v29 = vadd.f32 %v2003_v22, %v813_v53  ;;  %v815_v63 = vmul.f32 %v1835_v26, %v2001_v21  ;;  %v816_v35 = vmul.f32 %v1843_v30, %v2001_v21 }
 0x1cd   : > { %1374 = vst [vmem:[%s1815_s29 + $0x28] sm:$0xff] %v1318_v61   ;;  %v1328_v39 = vpack.c.bf16 %v883_v31, %v882_v27  ;;  %v853_v28 = vadd.f32 %v2003_v22, %v814_v62  ;;  %v817_v0 = vmul.f32 %v2001_v21, %v1855_v36  ;;  %v818_v32 = vmul.f32 %v2001_v21, %v1863_v40 }
 0x1ce   : > { %1375 = vst [vmem:[%s1815_s29 + $0x30] sm:$0xff] %v1323_v25   ;;  %v884_v33 = vmax.f32 %v852_v29, 0.0  ;;  %v854_v1 = vadd.f32 %v2003_v22, %v815_v63  ;;  %v855_v37 = vadd.f32 %v2003_v22, %v816_v35  ;;  %v819_v26 = vmul.f32 %v1851_v34, %v2001_v21 }
 0x1cf   : > { %1376 = vst [vmem:[%s1815_s29 + $0x38] sm:$0xff] %v1328_v39   ;;  %v885_v30 = vmax.f32 %v853_v28, 0.0  ;;  %v856_v2 = vadd.f32 %v2003_v22, %v817_v0  ;;  %v857_v3 = vadd.f32 %v2003_v22, %v818_v32  ;;  %v820_v36 = vmul.f32 %v1859_v38, %v2001_v21 }
 0x1d0   : > { %v886_v40 = vmax.f32 %v854_v1, 0.0  ;;  %v887_v4 = vmax.f32 %v855_v37, 0.0  ;;  %v858_v5 = vadd.f32 %v2003_v22, %v819_v26  ;;  %v821_v6 = vmul.f32 %v2001_v21, %v1871_v44 }
 0x1d1   : > { %v1333_v7 = vpack.c.bf16 %v885_v30, %v884_v33  ;;  %v888_v34 = vmax.f32 %v856_v2, 0.0  ;;  %v889_v8 = vmax.f32 %v857_v3, 0.0  ;;  %v859_v9 = vadd.f32 %v2003_v22, %v820_v36 }
 0x1d2   : > { %v1338_v10 = vpack.c.bf16 %v887_v4, %v886_v40  ;;  %v890_v11 = vmax.f32 %v858_v5, 0.0  ;;  %v822_v12 = vmul.f32 %v2001_v21, %v1879_v48  ;;  %v860_v38 = vadd.f32 %v2003_v22, %v821_v6 }
 0x1d3   : > { %1377 = vst [vmem:[%s1815_s29 + $0x40] sm:$0xff] %v1333_v7   ;;  %v1343_v13 = vpack.c.bf16 %v889_v8, %v888_v34  ;;  %v891_v14 = vmax.f32 %v859_v9, 0.0  ;;  %v823_v15 = vmul.f32 %v1867_v42, %v2001_v21  ;;  %v824_v44 = vmul.f32 %v1875_v46, %v2001_v21 }
 0x1d4   : > { %1378 = vst [vmem:[%s1815_s29 + $0x48] sm:$0xff] %v1338_v10   ;;  %v861_v16 = vadd.f32 %v2003_v22, %v822_v12  ;;  %v892_v43 = vmax.f32 %v860_v38, 0.0  ;;  %v825_v47 = vmul.f32 %v2001_v21, %v1887_v52  ;;  %v826_v48 = vmul.f32 %v2001_v21, %v1895_v56 }
 0x1d5   : > { %1379 = vst [vmem:[%s1815_s29 + $0x50] sm:$0xff] %v1343_v13   ;;  %v1348_v17 = vpack.c.bf16 %v891_v14, %v890_v11  ;;  %v862_v41 = vadd.f32 %v2003_v22, %v823_v15  ;;  %v863_v42 = vadd.f32 %v2003_v22, %v824_v44  ;;  %v827_v46 = vmul.f32 %v1883_v50, %v2001_v21 }
 0x1d6   : > { %v893_v45 = vmax.f32 %v861_v16, 0.0  ;;  %v864_v18 = vadd.f32 %v2003_v22, %v825_v47  ;;  %v865_v19 = vadd.f32 %v2003_v22, %v826_v48  ;;  %v828_v52 = vmul.f32 %v1891_v54, %v2001_v21 }
 0x1d7   : > { %1380 = vst [vmem:[%s1815_s29 + $0x58] sm:$0xff] %v1348_v17   ;;  %v894_v56 = vmax.f32 %v862_v41, 0.0  ;;  %v895_v20 = vmax.f32 %v863_v42, 0.0  ;;  %v866_v51 = vadd.f32 %v2003_v22, %v827_v46 }
 0x1d8   : > { %v1353_v23 = vpack.c.bf16 %v893_v45, %v892_v43  ;;  %v896_v55 = vmax.f32 %v864_v18, 0.0  ;;  %v897_v24 = vmax.f32 %v865_v19, 0.0  ;;  %v867_v50 = vadd.f32 %v2003_v22, %v828_v52 }
 0x1d9   : > { %v1358_v57 = vpack.c.bf16 %v895_v20, %v894_v56  ;;  %v898_v58 = vmax.f32 %v866_v51, 0.0 }
 0x1da   : > { %1381 = vst [vmem:[%s1815_s29 + $0x60] sm:$0xff] %v1353_v23   ;;  %v1363_v59 = vpack.c.bf16 %v897_v24, %v896_v55  ;;  %v899_v60 = vmax.f32 %v867_v50, 0.0 }
 0x1db   : > { %1382 = vst [vmem:[%s1815_s29 + $0x68] sm:$0xff] %v1358_v57  }
 0x1dc   : > { %1383 = vst [vmem:[%s1815_s29 + $0x70] sm:$0xff] %v1363_v59   ;;  %v1368_v49 = vpack.c.bf16 %v899_v60, %v898_v58 }
 0x1de   : > { %1384 = vst [vmem:[%s1815_s29 + $0x78] sm:$0xff] %v1368_v49  }
 0x1df PF: > { %s16_s19 = sadd.s32 1, %s1665_s19   ;;  %s2145_s15 = smov %s1657_s17 }
 0x1e0   : > { %p13_p2 = scmp.ge.s32.totalorder %s16_s19, 6   ;;  %s2146_s16 = smov %s1661_s18 }
 0x1e1   : > { %s2147_s17 = smov %s2150_s21  ;;  %s2148_s18 = smov %s2154_s22 }
 0x1e2   :  { %15 = sbr.rel (!%p13_p2) target bundleno = 4 (0x4), region = 96 }
 0x1e9   :  { %1091 = vsyncpa [#allocation5], 1 }
 0x1ea   :  { %1093 = vsyncpa [#allocation5 + $0x1], 1 }
 0x1eb   :  { %1094 = vsyncpa [#allocation7], 1 }

// kernel: a_call__.6
= control target key start
LH: loop header
LB: loop body
LE: loop exit
PB: predicated region body
PF: predicated region fallthrough
CT: control target
= control target key end

     0   :  { %9 = vsyncpa [#allocation5], 0  ;;  %s2100_s0 = inlined_call_operand.vmem [shape: bf16[512,128], index: 0, kind: input, shape index: {}]   ;;  %s2101_s1 = inlined_call_operand.hbm [shape: bf16[128,128], index: 1, kind: input, shape index: {}]   ;;  %s2102_s2 = inlined_call_operand.hbm [shape: f32[1,128], index: 2, kind: input, shape index: {}]   ;;  %s2103_s3 = inlined_call_operand.vmem [shape: f32[1,128], index: 3, kind: input, shape index: {}]   ;;  %s2104_s4 = inlined_call_operand.vmem [shape: bf16[512,128], index: 4, kind: output, shape index: {}]  }
   0x1   :  { %10 = vsyncpa [#allocation7], 0  ;;  %s1665_s15 = smov 0   ;;  %s1667_s16 = smov 0  }
   0x2   :  { %s1669_s17 = smov 0   ;;  %s1671_s18 = smov 0  }
   0x3   :  { %s1673_s19 = smov 0  }
   0x4 LB: > { %s1150_s20 = sadd.s32 4294967295, %s1633_s19   ;;  %s28_s21 = sadd.s32 1, %s1625_s17  ;;  %s1633_s19 = sphi %s1673_s19, %s16_s19   ;;  %s1629_s18 = sphi %s1671_s18, %s2116_s18   ;;  %s1625_s17 = sphi %s1669_s17, %s2115_s17   ;;  %s1621_s16 = sphi %s1667_s16, %s2114_s16   ;;  %s1617_s15 = sphi %s1665_s15, %s2113_s15  }
   0x5   : > { %p29_p0 = scmp.ge.s32.totalorder %s28_s21, 2  ;;  %s31_s22 = sadd.s32 1, %s1629_s18 }
   0x6   : > { %p1152_p1 = scmp.ge.s32.totalorder %s1633_s19, 1  ;;  %p174_p2 = scmp.lt.s32.totalorder %s1633_s19, 5 }
   0x7   : > { %s2118_s21 = smov (%p29_p0, %s28_s21), 0  ;;  %s2120_s22 = smov (!%p29_p0, %s31_s22), %s1629_s18 }
   0x8   : > { %p1698_p3 = pnand %p1152_p1, %p174_p2  ;;  %p33_p4 = scmp.ge.s32.totalorder %s2120_s22, 2 }
   0x9   : > { %p1702_p5 = scmp.eq.s32.totalorder %s1150_s20, 0  ;;  %s1635_s25 = smov [#allocation4]  }
   0xa   : > { %s2108_s23 = scalar_select %p1698_p3, 1, 0 }
   0xb   : > { %s2109_s24 = scalar_select %p1702_p5, 1, 0 }
   0xc   : > { %p1449_p6 = pneg %p1698_p3  ;;  %s2122_s22 = smov (%p33_p4, %s2120_s22), 0 }
   0xd   : > { %s188_s26 = sshll.u32 %s1635_s25, 4  ;;  %s1531_s30 = scalar_lea.hbm %s2101_s1, 1024  ;;  %s189_s26 = int_to_ptr.vmem [resolvable:$true] %s188_s26 }
   0xe   : > { %p1712_p7 = pnand %p1702_p5, %p1449_p6  ;;  %p1532_p8 = scmp.ne.s32.totalorder %s2101_s1, %s1531_s30 }
   0xf   : > { %p1538_p12 = scmp.lt.u32.totalorder %s1531_s30, %s2101_s1 }
  0x10   : > { %p1533_p9 = pneg %p1712_p7 }
  0x12   : > { %p1534_p10 = pnand %p1533_p9, %p1532_p8 }
  0x14   : > { %p1535_p11 = pneg %p1534_p10 }
  0x16   : > { %p1540_p13 = pnand %p1538_p12, %p1535_p11 }
  0x18   : > { %1543 = shalt.err (!%p1540_p13)
}
  0x19   : > { %s1544_s9 = scalar_lea.vmem %s189_s26, 1024  ;;  %p1552_p4 = scmp.lt.s32.totalorder %s189_s26, %s189_s26 }
  0x1a   : > { %p1545_p0 = scmp.ne.s32.totalorder %s189_s26, %s1544_s9  ;;  %p1553_p6 = scmp.lt.s32.totalorder %s1544_s9, %s1544_s9 }
  0x1c   : > { %p1547_p1 = pnand %p1545_p0, %p1533_p9  ;;  %p1554_p5 = por %p1553_p6, %p1552_p4 }
  0x1e   : > { %p1548_p2 = pneg %p1547_p1 }
  0x20   : > { %p1555_p3 = pnand %p1554_p5, %p1548_p2 }
  0x22   : > { %1558 = shalt.err (!%p1555_p3)
}
  0x23   : > { %s1636_s10 = smov 64   ;;  %s1637_s11 = smov 4  }
  0x24   : > { %1452 = dma.hbm_to_vmem [thread:$0]  (!%p1712_p7), %s2101_s1, 1024, %s189_s26, [#allocation5], %s1636_s10, %s1636_s10, %s1637_s11  }
  0x25   : > { %s1638_s14 = smov [#allocation6]   ;;  %s1559_s29 = scalar_lea.hbm %s2102_s2, 16 }
  0x26   : > { %s204_s20 = sshll.u32 %s1638_s14, 4  ;;  %p1560_p3 = scmp.ne.s32.totalorder %s2102_s2, %s1559_s29  ;;  %s205_s20 = int_to_ptr.vmem [resolvable:$true] %s204_s20 }
  0x27   : > { %p1566_p10 = scmp.lt.u32.totalorder %s1559_s29, %s2102_s2 }
  0x28   : > { %p1562_p5 = pnand %p1560_p3, %p1533_p9 }
  0x2a   : > { %p1563_p8 = pneg %p1562_p5 }
  0x2c   : > { %p1568_p11 = pnand %p1566_p10, %p1563_p8 }
  0x2e   : > { %1571 = shalt.err (!%p1568_p11)
}
  0x2f   : > { %s1572_s26 = scalar_lea.vmem %s205_s20, 16  ;;  %s1579_s8 = scalar_lea.vmem %s205_s20, 32 }
  0x30   : > { %p1573_p12 = scmp.ne.s32.totalorder %s205_s20, %s1572_s26  ;;  %p1580_p1 = scmp.lt.s32.totalorder %s205_s20, %s205_s20 }
  0x31   : > { %p1581_p2 = scmp.lt.s32.totalorder %s1579_s8, %s1572_s26 }
  0x32   : > { %p1575_p13 = pnand %p1573_p12, %p1533_p9 }
  0x33   : > { %p1582_p4 = por %p1581_p2, %p1580_p1 }
  0x34   : > { %p1576_p0 = pneg %p1575_p13 }
  0x36   : > { %p1583_p6 = pnand %p1582_p4, %p1576_p0 }
  0x38   : > { %1586 = shalt.err (!%p1583_p6)
}
  0x39   : > { %1455 = dma.hbm_to_vmem [thread:$0]  (!%p1712_p7), %s2102_s2, 16, %s205_s20, [#allocation7]  }
  0x3a   : > { %p2111_p3 = scmp.ne.s32.totalorder %s2108_s23, 0 }
  0x3b   : > { %p2112_p5 = scmp.ne.s32.totalorder (!%p2111_p3), %s2109_s24, 0 }
  0x3c   : > { %232 = sbr.rel (%p2111_p3) target bundleno = 471 (0x1d7), region = 36 }
  0x43   : > { %1608 = dma.done.wait (%p2112_p5), [#allocation5], 1024  }
  0x44   : > { %1610 = vsyncadd (%p2112_p5), [#allocation5], 4294966272 }
  0x45   : > { %1612 = dma.done.wait (%p2112_p5), [#allocation7], 16  }
  0x46   : > { %1614 = vsyncadd (%p2112_p5), [#allocation7], 4294967280  ;;  %s1160_s23 = sshll.u32 %s1617_s15, 5  ;;  %s278_s27 = smul.u32 %s1617_s15, %s1621_s16 }
  0x47   : > { %p270_p7 = scmp.lt.s32.totalorder %s1160_s23, 63  ;;  %p290_p9 = scmp.eq.s32.totalorder %s1621_s16, 0 }
  0x48   : > { %s1162_s11 = sshll.u32 %s278_s27, 5  ;;  %p291_p8 = scmp.eq.s32.totalorder %s1617_s15, 0 }
  0x49   : > { %s2124_s23 = smov (!%p270_p7, %s1160_s23), 63  ;;  %p280_p10 = scmp.lt.s32.totalorder %s1162_s11, 63 }
  0x4a   : > { %p292_p11 = pnand %p291_p8, %p290_p9  ;;  %s1161_s12 = sshll.u32 %s2124_s23, 2 }
  0x4b   : > { %s1778_s14 = scalar_lea.vmem %s2100_s0, %s1161_s12  ;;  %s2126_s11 = smov (!%p280_p10, %s1162_s11), 63  ;;  %v1639_v0 = vmov (!%p292_p11), 0.0  }
  0x4c   : > { %s1163_s20 = sshll.u32 %s2126_s11, 2  ;;  %295 = sbr.rel (%p292_p11) target bundleno = 83 (0x53), region = 48  ;;  %296 = vst [vmem:[#allocation2] sm:$0x1] (!%p292_p11), %v1639_v0  ;;  %297 = vst [vmem:[#allocation3] sm:$0x1] (!%p292_p11), %v1639_v0 }
  0x4d   : > { %s1783_s29 = scalar_lea.vmem %s2104_s4, %s1163_s20 }
  0x53 PF: > { %v1505_v1 = vld [vmem:[#allocation4] sm:$0xff]   ;;  %v1506_v2 = vld [vmem:[#allocation4 + $0x8] sm:$0xff]   ;;  %v1507_v3 = vld [vmem:[#allocation4 + $0x10] sm:$0xff]   ;;  %p1188_p12 = scmp.ne.s32.totalorder %s1621_s16, 0 }
  0x54   : > { %1377 = vmatprep.subr.bf16.mxu0 %v1505_v1  ;;  %1425 = vmatprep.subr.bf16.mxu1 %v1505_v1  ;;  %v1508_v4 = vld [vmem:[#allocation4 + $0x18] sm:$0xff]   ;;  %v1509_v7 = vld [vmem:[#allocation4 + $0x20] sm:$0xff]   ;;  %v1510_v8 = vld [vmem:[#allocation4 + $0x28] sm:$0xff]  }
  0x55   : > { %1378 = vmatpush3.bf16.msra.mxu0 %v1505_v1  ;;  %1433 = vmatpush3.bf16.msra.mxu1 %v1505_v1  ;;  %v1513_v5 = vld [vmem:[%s1778_s14] sm:$0xff]   ;;  %v1511_v9 = vld [vmem:[#allocation4 + $0x30] sm:$0xff]   ;;  %v1515_v11 = vld [vmem:[%s1778_s14 + $0x8] sm:$0xff]  }
  0x56   : > { %1379 = vmatprep.subr.bf16.mxu0 %v1506_v2  ;;  %1426 = vmatprep.subr.bf16.mxu1 %v1506_v2  ;;  %v1514_v6 = vld [vmem:[%s1778_s14 + $0x40] sm:$0xff]   ;;  %v1516_v12 = vld [vmem:[%s1778_s14 + $0x48] sm:$0xff]   ;;  %v1517_v13 = vld [vmem:[%s1778_s14 + $0x10] sm:$0xff]  }
  0x57   : > { %1393 = vmatprep.mubr.bf16.mxu0 %v1513_v5  ;;  %1409 = vmatprep.mubr.bf16.mxu1 %v1514_v6  ;;  %v1512_v10 = vld [vmem:[#allocation4 + $0x38] sm:$0xff]   ;;  %v1518_v14 = vld [vmem:[%s1778_s14 + $0x50] sm:$0xff]   ;;  %v1523_v19 = vld [vmem:[%s1778_s14 + $0x28] sm:$0xff]  }
  0x58   : > { %v1519_v15 = vld [vmem:[%s1778_s14 + $0x18] sm:$0xff]   ;;  %v1521_v17 = vld [vmem:[%s1778_s14 + $0x20] sm:$0xff]   ;;  %v1524_v20 = vld [vmem:[%s1778_s14 + $0x68] sm:$0xff]  }
  0x59   : > { %1380 = vmatpush3.bf16.msra.mxu0 %v1506_v2  ;;  %1434 = vmatpush3.bf16.msra.mxu1 %v1506_v2  ;;  %v1520_v16 = vld [vmem:[%s1778_s14 + $0x58] sm:$0xff]   ;;  %v1522_v18 = vld [vmem:[%s1778_s14 + $0x60] sm:$0xff]   ;;  %v1525_v21 = vld [vmem:[%s1778_s14 + $0x30] sm:$0xff]  }
  0x5a   : > { %1381 = vmatprep.subr.bf16.mxu0 %v1507_v3  ;;  %1427 = vmatprep.subr.bf16.mxu1 %v1507_v3  ;;  %v1526_v22 = vld [vmem:[%s1778_s14 + $0x70] sm:$0xff]   ;;  %v1527_v23 = vld [vmem:[%s1778_s14 + $0x38] sm:$0xff]  }
  0x5b   : > { %v1528_v24 = vld [vmem:[%s1778_s14 + $0x78] sm:$0xff]  }
  0x5d   : > { %1382 = vmatpush3.bf16.msra.mxu0 %v1507_v3  ;;  %1435 = vmatpush3.bf16.msra.mxu1 %v1507_v3 }
  0x5e   : > { %1383 = vmatprep.subr.bf16.mxu0 %v1508_v4  ;;  %1428 = vmatprep.subr.bf16.mxu1 %v1508_v4 }
  0x61   : > { %1384 = vmatpush3.bf16.msra.mxu0 %v1508_v4  ;;  %1436 = vmatpush3.bf16.msra.mxu1 %v1508_v4 }
  0x62   : > { %1385 = vmatprep.subr.bf16.mxu0 %v1509_v7  ;;  %1429 = vmatprep.subr.bf16.mxu1 %v1509_v7 }
  0x65   : > { %1386 = vmatpush3.bf16.msra.mxu0 %v1509_v7  ;;  %1437 = vmatpush3.bf16.msra.mxu1 %v1509_v7 }
  0x66   : > { %1387 = vmatprep.subr.bf16.mxu0 %v1510_v8  ;;  %1430 = vmatprep.subr.bf16.mxu1 %v1510_v8 }
  0x69   : > { %1388 = vmatpush3.bf16.msra.mxu0 %v1510_v8  ;;  %1438 = vmatpush3.bf16.msra.mxu1 %v1510_v8 }
  0x6a   : > { %1389 = vmatprep.subr.bf16.mxu0 %v1511_v9  ;;  %1431 = vmatprep.subr.bf16.mxu1 %v1511_v9 }
  0x6d   : > { %1390 = vmatpush3.bf16.msra.mxu0 %v1511_v9  ;;  %1439 = vmatpush3.bf16.msra.mxu1 %v1511_v9 }
  0x6e   : > { %1391 = vmatprep.subr.bf16.mxu0 %v1512_v10  ;;  %1432 = vmatprep.subr.bf16.mxu1 %v1512_v10 }
  0x71   : > { %1392 = vmatpush3.bf16.msra.mxu0 %v1512_v10  ;;  %1440 = vmatpush3.bf16.msra.mxu1 %v1512_v10 }
  0x74   : > { %1394 = vmatmul.mubr.bf16.vlgmr.msra.gmra.mrb[0].mxu0 %v1515_v11  ;;  %1410 = vmatmul.mubr.bf16.vlgmr.msra.gmra.mrb[0].mxu1 %v1516_v12 }
  0x75   : > { %1397 = vmatprep.mubr.bf16.mxu0 %v1517_v13  ;;  %1413 = vmatprep.mubr.bf16.mxu1 %v1518_v14 }
  0x7c   : > { %1398 = vmatmul.mubr.bf16.gmra.mrb[4].mxu0 %v1519_v15  ;;  %1414 = vmatmul.mubr.bf16.gmra.mrb[4].mxu1 %v1520_v16 }
  0x7d   : > { %1401 = vmatprep.mubr.bf16.mxu0 %v1521_v17  ;;  %1417 = vmatprep.mubr.bf16.mxu1 %v1522_v18 }
  0x84   : > { %1402 = vmatmul.mubr.bf16.gmra.mrb[8].mxu0 %v1523_v19  ;;  %1418 = vmatmul.mubr.bf16.gmra.mrb[8].mxu1 %v1524_v20 }
  0x85   : > { %1405 = vmatprep.mubr.bf16.mxu0 %v1525_v21  ;;  %1421 = vmatprep.mubr.bf16.mxu1 %v1526_v22 }
  0x8c   : > { %1406 = vmatmul.mubr.bf16.gmra.mrb[12].mxu0 %v1527_v23  ;;  %1422 = vmatmul.mubr.bf16.gmra.mrb[12].mxu1 %v1528_v24 }
 0x147   : > { %v1801_v25 = vpop.f32.mrb[0].mxu0  ;;  %v1803_v26 = vpop.f32.mrb[0].mxu1 }
 0x148   : > { %v1805_v27 = vpop.f32.mrb[1].mxu0  ;;  %v1807_v28 = vpop.f32.mrb[1].mxu1  ;;  %v697_v63 = vmul.f32 (!%p1188_p12), %v1801_v25, %v1801_v25 }
 0x149   : > { %v1809_v29 = vpop.f32.mrb[2].mxu0  ;;  %v1811_v30 = vpop.f32.mrb[2].mxu1  ;;  %v695_v60 = vmul.f32 (!%p1188_p12), %v1805_v27, %v1805_v27 }
 0x14a   : > { %v1813_v31 = vpop.f32.mrb[3].mxu0  ;;  %v1815_v32 = vpop.f32.mrb[3].mxu1  ;;  %v698_v1 = vmul.f32 (!%p1188_p12), %v1809_v29, %v1809_v29 }
 0x14b   : > { %v655_v57 = vadd.f32 (!%p1188_p12), %v1813_v31, %v1805_v27  ;;  %v696_v61 = vmul.f32 (!%p1188_p12), %v1813_v31, %v1813_v31 }
 0x14d   : > { %v656_v58 = vadd.f32 (!%p1188_p12), %v1801_v25, %v655_v57  ;;  %v727_v2 = vadd.f32 (!%p1188_p12), %v696_v61, %v695_v60 }
 0x14f   : > { %v1817_v33 = vpop.f32.mrb[4].mxu0  ;;  %v1819_v34 = vpop.f32.mrb[4].mxu1  ;;  %v657_v59 = vadd.f32 (!%p1188_p12), %v1809_v29, %v656_v58  ;;  %v728_v5 = vadd.f32 (!%p1188_p12), %v727_v2, %v697_v63 }
 0x150   : > { %v1821_v35 = vpop.f32.mrb[5].mxu0  ;;  %v1823_v36 = vpop.f32.mrb[5].mxu1  ;;  %v701_v10 = vmul.f32 (!%p1188_p12), %v1817_v33, %v1817_v33 }
 0x151   : > { %v1825_v37 = vpop.f32.mrb[6].mxu0  ;;  %v1827_v38 = vpop.f32.mrb[6].mxu1  ;;  %v658_v62 = vadd.f32 (!%p1188_p12), %v657_v59, %v1821_v35  ;;  %v699_v4 = vmul.f32 (!%p1188_p12), %v1821_v35, %v1821_v35  ;;  %v729_v8 = vadd.f32 (!%p1188_p12), %v728_v5, %v698_v1 }
 0x152   : > { %v1829_v39 = vpop.f32.mrb[7].mxu0  ;;  %v1831_v40 = vpop.f32.mrb[7].mxu1  ;;  %v702_v13 = vmul.f32 (!%p1188_p12), %v1825_v37, %v1825_v37 }
 0x153   : > { %v659_v0 = vadd.f32 (!%p1188_p12), %v658_v62, %v1829_v39  ;;  %v700_v7 = vmul.f32 (!%p1188_p12), %v1829_v39, %v1829_v39  ;;  %v730_v11 = vadd.f32 (!%p1188_p12), %v729_v8, %v699_v4  ;;  %v711_v8 = vmul.f32 (!%p1188_p12), %v1807_v28, %v1807_v28 }
 0x155   : > { %v660_v3 = vadd.f32 (!%p1188_p12), %v1817_v33, %v659_v0  ;;  %v731_v14 = vadd.f32 (!%p1188_p12), %v730_v11, %v700_v7  ;;  %v712_v11 = vmul.f32 (!%p1188_p12), %v1815_v32, %v1815_v32 }
 0x157   : > { %v1833_v41 = vpop.f32.mrb[8].mxu0  ;;  %v1835_v42 = vpop.f32.mrb[8].mxu1  ;;  %v661_v6 = vadd.f32 (!%p1188_p12), %v1825_v37, %v660_v3  ;;  %v732_v17 = vadd.f32 (!%p1188_p12), %v731_v14, %v701_v10  ;;  %v713_v14 = vmul.f32 (!%p1188_p12), %v1803_v26, %v1803_v26 }
 0x158   : > { %v1837_v43 = vpop.f32.mrb[9].mxu0  ;;  %v1839_v44 = vpop.f32.mrb[9].mxu1  ;;  %v705_v22 = vmul.f32 (!%p1188_p12), %v1833_v41, %v1833_v41 }
 0x159   : > { %v1841_v45 = vpop.f32.mrb[10].mxu0  ;;  %v1843_v46 = vpop.f32.mrb[10].mxu1  ;;  %v662_v9 = vadd.f32 (!%p1188_p12), %v661_v6, %v1837_v43  ;;  %v703_v16 = vmul.f32 (!%p1188_p12), %v1837_v43, %v1837_v43  ;;  %v733_v20 = vadd.f32 (!%p1188_p12), %v732_v17, %v702_v13  ;;  %v714_v17 = vmul.f32 (!%p1188_p12), %v1811_v30, %v1811_v30 }
 0x15a   : > { %v1845_v47 = vpop.f32.mrb[11].mxu0  ;;  %v1847_v48 = vpop.f32.mrb[11].mxu1  ;;  %v706_v57 = vmul.f32 (!%p1188_p12), %v1841_v45, %v1841_v45 }
 0x15b   : > { %v663_v12 = vadd.f32 (!%p1188_p12), %v662_v9, %v1845_v47  ;;  %v704_v19 = vmul.f32 (!%p1188_p12), %v1845_v47, %v1845_v47  ;;  %v734_v23 = vadd.f32 (!%p1188_p12), %v733_v20, %v703_v16  ;;  %v715_v20 = vmul.f32 (!%p1188_p12), %v1823_v36, %v1823_v36 }
 0x15c   : > { %653 = sbr.rel (%p1188_p12) target bundleno = 410 (0x19a), region = 52 }
 0x15d   : > { %v664_v15 = vadd.f32 (!%p1188_p12), %v1833_v41, %v663_v12  ;;  %v735_v58 = vadd.f32 (!%p1188_p12), %v734_v23, %v704_v19  ;;  %v716_v23 = vmul.f32 (!%p1188_p12), %v1831_v40, %v1831_v40 }
 0x15f   : > { %v1849_v49 = vpop.f32.mrb[12].mxu0  ;;  %v1851_v50 = vpop.f32.mrb[12].mxu1  ;;  %v665_v18 = vadd.f32 (!%p1188_p12), %v1841_v45, %v664_v15  ;;  %v736_v61 = vadd.f32 (!%p1188_p12), %v735_v58, %v705_v22  ;;  %v717_v58 = vmul.f32 (!%p1188_p12), %v1819_v34, %v1819_v34 }
 0x160   : > { %v1853_v51 = vpop.f32.mrb[13].mxu0  ;;  %v1855_v52 = vpop.f32.mrb[13].mxu1  ;;  %v709_v2 = vmul.f32 (!%p1188_p12), %v1849_v49, %v1849_v49 }
 0x161   : > { %v1857_v53 = vpop.f32.mrb[14].mxu0  ;;  %v1859_v54 = vpop.f32.mrb[14].mxu1  ;;  %v666_v21 = vadd.f32 (!%p1188_p12), %v665_v18, %v1853_v51  ;;  %v707_v60 = vmul.f32 (!%p1188_p12), %v1853_v51, %v1853_v51  ;;  %v737_v0 = vadd.f32 (!%p1188_p12), %v736_v61, %v706_v57  ;;  %v718_v61 = vmul.f32 (!%p1188_p12), %v1827_v38, %v1827_v38 }
 0x162   : > { %v1861_v55 = vpop.f32.mrb[15].mxu0  ;;  %v1863_v56 = vpop.f32.mrb[15].mxu1  ;;  %v710_v5 = vmul.f32 (!%p1188_p12), %v1857_v53, %v1857_v53 }
 0x163   : > { %v667_v24 = vadd.f32 %v666_v21, %v1861_v55  ;;  %v708_v63 = vmul.f32 %v1861_v55, %v1861_v55  ;;  %v738_v3 = vadd.f32 %v737_v0, %v707_v60  ;;  %v719_v0 = vmul.f32 %v1839_v44, %v1839_v44 }
 0x165   : > { %v668_v59 = vadd.f32 %v1849_v49, %v667_v24  ;;  %v739_v6 = vadd.f32 %v738_v3, %v708_v63  ;;  %v720_v3 = vmul.f32 %v1847_v48, %v1847_v48 }
 0x167   : > { %v669_v62 = vadd.f32 %v1857_v53, %v668_v59  ;;  %v740_v9 = vadd.f32 %v739_v6, %v709_v2  ;;  %v721_v6 = vmul.f32 %v1835_v42, %v1835_v42 }
 0x169   : > { %v670_v1 = vadd.f32 %v669_v62, %v1807_v28  ;;  %v741_v12 = vadd.f32 %v740_v9, %v710_v5  ;;  %v722_v9 = vmul.f32 %v1843_v46, %v1843_v46 }
 0x16b   : > { %v671_v4 = vadd.f32 %v670_v1, %v1815_v32  ;;  %v742_v15 = vadd.f32 %v741_v12, %v711_v8  ;;  %v723_v12 = vmul.f32 %v1855_v52, %v1855_v52 }
 0x16d   : > { %v672_v7 = vadd.f32 %v1803_v26, %v671_v4  ;;  %v743_v18 = vadd.f32 %v742_v15, %v712_v11  ;;  %v724_v15 = vmul.f32 %v1863_v56, %v1863_v56 }
 0x16f   : > { %v673_v10 = vadd.f32 %v1811_v30, %v672_v7  ;;  %v744_v21 = vadd.f32 %v743_v18, %v713_v14  ;;  %v725_v18 = vmul.f32 %v1851_v50, %v1851_v50 }
 0x171   : > { %v674_v13 = vadd.f32 %v673_v10, %v1823_v36  ;;  %v745_v24 = vadd.f32 %v744_v21, %v714_v17  ;;  %v726_v21 = vmul.f32 %v1859_v54, %v1859_v54 }
 0x173   : > { %v675_v16 = vadd.f32 %v674_v13, %v1831_v40  ;;  %v746_v59 = vadd.f32 %v745_v24, %v715_v20 }
 0x175   : > { %v676_v19 = vadd.f32 %v1819_v34, %v675_v16  ;;  %v747_v62 = vadd.f32 %v746_v59, %v716_v23 }
 0x177   : > { %v677_v22 = vadd.f32 %v1827_v38, %v676_v19  ;;  %v748_v1 = vadd.f32 %v747_v62, %v717_v58 }
 0x179   : > { %v678_v57 = vadd.f32 %v677_v22, %v1839_v44  ;;  %v749_v4 = vadd.f32 %v748_v1, %v718_v61 }
 0x17b   : > { %v679_v60 = vadd.f32 %v678_v57, %v1847_v48  ;;  %v750_v7 = vadd.f32 %v749_v4, %v719_v0  ;;  %v694_v4 = vld [vmem:[#allocation3] sm:$0x1] }
 0x17d   : > { %v680_v63 = vadd.f32 %v1835_v42, %v679_v60  ;;  %v751_v10 = vadd.f32 %v750_v7, %v720_v3  ;;  %v654_v60 = vld [vmem:[#allocation2] sm:$0x1] }
 0x17f   : > { %v681_v2 = vadd.f32 %v1843_v46, %v680_v63  ;;  %v752_v13 = vadd.f32 %v751_v10, %v721_v6 }
 0x181   : > { %v682_v5 = vadd.f32 %v681_v2, %v1855_v52  ;;  %v753_v16 = vadd.f32 %v752_v13, %v722_v9 }
 0x183   : > { %v683_v8 = vadd.f32 %v682_v5, %v1863_v56  ;;  %v754_v19 = vadd.f32 %v753_v16, %v723_v12 }
 0x185   : > { %v684_v11 = vadd.f32 %v1851_v50, %v683_v8  ;;  %v755_v22 = vadd.f32 %v754_v19, %v724_v15 }
 0x187   : > { %v685_v14 = vadd.f32 %v1859_v54, %v684_v11  ;;  %v756_v24 = vadd.f32 %v755_v22, %v725_v18 }
 0x189   : > { %v686_v17 = vrot.slane %v685_v14, 4  ;;  %v757_v58 = vadd.f32 %v756_v24, %v726_v21 }
 0x18b   : > { %v687_v20 = vadd.f32 %v686_v17, %v685_v14  ;;  %v758_v61 = vrot.slane %v757_v58, 4 }
 0x18d   : > { %v688_v23 = vrot.slane %v687_v20, 2  ;;  %v759_v63 = vadd.f32 %v758_v61, %v757_v58 }
 0x18f   : > { %v689_v57 = vadd.f32 %v688_v23, %v687_v20  ;;  %v760_v1 = vrot.slane %v759_v63, 2 }
 0x191   : > { %v690_v59 = vrot.slane %v689_v57, 1  ;;  %v761_v2 = vadd.f32 %v760_v1, %v759_v63 }
 0x193   : > { %v691_v62 = vadd.f32 %v690_v59, %v689_v57  ;;  %v762_v3 = vrot.slane %v761_v2, 1 }
 0x195   : > { %v692_v0 = vadd.f32 %v691_v62, %v654_v60  ;;  %v763_v5 = vadd.f32 %v762_v3, %v761_v2 }
 0x197   : > { %693 = vst [vmem:[#allocation2] sm:$0x1] %v692_v0  ;;  %v764_v6 = vadd.f32 %v763_v5, %v694_v4 }
 0x199   : > { %765 = vst [vmem:[#allocation3] sm:$0x1] %v764_v6 }
 0x19a PF: > { %p766_p13 = scmp.eq.s32.totalorder %s1621_s16, 1 }
 0x19c   : > { %p767_p0 = pnand %p766_p13, %p291_p8 }
 0x19d   : > { %v778_v15 = vld [vmem:[#allocation6] sm:$0x1] (!%p767_p0)  ;;  %v782_v18 = vld [vmem:[%s2103_s3] sm:$0x1] (!%p767_p0) }
 0x19e   : > { %770 = sbr.rel (%p767_p0) target bundleno = 443 (0x1bb), region = 56  ;;  %v771_v7 = vld [vmem:[#allocation2] sm:$0x1] (!%p767_p0) }
 0x19f   : > { %v772_v9 = vmul.f32 (!%p767_p0), 0.001953125, %v771_v7 }
 0x1a0   : > { %v773_v8 = vld [vmem:[#allocation3] sm:$0x1] (!%p767_p0) }
 0x1a1   : > { %v774_v10 = vmul.f32 (!%p767_p0), 0.001953125, %v773_v8  ;;  %v775_v11 = vmul.f32 (!%p767_p0), %v772_v9, %v772_v9 }
 0x1a3   : > { %v776_v12 = vsub.f32 (!%p767_p0), %v774_v10, %v775_v11 }
 0x1a5   : > { %v777_v13 = vmax.f32 %v776_v12, 0.0 }
 0x1a7   : > { %v779_v14 = vadd.f32 1e-05, %v777_v13 }
 0x1a9   : > { %1529 = vrsqrt.f32 %v779_v14 }
 0x1b3   : > { %v1530_v16 = vpop.eup %1529 }
 0x1b4   : > { %v781_v17 = vmul.f32 %v1530_v16, %v778_v15 }
 0x1b6   : > { %v783_v19 = vmul.f32 %v781_v17, %v772_v9  ;;  %786 = vst [vmem:[#allocation2] sm:$0x1] %v781_v17 }
 0x1b8   : > { %v784_v20 = vsub.f32 %v782_v18, %v783_v19 }
 0x1ba   : > { %785 = vst [vmem:[#allocation3] sm:$0x1] %v784_v20 }
 0x1bb PF: > { %p1189_p1 = scmp.ne.s32.totalorder %s1621_s16, 1 }
 0x1bd   : > { %789 = sbr.rel (%p1189_p1) target bundleno = 471 (0x1d7), region = 60  ;;  %v1969_v21 = vld [vmem:[#allocation2] ss:$0 sm:$0xff] (!%p1189_p1) }
 0x1be   : > { %v797_v23 = vmul.f32 (!%p1189_p1), %v1969_v21, %v1805_v27  ;;  %v798_v24 = vmul.f32 (!%p1189_p1), %v1969_v21, %v1813_v31  ;;  %v799_v57 = vmul.f32 (!%p1189_p1), %v1801_v25, %v1969_v21  ;;  %v800_v58 = vmul.f32 (!%p1189_p1), %v1809_v29, %v1969_v21 }
 0x1bf   : > { %v801_v59 = vmul.f32 (!%p1189_p1), %v1969_v21, %v1821_v35  ;;  %v802_v60 = vmul.f32 (!%p1189_p1), %v1969_v21, %v1829_v39  ;;  %v803_v61 = vmul.f32 (!%p1189_p1), %v1817_v33, %v1969_v21  ;;  %v804_v27 = vmul.f32 (!%p1189_p1), %v1825_v37, %v1969_v21 }
 0x1c0   : > { %v805_v1 = vmul.f32 (!%p1189_p1), %v1969_v21, %v1837_v43  ;;  %v806_v2 = vmul.f32 (!%p1189_p1), %v1969_v21, %v1845_v47  ;;  %v807_v5 = vmul.f32 (!%p1189_p1), %v1833_v41, %v1969_v21  ;;  %v808_v6 = vmul.f32 (!%p1189_p1), %v1841_v45, %v1969_v21 }
 0x1c1   : > { %v1971_v22 = vld [vmem:[#allocation3] ss:$0 sm:$0xff] (!%p1189_p1)  ;;  %v809_v43 = vmul.f32 (!%p1189_p1), %v1969_v21, %v1853_v51  ;;  %v810_v47 = vmul.f32 (!%p1189_p1), %v1969_v21, %v1861_v55  ;;  %v811_v45 = vmul.f32 (!%p1189_p1), %v1849_v49, %v1969_v21  ;;  %v812_v10 = vmul.f32 (!%p1189_p1), %v1857_v53, %v1969_v21 }
 0x1c2   : > { %v836_v31 = vadd.f32 (!%p1189_p1), %v1971_v22, %v797_v23  ;;  %v837_v25 = vadd.f32 (!%p1189_p1), %v1971_v22, %v798_v24  ;;  %v838_v29 = vadd.f32 (!%p1189_p1), %v1971_v22, %v799_v57  ;;  %v839_v62 = vadd.f32 (!%p1189_p1), %v1971_v22, %v800_v58 }
 0x1c3   : > { %v840_v35 = vadd.f32 (!%p1189_p1), %v1971_v22, %v801_v59  ;;  %v841_v39 = vadd.f32 (!%p1189_p1), %v1971_v22, %v802_v60  ;;  %v842_v63 = vadd.f32 (!%p1189_p1), %v1971_v22, %v803_v61  ;;  %v843_v33 = vadd.f32 (!%p1189_p1), %v1971_v22, %v804_v27 }
 0x1c4   : > { %v1261_v37 = vpack.c.bf16 %v837_v25, %v836_v31  ;;  %v1266_v0 = vpack.c.bf16 %v839_v62, %v838_v29  ;;  %v844_v7 = vadd.f32 %v1971_v22, %v805_v1  ;;  %v845_v8 = vadd.f32 %v1971_v22, %v806_v2 }
 0x1c5   : > { %v1271_v3 = vpack.c.bf16 %v841_v39, %v840_v35  ;;  %v1276_v4 = vpack.c.bf16 %v843_v33, %v842_v63  ;;  %v846_v41 = vadd.f32 %v1971_v22, %v807_v5  ;;  %v847_v9 = vadd.f32 %v1971_v22, %v808_v6 }
 0x1c6   : > { %1262 = vst [vmem:[%s1783_s29] sm:$0xff] %v1261_v37   ;;  %1338 = vst [vmem:[%s1783_s29 + $0x8] sm:$0xff] %v1266_v0   ;;  %v1281_v11 = vpack.c.bf16 %v845_v8, %v844_v7  ;;  %v848_v51 = vadd.f32 %v1971_v22, %v809_v43  ;;  %v849_v12 = vadd.f32 %v1971_v22, %v810_v47 }
 0x1c7   : > { %1339 = vst [vmem:[%s1783_s29 + $0x10] sm:$0xff] %v1271_v3   ;;  %1340 = vst [vmem:[%s1783_s29 + $0x18] sm:$0xff] %v1276_v4   ;;  %v813_v55 = vmul.f32 %v1969_v21, %v1807_v28  ;;  %v1286_v13 = vpack.c.bf16 %v847_v9, %v846_v41  ;;  %v850_v14 = vadd.f32 %v1971_v22, %v811_v45 }
 0x1c8   : > { %v851_v15 = vadd.f32 %v1971_v22, %v812_v10  ;;  %v814_v49 = vmul.f32 %v1969_v21, %v1815_v32  ;;  %1341 = vst [vmem:[%s1783_s29 + $0x20] sm:$0xff] %v1281_v11   ;;  %v1291_v53 = vpack.c.bf16 %v849_v12, %v848_v51  ;;  %v815_v17 = vmul.f32 %v1803_v26, %v1969_v21 }
 0x1c9   : > { %v852_v16 = vadd.f32 %v1971_v22, %v813_v55  ;;  %v816_v18 = vmul.f32 %v1811_v30, %v1969_v21  ;;  %1342 = vst [vmem:[%s1783_s29 + $0x28] sm:$0xff] %v1286_v13   ;;  %v817_v20 = vmul.f32 %v1969_v21, %v1823_v36  ;;  %v818_v32 = vmul.f32 %v1969_v21, %v1831_v40 }
 0x1ca   : > { %v1296_v28 = vpack.c.bf16 %v851_v15, %v850_v14  ;;  %v853_v19 = vadd.f32 %v1971_v22, %v814_v49  ;;  %1343 = vst [vmem:[%s1783_s29 + $0x30] sm:$0xff] %v1291_v53   ;;  %v854_v23 = vadd.f32 %v1971_v22, %v815_v17  ;;  %v819_v26 = vmul.f32 %v1819_v34, %v1969_v21 }
 0x1cb   : > { %v855_v24 = vadd.f32 %v1971_v22, %v816_v18  ;;  %v820_v30 = vmul.f32 %v1827_v38, %v1969_v21  ;;  %v856_v36 = vadd.f32 %v1971_v22, %v817_v20  ;;  %v857_v58 = vadd.f32 %v1971_v22, %v818_v32 }
 0x1cc   : > { %1344 = vst [vmem:[%s1783_s29 + $0x38] sm:$0xff] %v1296_v28   ;;  %v1301_v57 = vpack.c.bf16 %v853_v19, %v852_v16  ;;  %v821_v40 = vmul.f32 %v1969_v21, %v1839_v44  ;;  %v858_v60 = vadd.f32 %v1971_v22, %v819_v26  ;;  %v822_v34 = vmul.f32 %v1969_v21, %v1847_v48 }
 0x1cd   : > { %v1306_v59 = vpack.c.bf16 %v855_v24, %v854_v23  ;;  %v859_v61 = vadd.f32 %v1971_v22, %v820_v30  ;;  %v1311_v38 = vpack.c.bf16 %v857_v58, %v856_v36  ;;  %v823_v31 = vmul.f32 %v1835_v42, %v1969_v21 }
 0x1ce   : > { %1345 = vst [vmem:[%s1783_s29 + $0x40] sm:$0xff] %v1301_v57   ;;  %v860_v27 = vadd.f32 %v1971_v22, %v821_v40  ;;  %v824_v25 = vmul.f32 %v1843_v46, %v1969_v21  ;;  %v861_v29 = vadd.f32 %v1971_v22, %v822_v34  ;;  %v825_v62 = vmul.f32 %v1969_v21, %v1855_v52 }
 0x1cf   : > { %1346 = vst [vmem:[%s1783_s29 + $0x48] sm:$0xff] %v1306_v59   ;;  %v1316_v44 = vpack.c.bf16 %v859_v61, %v858_v60  ;;  %v826_v48 = vmul.f32 %v1969_v21, %v1863_v56  ;;  %1347 = vst [vmem:[%s1783_s29 + $0x50] sm:$0xff] %v1311_v38   ;;  %v862_v35 = vadd.f32 %v1971_v22, %v823_v31 }
 0x1d0   : > { %v863_v42 = vadd.f32 %v1971_v22, %v824_v25  ;;  %v827_v46 = vmul.f32 %v1851_v50, %v1969_v21  ;;  %v828_v39 = vmul.f32 %v1859_v54, %v1969_v21  ;;  %v1321_v63 = vpack.c.bf16 %v861_v29, %v860_v27 }
 0x1d1   : > { %1348 = vst [vmem:[%s1783_s29 + $0x58] sm:$0xff] %v1316_v44   ;;  %v864_v52 = vadd.f32 %v1971_v22, %v825_v62  ;;  %v865_v33 = vadd.f32 %v1971_v22, %v826_v48 }
 0x1d2   : > { %v1326_v56 = vpack.c.bf16 %v863_v42, %v862_v35  ;;  %v866_v37 = vadd.f32 %v1971_v22, %v827_v46  ;;  %v867_v0 = vadd.f32 %v1971_v22, %v828_v39  ;;  %1349 = vst [vmem:[%s1783_s29 + $0x60] sm:$0xff] %v1321_v63  }
 0x1d3   : > { %v1331_v1 = vpack.c.bf16 %v865_v33, %v864_v52 }
 0x1d4   : > { %1350 = vst [vmem:[%s1783_s29 + $0x68] sm:$0xff] %v1326_v56   ;;  %v1336_v2 = vpack.c.bf16 %v867_v0, %v866_v37 }
 0x1d5   : > { %1351 = vst [vmem:[%s1783_s29 + $0x70] sm:$0xff] %v1331_v1  }
 0x1d6   : > { %1352 = vst [vmem:[%s1783_s29 + $0x78] sm:$0xff] %v1336_v2  }
 0x1d7 PF: > { %s16_s19 = sadd.s32 1, %s1633_s19   ;;  %s2113_s15 = smov %s1625_s17 }
 0x1d8   : > { %p13_p2 = scmp.ge.s32.totalorder %s16_s19, 6   ;;  %s2114_s16 = smov %s1629_s18 }
 0x1d9   : > { %s2115_s17 = smov %s2118_s21  ;;  %s2116_s18 = smov %s2122_s22 }
 0x1da   :  { %15 = sbr.rel (!%p13_p2) target bundleno = 4 (0x4), region = 96 }
 0x1e1   :  { %1059 = vsyncpa [#allocation5], 1 }
 0x1e2   :  { %1061 = vsyncpa [#allocation5 + $0x1], 1 }
 0x1e3   :  { %1062 = vsyncpa [#allocation7], 1 }

// kernel: a_call__.7
= control target key start
LH: loop header
LB: loop body
LE: loop exit
PB: predicated region body
PF: predicated region fallthrough
CT: control target
= control target key end

     0   :  { %s1571_s18 = smov 0   ;;  %s1573_s19 = smov 0   ;;  %s2001_s0 = inlined_call_operand.vmem [shape: bf16[512,128], index: 0, kind: input, shape index: {}]   ;;  %s2002_s1 = inlined_call_operand.vmem [shape: bf16[128,128], index: 1, kind: input, shape index: {}]   ;;  %s2003_s2 = inlined_call_operand.vmem [shape: f32[1,128], index: 2, kind: input, shape index: {}]   ;;  %s2004_s3 = inlined_call_operand.vmem [shape: f32[1,128], index: 3, kind: input, shape index: {}]   ;;  %s2005_s4 = inlined_call_operand.vmem [shape: bf16[512,128], index: 4, kind: input, shape index: {}]   ;;  %s2006_s5 = inlined_call_operand.vmem [shape: f32[512,128], index: 5, kind: output, shape index: {}]  }
   0x1   :  { %s1575_s20 = smov 0   ;;  %s1577_s21 = smov 0  }
   0x2   :  { %s1579_s22 = smov 0  }
   0x3 LB: > { %s27_s23 = sadd.s32 1, %s1530_s20  ;;  %s30_s24 = sadd.s32 1, %s1534_s21  ;;  %s1538_s22 = sphi %s1579_s22, %s15_s22   ;;  %s1534_s21 = sphi %s1577_s21, %s2010_s21   ;;  %s1530_s20 = sphi %s1575_s20, %s2009_s20   ;;  %s1526_s19 = sphi %s1573_s19, %s2008_s19   ;;  %s1522_s18 = sphi %s1571_s18, %s2007_s18  }
   0x4   : > { %p28_p0 = scmp.ge.s32.totalorder %s27_s23, 2  ;;  %p1229_p1 = scmp.ge.s32.totalorder %s1538_s22, 1 }
   0x5   : > { %p256_p2 = scmp.lt.s32.totalorder %s1538_s22, 5 }
   0x6   : > { %s2012_s23 = smov (%p28_p0, %s27_s23), 0  ;;  %s2014_s24 = smov (!%p28_p0, %s30_s24), %s1534_s21 }
   0x7   : > { %p257_p3 = pnand %p1229_p1, %p256_p2  ;;  %p32_p4 = scmp.ge.s32.totalorder %s2014_s24, 2 }
   0x8   : > { %s1230_s25 = sshll.u32 (!%p257_p3), %s1522_s18, 5  ;;  %s323_s26 = smul.u32 (!%p257_p3), %s1522_s18, %s1526_s19 }
   0x9   : > { %s2016_s24 = smov (%p32_p4, %s2014_s24), 0  ;;  %260 = sbr.rel (%p257_p3) target bundleno = 436 (0x1b4), region = 40 }
   0xa   : > { %p308_p5 = scmp.lt.s32.totalorder (!%p257_p3), %s1230_s25, 63  ;;  %p346_p6 = scmp.eq.s32.totalorder (!%p257_p3), %s1526_s19, 0 }
   0xb   : > { %s1232_s27 = sshll.u32 (!%p257_p3), %s323_s26, 5  ;;  %p347_p7 = scmp.eq.s32.totalorder (!%p257_p3), %s1522_s18, 0 }
   0xc   : > { %p325_p8 = scmp.lt.s32.totalorder (!%p257_p3), %s1232_s27, 63 }
   0xd   : > { %p348_p9 = pnand (!%p257_p3), %p347_p7, %p346_p6 }
  0x10   : > { %s2018_s25 = smov (!%p308_p5, %s1230_s25), 63  ;;  %s2020_s27 = smov (!%p325_p8, %s1232_s27), 63 }
  0x11   : > { %s1231_s28 = sshll.u32 %s2018_s25, 2  ;;  %s1233_s7 = sshll.u32 %s2020_s27, 2  ;;  %v1540_v0 = vmov (!%p348_p9), 0.0  }
  0x12   : > { %s1615_s6 = scalar_lea.vmem %s2001_s0, %s1231_s28  ;;  %s1235_s8 = sshll.u32 %s2020_s27, 3  ;;  %352 = vst [vmem:[#allocation2] sm:$0x1] (!%p348_p9), %v1540_v0  ;;  %353 = vst [vmem:[#allocation3] sm:$0x1] (!%p348_p9), %v1540_v0 }
  0x13   : > { %s1620_s11 = scalar_lea.vmem %s2005_s4, %s1233_s7  ;;  %s1625_s14 = scalar_lea.vmem %s2006_s5, %s1235_s8 }
  0x14   : > { %351 = sbr.rel (%p348_p9) target bundleno = 27 (0x1b), region = 44 }
  0x1b PF: > { %v1474_v1 = vld [vmem:[%s2002_s1] sm:$0xff]   ;;  %v1475_v2 = vld [vmem:[%s2002_s1 + $0x8] sm:$0xff]   ;;  %v1476_v3 = vld [vmem:[%s2002_s1 + $0x10] sm:$0xff]   ;;  %p1260_p10 = scmp.ne.s32.totalorder %s1526_s19, 0 }
  0x1c   : > { %1369 = vmatprep.subr.bf16.mxu0 %v1474_v1  ;;  %1417 = vmatprep.subr.bf16.mxu1 %v1474_v1  ;;  %v1477_v4 = vld [vmem:[%s2002_s1 + $0x18] sm:$0xff]   ;;  %v1482_v5 = vld [vmem:[%s1615_s6] sm:$0xff]   ;;  %v1479_v8 = vld [vmem:[%s2002_s1 + $0x28] sm:$0xff]  }
  0x1d   : > { %1370 = vmatpush3.bf16.msra.mxu0 %v1474_v1  ;;  %1425 = vmatpush3.bf16.msra.mxu1 %v1474_v1  ;;  %v1483_v6 = vld [vmem:[%s1615_s6 + $0x40] sm:$0xff]   ;;  %v1480_v9 = vld [vmem:[%s2002_s1 + $0x30] sm:$0xff]   ;;  %v1481_v10 = vld [vmem:[%s2002_s1 + $0x38] sm:$0xff]  }
  0x1e   : > { %1371 = vmatprep.subr.bf16.mxu0 %v1475_v2  ;;  %1418 = vmatprep.subr.bf16.mxu1 %v1475_v2  ;;  %v1478_v7 = vld [vmem:[%s2002_s1 + $0x20] sm:$0xff]   ;;  %v1484_v11 = vld [vmem:[%s1615_s6 + $0x8] sm:$0xff]   ;;  %v1486_v13 = vld [vmem:[%s1615_s6 + $0x10] sm:$0xff]  }
  0x1f   : > { %1385 = vmatprep.mubr.bf16.mxu0 %v1482_v5  ;;  %1401 = vmatprep.mubr.bf16.mxu1 %v1483_v6  ;;  %v1485_v12 = vld [vmem:[%s1615_s6 + $0x48] sm:$0xff]   ;;  %v1487_v14 = vld [vmem:[%s1615_s6 + $0x50] sm:$0xff]   ;;  %v1488_v15 = vld [vmem:[%s1615_s6 + $0x18] sm:$0xff]  }
  0x20   : > { %v1489_v16 = vld [vmem:[%s1615_s6 + $0x58] sm:$0xff]   ;;  %v1490_v17 = vld [vmem:[%s1615_s6 + $0x20] sm:$0xff]   ;;  %v1492_v19 = vld [vmem:[%s1615_s6 + $0x28] sm:$0xff]  }
  0x21   : > { %1372 = vmatpush3.bf16.msra.mxu0 %v1475_v2  ;;  %1426 = vmatpush3.bf16.msra.mxu1 %v1475_v2  ;;  %v1491_v18 = vld [vmem:[%s1615_s6 + $0x60] sm:$0xff]   ;;  %v1493_v20 = vld [vmem:[%s1615_s6 + $0x68] sm:$0xff]   ;;  %v1494_v21 = vld [vmem:[%s1615_s6 + $0x30] sm:$0xff]  }
  0x22   : > { %1373 = vmatprep.subr.bf16.mxu0 %v1476_v3  ;;  %1419 = vmatprep.subr.bf16.mxu1 %v1476_v3  ;;  %v1495_v22 = vld [vmem:[%s1615_s6 + $0x70] sm:$0xff]   ;;  %v1496_v23 = vld [vmem:[%s1615_s6 + $0x38] sm:$0xff]  }
  0x23   : > { %v1497_v24 = vld [vmem:[%s1615_s6 + $0x78] sm:$0xff]  }
  0x25   : > { %1374 = vmatpush3.bf16.msra.mxu0 %v1476_v3  ;;  %1427 = vmatpush3.bf16.msra.mxu1 %v1476_v3 }
  0x26   : > { %1375 = vmatprep.subr.bf16.mxu0 %v1477_v4  ;;  %1420 = vmatprep.subr.bf16.mxu1 %v1477_v4 }
  0x29   : > { %1376 = vmatpush3.bf16.msra.mxu0 %v1477_v4  ;;  %1428 = vmatpush3.bf16.msra.mxu1 %v1477_v4 }
  0x2a   : > { %1377 = vmatprep.subr.bf16.mxu0 %v1478_v7  ;;  %1421 = vmatprep.subr.bf16.mxu1 %v1478_v7 }
  0x2d   : > { %1378 = vmatpush3.bf16.msra.mxu0 %v1478_v7  ;;  %1429 = vmatpush3.bf16.msra.mxu1 %v1478_v7 }
  0x2e   : > { %1379 = vmatprep.subr.bf16.mxu0 %v1479_v8  ;;  %1422 = vmatprep.subr.bf16.mxu1 %v1479_v8 }
  0x31   : > { %1380 = vmatpush3.bf16.msra.mxu0 %v1479_v8  ;;  %1430 = vmatpush3.bf16.msra.mxu1 %v1479_v8 }
  0x32   : > { %1381 = vmatprep.subr.bf16.mxu0 %v1480_v9  ;;  %1423 = vmatprep.subr.bf16.mxu1 %v1480_v9 }
  0x35   : > { %1382 = vmatpush3.bf16.msra.mxu0 %v1480_v9  ;;  %1431 = vmatpush3.bf16.msra.mxu1 %v1480_v9 }
  0x36   : > { %1383 = vmatprep.subr.bf16.mxu0 %v1481_v10  ;;  %1424 = vmatprep.subr.bf16.mxu1 %v1481_v10 }
  0x39   : > { %1384 = vmatpush3.bf16.msra.mxu0 %v1481_v10  ;;  %1432 = vmatpush3.bf16.msra.mxu1 %v1481_v10 }
  0x3c   : > { %1386 = vmatmul.mubr.bf16.vlgmr.msra.gmra.mrb[0].mxu0 %v1484_v11  ;;  %1402 = vmatmul.mubr.bf16.vlgmr.msra.gmra.mrb[0].mxu1 %v1485_v12 }
  0x3d   : > { %1389 = vmatprep.mubr.bf16.mxu0 %v1486_v13  ;;  %1405 = vmatprep.mubr.bf16.mxu1 %v1487_v14 }
  0x44   : > { %1390 = vmatmul.mubr.bf16.gmra.mrb[4].mxu0 %v1488_v15  ;;  %1406 = vmatmul.mubr.bf16.gmra.mrb[4].mxu1 %v1489_v16 }
  0x45   : > { %1393 = vmatprep.mubr.bf16.mxu0 %v1490_v17  ;;  %1409 = vmatprep.mubr.bf16.mxu1 %v1491_v18 }
  0x4c   : > { %1394 = vmatmul.mubr.bf16.gmra.mrb[8].mxu0 %v1492_v19  ;;  %1410 = vmatmul.mubr.bf16.gmra.mrb[8].mxu1 %v1493_v20 }
  0x4d   : > { %1397 = vmatprep.mubr.bf16.mxu0 %v1494_v21  ;;  %1413 = vmatprep.mubr.bf16.mxu1 %v1495_v22 }
  0x54   : > { %1398 = vmatmul.mubr.bf16.gmra.mrb[12].mxu0 %v1496_v23  ;;  %1414 = vmatmul.mubr.bf16.gmra.mrb[12].mxu1 %v1497_v24 }
 0x10f   : > { %v1667_v25 = vpop.f32.mrb[0].mxu0  ;;  %v1669_v26 = vpop.f32.mrb[0].mxu1 }
 0x110   : > { %v1671_v27 = vpop.f32.mrb[1].mxu0  ;;  %v1673_v28 = vpop.f32.mrb[1].mxu1  ;;  %v753_v63 = vmul.f32 (!%p1260_p10), %v1667_v25, %v1667_v25 }
 0x111   : > { %v1675_v29 = vpop.f32.mrb[2].mxu0  ;;  %v1677_v30 = vpop.f32.mrb[2].mxu1  ;;  %v751_v60 = vmul.f32 (!%p1260_p10), %v1671_v27, %v1671_v27 }
 0x112   : > { %v1679_v31 = vpop.f32.mrb[3].mxu0  ;;  %v1681_v32 = vpop.f32.mrb[3].mxu1  ;;  %v754_v1 = vmul.f32 (!%p1260_p10), %v1675_v29, %v1675_v29 }
 0x113   : > { %v711_v57 = vadd.f32 (!%p1260_p10), %v1679_v31, %v1671_v27  ;;  %v752_v61 = vmul.f32 (!%p1260_p10), %v1679_v31, %v1679_v31 }
 0x115   : > { %v712_v58 = vadd.f32 (!%p1260_p10), %v1667_v25, %v711_v57  ;;  %v783_v2 = vadd.f32 (!%p1260_p10), %v752_v61, %v751_v60 }
 0x117   : > { %v1683_v33 = vpop.f32.mrb[4].mxu0  ;;  %v1685_v34 = vpop.f32.mrb[4].mxu1  ;;  %v713_v59 = vadd.f32 (!%p1260_p10), %v1675_v29, %v712_v58  ;;  %v784_v5 = vadd.f32 (!%p1260_p10), %v783_v2, %v753_v63 }
 0x118   : > { %v1687_v35 = vpop.f32.mrb[5].mxu0  ;;  %v1689_v36 = vpop.f32.mrb[5].mxu1  ;;  %v757_v10 = vmul.f32 (!%p1260_p10), %v1683_v33, %v1683_v33 }
 0x119   : > { %v1691_v37 = vpop.f32.mrb[6].mxu0  ;;  %v1693_v38 = vpop.f32.mrb[6].mxu1  ;;  %v714_v62 = vadd.f32 (!%p1260_p10), %v713_v59, %v1687_v35  ;;  %v755_v4 = vmul.f32 (!%p1260_p10), %v1687_v35, %v1687_v35  ;;  %v785_v8 = vadd.f32 (!%p1260_p10), %v784_v5, %v754_v1 }
 0x11a   : > { %v1695_v39 = vpop.f32.mrb[7].mxu0  ;;  %v1697_v40 = vpop.f32.mrb[7].mxu1  ;;  %v758_v13 = vmul.f32 (!%p1260_p10), %v1691_v37, %v1691_v37 }
 0x11b   : > { %v715_v0 = vadd.f32 (!%p1260_p10), %v714_v62, %v1695_v39  ;;  %v756_v7 = vmul.f32 (!%p1260_p10), %v1695_v39, %v1695_v39  ;;  %v786_v11 = vadd.f32 (!%p1260_p10), %v785_v8, %v755_v4  ;;  %v767_v8 = vmul.f32 (!%p1260_p10), %v1673_v28, %v1673_v28 }
 0x11d   : > { %v716_v3 = vadd.f32 (!%p1260_p10), %v1683_v33, %v715_v0  ;;  %v787_v14 = vadd.f32 (!%p1260_p10), %v786_v11, %v756_v7  ;;  %v768_v11 = vmul.f32 (!%p1260_p10), %v1681_v32, %v1681_v32 }
 0x11f   : > { %v1699_v41 = vpop.f32.mrb[8].mxu0  ;;  %v1701_v42 = vpop.f32.mrb[8].mxu1  ;;  %v717_v6 = vadd.f32 (!%p1260_p10), %v1691_v37, %v716_v3  ;;  %v788_v17 = vadd.f32 (!%p1260_p10), %v787_v14, %v757_v10  ;;  %v769_v14 = vmul.f32 (!%p1260_p10), %v1669_v26, %v1669_v26 }
 0x120   : > { %v1703_v43 = vpop.f32.mrb[9].mxu0  ;;  %v1705_v44 = vpop.f32.mrb[9].mxu1  ;;  %v761_v22 = vmul.f32 (!%p1260_p10), %v1699_v41, %v1699_v41 }
 0x121   : > { %v1707_v45 = vpop.f32.mrb[10].mxu0  ;;  %v1709_v46 = vpop.f32.mrb[10].mxu1  ;;  %v718_v9 = vadd.f32 (!%p1260_p10), %v717_v6, %v1703_v43  ;;  %v759_v16 = vmul.f32 (!%p1260_p10), %v1703_v43, %v1703_v43  ;;  %v789_v20 = vadd.f32 (!%p1260_p10), %v788_v17, %v758_v13  ;;  %v770_v17 = vmul.f32 (!%p1260_p10), %v1677_v30, %v1677_v30 }
 0x122   : > { %v1711_v47 = vpop.f32.mrb[11].mxu0  ;;  %v1713_v48 = vpop.f32.mrb[11].mxu1  ;;  %v762_v57 = vmul.f32 (!%p1260_p10), %v1707_v45, %v1707_v45 }
 0x123   : > { %v719_v12 = vadd.f32 (!%p1260_p10), %v718_v9, %v1711_v47  ;;  %v760_v19 = vmul.f32 (!%p1260_p10), %v1711_v47, %v1711_v47  ;;  %v790_v23 = vadd.f32 (!%p1260_p10), %v789_v20, %v759_v16  ;;  %v771_v20 = vmul.f32 (!%p1260_p10), %v1689_v36, %v1689_v36 }
 0x124   : > { %709 = sbr.rel (%p1260_p10) target bundleno = 354 (0x162), region = 48 }
 0x125   : > { %v720_v15 = vadd.f32 (!%p1260_p10), %v1699_v41, %v719_v12  ;;  %v791_v58 = vadd.f32 (!%p1260_p10), %v790_v23, %v760_v19  ;;  %v772_v23 = vmul.f32 (!%p1260_p10), %v1697_v40, %v1697_v40 }
 0x127   : > { %v1715_v49 = vpop.f32.mrb[12].mxu0  ;;  %v1717_v50 = vpop.f32.mrb[12].mxu1  ;;  %v721_v18 = vadd.f32 (!%p1260_p10), %v1707_v45, %v720_v15  ;;  %v792_v61 = vadd.f32 (!%p1260_p10), %v791_v58, %v761_v22  ;;  %v773_v58 = vmul.f32 (!%p1260_p10), %v1685_v34, %v1685_v34 }
 0x128   : > { %v1719_v51 = vpop.f32.mrb[13].mxu0  ;;  %v1721_v52 = vpop.f32.mrb[13].mxu1  ;;  %v765_v2 = vmul.f32 (!%p1260_p10), %v1715_v49, %v1715_v49 }
 0x129   : > { %v1723_v53 = vpop.f32.mrb[14].mxu0  ;;  %v1725_v54 = vpop.f32.mrb[14].mxu1  ;;  %v722_v21 = vadd.f32 (!%p1260_p10), %v721_v18, %v1719_v51  ;;  %v763_v60 = vmul.f32 (!%p1260_p10), %v1719_v51, %v1719_v51  ;;  %v793_v0 = vadd.f32 (!%p1260_p10), %v792_v61, %v762_v57  ;;  %v774_v61 = vmul.f32 (!%p1260_p10), %v1693_v38, %v1693_v38 }
 0x12a   : > { %v1727_v55 = vpop.f32.mrb[15].mxu0  ;;  %v1729_v56 = vpop.f32.mrb[15].mxu1  ;;  %v766_v5 = vmul.f32 (!%p1260_p10), %v1723_v53, %v1723_v53 }
 0x12b   : > { %v723_v24 = vadd.f32 %v722_v21, %v1727_v55  ;;  %v764_v63 = vmul.f32 %v1727_v55, %v1727_v55  ;;  %v794_v3 = vadd.f32 %v793_v0, %v763_v60  ;;  %v775_v0 = vmul.f32 %v1705_v44, %v1705_v44 }
 0x12d   : > { %v724_v59 = vadd.f32 %v1715_v49, %v723_v24  ;;  %v795_v6 = vadd.f32 %v794_v3, %v764_v63  ;;  %v776_v3 = vmul.f32 %v1713_v48, %v1713_v48 }
 0x12f   : > { %v725_v62 = vadd.f32 %v1723_v53, %v724_v59  ;;  %v796_v9 = vadd.f32 %v795_v6, %v765_v2  ;;  %v777_v6 = vmul.f32 %v1701_v42, %v1701_v42 }
 0x131   : > { %v726_v1 = vadd.f32 %v725_v62, %v1673_v28  ;;  %v797_v12 = vadd.f32 %v796_v9, %v766_v5  ;;  %v778_v9 = vmul.f32 %v1709_v46, %v1709_v46 }
 0x133   : > { %v727_v4 = vadd.f32 %v726_v1, %v1681_v32  ;;  %v798_v15 = vadd.f32 %v797_v12, %v767_v8  ;;  %v779_v12 = vmul.f32 %v1721_v52, %v1721_v52 }
 0x135   : > { %v728_v7 = vadd.f32 %v1669_v26, %v727_v4  ;;  %v799_v18 = vadd.f32 %v798_v15, %v768_v11  ;;  %v780_v15 = vmul.f32 %v1729_v56, %v1729_v56 }
 0x137   : > { %v729_v10 = vadd.f32 %v1677_v30, %v728_v7  ;;  %v800_v21 = vadd.f32 %v799_v18, %v769_v14  ;;  %v781_v18 = vmul.f32 %v1717_v50, %v1717_v50 }
 0x139   : > { %v730_v13 = vadd.f32 %v729_v10, %v1689_v36  ;;  %v801_v24 = vadd.f32 %v800_v21, %v770_v17  ;;  %v782_v21 = vmul.f32 %v1725_v54, %v1725_v54 }
 0x13b   : > { %v731_v16 = vadd.f32 %v730_v13, %v1697_v40  ;;  %v802_v59 = vadd.f32 %v801_v24, %v771_v20 }
 0x13d   : > { %v732_v19 = vadd.f32 %v1685_v34, %v731_v16  ;;  %v803_v62 = vadd.f32 %v802_v59, %v772_v23 }
 0x13f   : > { %v733_v22 = vadd.f32 %v1693_v38, %v732_v19  ;;  %v804_v1 = vadd.f32 %v803_v62, %v773_v58 }
 0x141   : > { %v734_v57 = vadd.f32 %v733_v22, %v1705_v44  ;;  %v805_v4 = vadd.f32 %v804_v1, %v774_v61 }
 0x143   : > { %v735_v60 = vadd.f32 %v734_v57, %v1713_v48  ;;  %v806_v7 = vadd.f32 %v805_v4, %v775_v0  ;;  %v750_v4 = vld [vmem:[#allocation3] sm:$0x1] }
 0x145   : > { %v736_v63 = vadd.f32 %v1701_v42, %v735_v60  ;;  %v807_v10 = vadd.f32 %v806_v7, %v776_v3  ;;  %v710_v60 = vld [vmem:[#allocation2] sm:$0x1] }
 0x147   : > { %v737_v2 = vadd.f32 %v1709_v46, %v736_v63  ;;  %v808_v13 = vadd.f32 %v807_v10, %v777_v6 }
 0x149   : > { %v738_v5 = vadd.f32 %v737_v2, %v1721_v52  ;;  %v809_v16 = vadd.f32 %v808_v13, %v778_v9 }
 0x14b   : > { %v739_v8 = vadd.f32 %v738_v5, %v1729_v56  ;;  %v810_v19 = vadd.f32 %v809_v16, %v779_v12 }
 0x14d   : > { %v740_v11 = vadd.f32 %v1717_v50, %v739_v8  ;;  %v811_v22 = vadd.f32 %v810_v19, %v780_v15 }
 0x14f   : > { %v741_v14 = vadd.f32 %v1725_v54, %v740_v11  ;;  %v812_v24 = vadd.f32 %v811_v22, %v781_v18 }
 0x151   : > { %v742_v17 = vrot.slane %v741_v14, 4  ;;  %v813_v58 = vadd.f32 %v812_v24, %v782_v21 }
 0x153   : > { %v743_v20 = vadd.f32 %v742_v17, %v741_v14  ;;  %v814_v61 = vrot.slane %v813_v58, 4 }
 0x155   : > { %v744_v23 = vrot.slane %v743_v20, 2  ;;  %v815_v63 = vadd.f32 %v814_v61, %v813_v58 }
 0x157   : > { %v745_v57 = vadd.f32 %v744_v23, %v743_v20  ;;  %v816_v1 = vrot.slane %v815_v63, 2 }
 0x159   : > { %v746_v59 = vrot.slane %v745_v57, 1  ;;  %v817_v2 = vadd.f32 %v816_v1, %v815_v63 }
 0x15b   : > { %v747_v62 = vadd.f32 %v746_v59, %v745_v57  ;;  %v818_v3 = vrot.slane %v817_v2, 1 }
 0x15d   : > { %v748_v0 = vadd.f32 %v747_v62, %v710_v60  ;;  %v819_v5 = vadd.f32 %v818_v3, %v817_v2 }
 0x15f   : > { %749 = vst [vmem:[#allocation2] sm:$0x1] %v748_v0  ;;  %v820_v6 = vadd.f32 %v819_v5, %v750_v4 }
 0x161   : > { %821 = vst [vmem:[#allocation3] sm:$0x1] %v820_v6 }
 0x162 PF: > { %p822_p11 = scmp.eq.s32.totalorder %s1526_s19, 1 }
 0x164   : > { %p823_p12 = pnand %p822_p11, %p347_p7 }
 0x165   : > { %v834_v15 = vld [vmem:[%s2003_s2] sm:$0x1] (!%p823_p12) }
 0x166   : > { %826 = sbr.rel (%p823_p12) target bundleno = 387 (0x183), region = 52  ;;  %v827_v7 = vld [vmem:[#allocation2] sm:$0x1] (!%p823_p12) }
 0x167   : > { %v828_v9 = vmul.f32 (!%p823_p12), 0.001953125, %v827_v7  ;;  %v838_v18 = vld [vmem:[%s2004_s3] sm:$0x1] (!%p823_p12) }
 0x168   : > { %v829_v8 = vld [vmem:[#allocation3] sm:$0x1] (!%p823_p12) }
 0x169   : > { %v830_v10 = vmul.f32 (!%p823_p12), 0.001953125, %v829_v8  ;;  %v831_v11 = vmul.f32 (!%p823_p12), %v828_v9, %v828_v9 }
 0x16b   : > { %v832_v12 = vsub.f32 (!%p823_p12), %v830_v10, %v831_v11 }
 0x16d   : > { %v833_v13 = vmax.f32 %v832_v12, 0.0 }
 0x16f   : > { %v835_v14 = vadd.f32 1e-05, %v833_v13 }
 0x171   : > { %1498 = vrsqrt.f32 %v835_v14 }
 0x17b   : > { %v1499_v16 = vpop.eup %1498 }
 0x17c   : > { %v837_v17 = vmul.f32 %v1499_v16, %v834_v15 }
 0x17e   : > { %v839_v19 = vmul.f32 %v837_v17, %v828_v9  ;;  %842 = vst [vmem:[#allocation2] sm:$0x1] %v837_v17 }
 0x180   : > { %v840_v20 = vsub.f32 %v838_v18, %v839_v19 }
 0x182   : > { %841 = vst [vmem:[#allocation3] sm:$0x1] %v840_v20 }
 0x183 PF: > { %p1261_p13 = scmp.ne.s32.totalorder %s1526_s19, 1 }
 0x184   : > { %v1267_v23 = vld [vmem:[%s1620_s11] sm:$0xff] (!%p1261_p13)   ;;  %v1330_v60 = vld [vmem:[%s1620_s11 + $0x8] sm:$0xff] (!%p1261_p13)   ;;  %v1331_v61 = vld [vmem:[%s1620_s11 + $0x10] sm:$0xff] (!%p1261_p13)  }
 0x185   : > { %845 = sbr.rel (%p1261_p13) target bundleno = 436 (0x1b4), region = 56  ;;  %v1838_v21 = vld [vmem:[#allocation2] ss:$0 sm:$0xff] (!%p1261_p13)  ;;  %v1268_v57 = vunpack.c.l.bf16 (!%p1261_p13), %v1267_v23  ;;  %v1269_v59 = vunpack.c.h.bf16 (!%p1261_p13), %v1267_v23  ;;  %v1272_v63 = vunpack.c.l.bf16 (!%p1261_p13), %v1330_v60  ;;  %v1273_v1 = vunpack.c.h.bf16 (!%p1261_p13), %v1330_v60 }
 0x186   : > { %v853_v24 = vmul.f32 (!%p1261_p13), %v1838_v21, %v1671_v27  ;;  %v854_v58 = vmul.f32 (!%p1261_p13), %v1838_v21, %v1679_v31  ;;  %v855_v62 = vmul.f32 (!%p1261_p13), %v1667_v25, %v1838_v21  ;;  %v856_v0 = vmul.f32 (!%p1261_p13), %v1675_v29, %v1838_v21  ;;  %v1332_v31 = vld [vmem:[%s1620_s11 + $0x18] sm:$0xff] (!%p1261_p13)   ;;  %v1333_v17 = vld [vmem:[%s1620_s11 + $0x20] sm:$0xff] (!%p1261_p13)  }
 0x187   : > { %v857_v27 = vmul.f32 (!%p1261_p13), %v1838_v21, %v1687_v35  ;;  %v1276_v4 = vunpack.c.l.bf16 (!%p1261_p13), %v1331_v61  ;;  %v858_v25 = vmul.f32 (!%p1261_p13), %v1838_v21, %v1695_v39  ;;  %v1277_v7 = vunpack.c.h.bf16 (!%p1261_p13), %v1331_v61 }
 0x188   : > { %v859_v35 = vmul.f32 (!%p1261_p13), %v1683_v33, %v1838_v21  ;;  %v1280_v13 = vunpack.c.l.bf16 (!%p1261_p13), %v1332_v31  ;;  %v860_v33 = vmul.f32 (!%p1261_p13), %v1691_v37, %v1838_v21  ;;  %v862_v37 = vmul.f32 (!%p1261_p13), %v1838_v21, %v1711_v47 }
 0x189   : > { %v1840_v22 = vld [vmem:[#allocation3] ss:$0 sm:$0xff] (!%p1261_p13) }
 0x18a   : > { %v892_v2 = vadd.f32 (!%p1261_p13), %v1840_v22, %v853_v24  ;;  %v893_v3 = vadd.f32 (!%p1261_p13), %v1840_v22, %v854_v58  ;;  %v894_v5 = vadd.f32 (!%p1261_p13), %v1840_v22, %v855_v62  ;;  %v895_v6 = vadd.f32 (!%p1261_p13), %v1840_v22, %v856_v0 }
 0x18b   : > { %v896_v9 = vadd.f32 (!%p1261_p13), %v1840_v22, %v857_v27  ;;  %v897_v12 = vadd.f32 (!%p1261_p13), %v1840_v22, %v858_v25  ;;  %v898_v16 = vadd.f32 (!%p1261_p13), %v1840_v22, %v859_v35  ;;  %v861_v58 = vmul.f32 (!%p1261_p13), %v1838_v21, %v1703_v43  ;;  %v1335_v43 = vld [vmem:[%s1620_s11 + $0x30] sm:$0xff] (!%p1261_p13)  }
 0x18c   : > { %v988_v29 = vadd.f32 %v1268_v57, %v892_v2  ;;  %v989_v8 = vadd.f32 %v1269_v59, %v893_v3  ;;  %v990_v10 = vadd.f32 %v1272_v63, %v894_v5  ;;  %v991_v11 = vadd.f32 %v1273_v1, %v895_v6  ;;  %v1334_v59 = vld [vmem:[%s1620_s11 + $0x28] sm:$0xff]  }
 0x18d   : > { %v992_v39 = vadd.f32 %v1276_v4, %v896_v9  ;;  %v993_v20 = vadd.f32 %v1277_v7, %v897_v12  ;;  %v994_v24 = vadd.f32 %v1280_v13, %v898_v16  ;;  %v1281_v57 = vunpack.c.h.bf16 %v1332_v31  ;;  %v1336_v9 = vld [vmem:[%s1620_s11 + $0x38] sm:$0xff]  }
 0x18e   : > { %v1020_v14 = vmax.f32 %v988_v29, 0.0  ;;  %v1021_v15 = vmax.f32 %v989_v8, 0.0  ;;  %v1022_v18 = vmax.f32 %v990_v10, 0.0  ;;  %v1023_v19 = vmax.f32 %v991_v11, 0.0 }
 0x18f   : > { %v1024_v23 = vmax.f32 %v992_v39, 0.0  ;;  %v1025_v60 = vmax.f32 %v993_v20, 0.0  ;;  %v899_v61 = vadd.f32 %v1840_v22, %v860_v33  ;;  %v1284_v62 = vunpack.c.l.bf16 %v1333_v17 }
 0x190   : > { %1052 = vst [vmem:[%s1625_s14] sm:$0xff] %v1020_v14  ;;  %1053 = vst [vmem:[%s1625_s14 + $0x8] sm:$0xff] %v1021_v15  ;;  %v1026_v63 = vmax.f32 %v994_v24, 0.0  ;;  %v900_v0 = vadd.f32 %v1840_v22, %v861_v58  ;;  %v1285_v1 = vunpack.c.h.bf16 %v1333_v17  ;;  %v863_v2 = vmul.f32 %v1699_v41, %v1838_v21  ;;  %v1337_v15 = vld [vmem:[%s1620_s11 + $0x40] sm:$0xff]  }
 0x191   : > { %1054 = vst [vmem:[%s1625_s14 + $0x10] sm:$0xff] %v1022_v18  ;;  %1055 = vst [vmem:[%s1625_s14 + $0x18] sm:$0xff] %v1023_v19  ;;  %v995_v3 = vadd.f32 %v1281_v57, %v899_v61  ;;  %v901_v27 = vadd.f32 %v1840_v22, %v862_v37  ;;  %v1288_v4 = vunpack.c.l.bf16 %v1334_v59  ;;  %v864_v31 = vmul.f32 %v1707_v45, %v1838_v21 }
 0x192   : > { %1056 = vst [vmem:[%s1625_s14 + $0x20] sm:$0xff] %v1024_v23  ;;  %1057 = vst [vmem:[%s1625_s14 + $0x28] sm:$0xff] %v1025_v60  ;;  %v996_v47 = vadd.f32 %v1284_v62, %v900_v0  ;;  %v902_v5 = vadd.f32 %v1840_v22, %v863_v2  ;;  %v1289_v6 = vunpack.c.h.bf16 %v1334_v59  ;;  %v865_v41 = vmul.f32 %v1838_v21, %v1719_v51  ;;  %v1338_v23 = vld [vmem:[%s1620_s11 + $0x48] sm:$0xff]  }
 0x193   : > { %1058 = vst [vmem:[%s1625_s14 + $0x30] sm:$0xff] %v1026_v63  ;;  %v1027_v25 = vmax.f32 %v995_v3, 0.0  ;;  %v997_v7 = vadd.f32 %v1285_v1, %v901_v27  ;;  %v903_v29 = vadd.f32 %v1840_v22, %v864_v31  ;;  %v1292_v8 = vunpack.c.l.bf16 %v1335_v43 }
 0x194   : > { %v1028_v35 = vmax.f32 %v996_v47, 0.0  ;;  %v998_v10 = vadd.f32 %v1288_v4, %v902_v5  ;;  %v904_v45 = vadd.f32 %v1840_v22, %v865_v41  ;;  %v866_v11 = vmul.f32 %v1838_v21, %v1727_v55  ;;  %v1340_v41 = vld [vmem:[%s1620_s11 + $0x58] sm:$0xff]  }
 0x195   : > { %1059 = vst [vmem:[%s1625_s14 + $0x38] sm:$0xff] %v1027_v25  ;;  %v1029_v12 = vmax.f32 %v997_v7, 0.0  ;;  %v999_v51 = vadd.f32 %v1289_v6, %v903_v29  ;;  %v1293_v13 = vunpack.c.h.bf16 %v1335_v43  ;;  %v867_v14 = vmul.f32 %v1715_v49, %v1838_v21 }
 0x196   : > { %1060 = vst [vmem:[%s1625_s14 + $0x40] sm:$0xff] %v1028_v35  ;;  %v1030_v39 = vmax.f32 %v998_v10, 0.0  ;;  %v1000_v16 = vadd.f32 %v1292_v8, %v904_v45  ;;  %v905_v17 = vadd.f32 %v1840_v22, %v866_v11  ;;  %v1296_v18 = vunpack.c.l.bf16 %v1336_v9  ;;  %v1341_v10 = vld [vmem:[%s1620_s11 + $0x60] sm:$0xff]  }
 0x197   : > { %1061 = vst [vmem:[%s1625_s14 + $0x48] sm:$0xff] %v1029_v12  ;;  %v1031_v55 = vmax.f32 %v999_v51, 0.0  ;;  %v906_v19 = vadd.f32 %v1840_v22, %v867_v14  ;;  %v868_v20 = vmul.f32 %v1723_v53, %v1838_v21  ;;  %v1297_v33 = vunpack.c.h.bf16 %v1336_v9 }
 0x198   : > { %1062 = vst [vmem:[%s1625_s14 + $0x50] sm:$0xff] %v1030_v39  ;;  %v1032_v49 = vmax.f32 %v1000_v16, 0.0  ;;  %v1001_v24 = vadd.f32 %v1293_v13, %v905_v17  ;;  %v869_v57 = vmul.f32 %v1838_v21, %v1673_v28  ;;  %v1300_v58 = vunpack.c.l.bf16 %v1337_v15  ;;  %v1339_v28 = vld [vmem:[%s1620_s11 + $0x50] sm:$0xff]   ;;  %v1342_v39 = vld [vmem:[%s1620_s11 + $0x68] sm:$0xff]  }
 0x199   : > { %1063 = vst [vmem:[%s1625_s14 + $0x58] sm:$0xff] %v1031_v55  ;;  %v1002_v59 = vadd.f32 %v1296_v18, %v906_v19  ;;  %v907_v60 = vadd.f32 %v1840_v22, %v868_v20  ;;  %v870_v61 = vmul.f32 %v1838_v21, %v1681_v32  ;;  %v1301_v62 = vunpack.c.h.bf16 %v1337_v15 }
 0x19a   : > { %1064 = vst [vmem:[%s1625_s14 + $0x60] sm:$0xff] %v1032_v49  ;;  %v1033_v53 = vmax.f32 %v1001_v24, 0.0  ;;  %v908_v37 = vadd.f32 %v1840_v22, %v869_v57  ;;  %v871_v63 = vmul.f32 %v1669_v26, %v1838_v21  ;;  %v1304_v0 = vunpack.c.l.bf16 %v1338_v23 }
 0x19b   : > { %v1034_v1 = vmax.f32 %v1002_v59, 0.0  ;;  %v1003_v2 = vadd.f32 %v1297_v33, %v907_v60  ;;  %v909_v43 = vadd.f32 %v1840_v22, %v870_v61  ;;  %v872_v3 = vmul.f32 %v1677_v30, %v1838_v21 }
 0x19c   : > { %1065 = vst [vmem:[%s1625_s14 + $0x68] sm:$0xff] %v1033_v53  ;;  %v1004_v32 = vadd.f32 %v1300_v58, %v908_v37  ;;  %v910_v27 = vadd.f32 %v1840_v22, %v871_v63  ;;  %v1305_v4 = vunpack.c.h.bf16 %v1338_v23  ;;  %v873_v31 = vmul.f32 %v1838_v21, %v1689_v36 }
 0x19d   : > { %1066 = vst [vmem:[%s1625_s14 + $0x70] sm:$0xff] %v1034_v1  ;;  %v1035_v26 = vmax.f32 %v1003_v2, 0.0  ;;  %v1005_v47 = vadd.f32 %v1301_v62, %v909_v43  ;;  %v911_v5 = vadd.f32 %v1840_v22, %v872_v3  ;;  %v1308_v6 = vunpack.c.l.bf16 %v1339_v28 }
 0x19e   : > { %v1036_v30 = vmax.f32 %v1004_v32, 0.0  ;;  %v1006_v25 = vadd.f32 %v1304_v0, %v910_v27  ;;  %v912_v7 = vadd.f32 %v1840_v22, %v873_v31  ;;  %v874_v29 = vmul.f32 %v1838_v21, %v1697_v40 }
 0x19f   : > { %1067 = vst [vmem:[%s1625_s14 + $0x78] sm:$0xff] %v1035_v26  ;;  %v1037_v36 = vmax.f32 %v1005_v47, 0.0  ;;  %v1007_v8 = vadd.f32 %v1305_v4, %v911_v5  ;;  %v1309_v9 = vunpack.c.h.bf16 %v1339_v28  ;;  %v875_v35 = vmul.f32 %v1685_v34, %v1838_v21  ;;  %v1344_v28 = vld [vmem:[%s1620_s11 + $0x78] sm:$0xff]  }
 0x1a0   : > { %1068 = vst [vmem:[%s1625_s14 + $0x80] sm:$0xff] %v1036_v30  ;;  %v1038_v45 = vmax.f32 %v1006_v25, 0.0  ;;  %v1008_v11 = vadd.f32 %v1308_v6, %v912_v7  ;;  %v913_v12 = vadd.f32 %v1840_v22, %v874_v29  ;;  %v1312_v51 = vunpack.c.l.bf16 %v1340_v41 }
 0x1a1   : > { %1069 = vst [vmem:[%s1625_s14 + $0x88] sm:$0xff] %v1037_v36  ;;  %v1039_v40 = vmax.f32 %v1007_v8, 0.0  ;;  %v914_v13 = vadd.f32 %v1840_v22, %v875_v35  ;;  %v876_v14 = vmul.f32 %v1693_v38, %v1838_v21  ;;  %v1313_v15 = vunpack.c.h.bf16 %v1340_v41 }
 0x1a2   : > { %1070 = vst [vmem:[%s1625_s14 + $0x90] sm:$0xff] %v1038_v45  ;;  %v1040_v34 = vmax.f32 %v1008_v11, 0.0  ;;  %v1009_v16 = vadd.f32 %v1309_v9, %v913_v12  ;;  %v877_v17 = vmul.f32 %v1838_v21, %v1705_v44  ;;  %v1316_v18 = vunpack.c.l.bf16 %v1341_v10  ;;  %v1343_v44 = vld [vmem:[%s1620_s11 + $0x70] sm:$0xff]  }
 0x1a3   : > { %1071 = vst [vmem:[%s1625_s14 + $0x98] sm:$0xff] %v1039_v40  ;;  %v1010_v55 = vadd.f32 %v1312_v51, %v914_v13  ;;  %v915_v19 = vadd.f32 %v1840_v22, %v876_v14  ;;  %v878_v20 = vmul.f32 %v1838_v21, %v1713_v48  ;;  %v1317_v33 = vunpack.c.h.bf16 %v1341_v10 }
 0x1a4   : > { %1072 = vst [vmem:[%s1625_s14 + $0xa0] sm:$0xff] %v1040_v34  ;;  %v1041_v38 = vmax.f32 %v1009_v16, 0.0  ;;  %v916_v23 = vadd.f32 %v1840_v22, %v877_v17  ;;  %v879_v49 = vmul.f32 %v1701_v42, %v1838_v21  ;;  %v1320_v24 = vunpack.c.l.bf16 %v1342_v39 }
 0x1a5   : > { %v1042_v57 = vmax.f32 %v1010_v55, 0.0  ;;  %v1011_v58 = vadd.f32 %v1313_v15, %v915_v19  ;;  %v917_v59 = vadd.f32 %v1840_v22, %v878_v20  ;;  %v880_v60 = vmul.f32 %v1709_v46, %v1838_v21 }
 0x1a6   : > { %1073 = vst [vmem:[%s1625_s14 + $0xa8] sm:$0xff] %v1041_v38  ;;  %v1012_v48 = vadd.f32 %v1316_v18, %v916_v23  ;;  %v918_v61 = vadd.f32 %v1840_v22, %v879_v49  ;;  %v1321_v62 = vunpack.c.h.bf16 %v1342_v39  ;;  %v881_v53 = vmul.f32 %v1838_v21, %v1721_v52 }
 0x1a7   : > { %1074 = vst [vmem:[%s1625_s14 + $0xb0] sm:$0xff] %v1042_v57  ;;  %v1043_v42 = vmax.f32 %v1011_v58, 0.0  ;;  %v1013_v37 = vadd.f32 %v1317_v33, %v917_v59  ;;  %v919_v63 = vadd.f32 %v1840_v22, %v880_v60  ;;  %v1324_v0 = vunpack.c.l.bf16 %v1343_v44 }
 0x1a8   : > { %v1044_v1 = vmax.f32 %v1012_v48, 0.0  ;;  %v1014_v46 = vadd.f32 %v1320_v24, %v918_v61  ;;  %v920_v2 = vadd.f32 %v1840_v22, %v881_v53  ;;  %v882_v43 = vmul.f32 %v1838_v21, %v1729_v56 }
 0x1a9   : > { %1075 = vst [vmem:[%s1625_s14 + $0xb8] sm:$0xff] %v1043_v42  ;;  %v1045_v3 = vmax.f32 %v1013_v37, 0.0  ;;  %v1015_v52 = vadd.f32 %v1321_v62, %v919_v63  ;;  %v1325_v32 = vunpack.c.h.bf16 %v1343_v44  ;;  %v883_v27 = vmul.f32 %v1717_v50, %v1838_v21 }
 0x1aa   : > { %1076 = vst [vmem:[%s1625_s14 + $0xc0] sm:$0xff] %v1044_v1  ;;  %v1046_v4 = vmax.f32 %v1014_v46, 0.0  ;;  %v1016_v31 = vadd.f32 %v1324_v0, %v920_v2  ;;  %v921_v26 = vadd.f32 %v1840_v22, %v882_v43  ;;  %v1328_v47 = vunpack.c.l.bf16 %v1344_v28 }
 0x1ab   : > { %1077 = vst [vmem:[%s1625_s14 + $0xc8] sm:$0xff] %v1045_v3  ;;  %v1047_v56 = vmax.f32 %v1015_v52, 0.0  ;;  %v922_v5 = vadd.f32 %v1840_v22, %v883_v27  ;;  %v884_v6 = vmul.f32 %v1725_v54, %v1838_v21  ;;  %v1329_v41 = vunpack.c.h.bf16 %v1344_v28 }
 0x1ac   : > { %1078 = vst [vmem:[%s1625_s14 + $0xd0] sm:$0xff] %v1046_v4  ;;  %v1048_v50 = vmax.f32 %v1016_v31, 0.0  ;;  %v1017_v30 = vadd.f32 %v1325_v32, %v921_v26 }
 0x1ad   : > { %1079 = vst [vmem:[%s1625_s14 + $0xd8] sm:$0xff] %v1047_v56  ;;  %v1018_v25 = vadd.f32 %v1328_v47, %v922_v5  ;;  %v923_v7 = vadd.f32 %v1840_v22, %v884_v6 }
 0x1ae   : > { %1080 = vst [vmem:[%s1625_s14 + $0xe0] sm:$0xff] %v1048_v50  ;;  %v1049_v29 = vmax.f32 %v1017_v30, 0.0 }
 0x1af   : > { %v1050_v36 = vmax.f32 %v1018_v25, 0.0  ;;  %v1019_v8 = vadd.f32 %v1329_v41, %v923_v7 }
 0x1b0   : > { %1081 = vst [vmem:[%s1625_s14 + $0xe8] sm:$0xff] %v1049_v29 }
 0x1b1   : > { %1082 = vst [vmem:[%s1625_s14 + $0xf0] sm:$0xff] %v1050_v36  ;;  %v1051_v9 = vmax.f32 %v1019_v8, 0.0 }
 0x1b3   : > { %1083 = vst [vmem:[%s1625_s14 + $0xf8] sm:$0xff] %v1051_v9 }
 0x1b4 PF: > { %s15_s22 = sadd.s32 1, %s1538_s22   ;;  %s2007_s18 = smov %s1530_s20 }
 0x1b5   : > { %p12_p0 = scmp.ge.s32.totalorder %s15_s22, 6   ;;  %s2008_s19 = smov %s1534_s21 }
 0x1b6   : > { %s2009_s20 = smov %s2012_s23  ;;  %s2010_s21 = smov %s2016_s24 }
 0x1b7   :  { %14 = sbr.rel (!%p12_p0) target bundleno = 3 (0x3), region = 98 }

// kernel: a_call__.5
= control target key start
LH: loop header
LB: loop body
LE: loop exit
PB: predicated region body
PF: predicated region fallthrough
CT: control target
= control target key end

     0   :  { %s4418_s15 = smov 0   ;;  %s4420_s16 = smov 0   ;;  %s5446_s0 = inlined_call_operand.vmem [shape: bf16[512,1152], index: 0, kind: input, shape index: {}]   ;;  %s5447_s1 = inlined_call_operand.vmem [shape: bf16[1152,128], index: 1, kind: input, shape index: {}]   ;;  %s5448_s2 = inlined_call_operand.vmem [shape: f32[1,128], index: 2, kind: input, shape index: {}]   ;;  %s5449_s3 = inlined_call_operand.vmem [shape: f32[1,128], index: 3, kind: input, shape index: {}]   ;;  %s5450_s4 = inlined_call_operand.vmem [shape: bf16[512,128], index: 4, kind: output, shape index: {}]  }
   0x1   :  { %s4422_s17 = smov 0   ;;  %s4424_s18 = smov 0  }
   0x2   :  { %s4426_s19 = smov 0  }
   0x3 LB: > { %s26_s20 = sadd.s32 1, %s4382_s17  ;;  %s29_s21 = sadd.s32 1, %s4386_s18  ;;  %s4390_s19 = sphi %s4426_s19, %s14_s19   ;;  %s4386_s18 = sphi %s4424_s18, %s5454_s18   ;;  %s4382_s17 = sphi %s4422_s17, %s5453_s17   ;;  %s4378_s16 = sphi %s4420_s16, %s5452_s16   ;;  %s4374_s15 = sphi %s4418_s15, %s5451_s15  }
   0x4   : > { %p27_p0 = scmp.ge.s32.totalorder %s26_s20, 2  ;;  %p3106_p1 = scmp.ge.s32.totalorder %s4390_s19, 1 }
   0x5   : > { %p212_p2 = scmp.lt.s32.totalorder %s4390_s19, 5 }
   0x6   : > { %s5456_s20 = smov (%p27_p0, %s26_s20), 0  ;;  %s5458_s21 = smov (!%p27_p0, %s29_s21), %s4386_s18 }
   0x7   : > { %p213_p3 = pnand %p3106_p1, %p212_p2  ;;  %p31_p4 = scmp.ge.s32.totalorder %s5458_s21, 2 }
   0x8   : > { %s3107_s22 = sshll.u32 (!%p213_p3), %s4374_s15, 5  ;;  %s270_s23 = smul.u32 (!%p213_p3), %s4374_s15, %s4378_s16 }
   0x9   : > { %s5460_s21 = smov (%p31_p4, %s5458_s21), 0  ;;  %216 = sbr.rel (%p213_p3) target bundleno = 701 (0x2bd), region = 36 }
   0xa   : > { %p254_p5 = scmp.lt.s32.totalorder (!%p213_p3), %s3107_s22, 63  ;;  %p282_p6 = scmp.eq.s32.totalorder (!%p213_p3), %s4378_s16, 0 }
   0xb   : > { %s3109_s24 = sshll.u32 (!%p213_p3), %s270_s23, 5  ;;  %p283_p7 = scmp.eq.s32.totalorder (!%p213_p3), %s4374_s15, 0 }
   0xc   : > { %p272_p8 = scmp.lt.s32.totalorder (!%p213_p3), %s3109_s24, 63 }
   0xd   : > { %p284_p9 = pnand (!%p213_p3), %p283_p7, %p282_p6 }
  0x10   : > { %s5462_s22 = smov (!%p254_p5, %s3107_s22), 63  ;;  %s5464_s24 = smov (!%p272_p8, %s3109_s24), 63 }
  0x11   : > { %s4028_s25 = smul.u32 36, %s5462_s22  ;;  %s3110_s29 = sshll.u32 %s5464_s24, 2  ;;  %v4392_v0 = vmov (!%p284_p9), 0.0  }
  0x12   : > { %s4467_s6 = scalar_lea.vmem %s5450_s4, %s3110_s29  ;;  %287 = sbr.rel (%p284_p9) target bundleno = 25 (0x19), region = 40  ;;  %288 = vst [vmem:[#allocation2] sm:$0x1] (!%p284_p9), %v4392_v0  ;;  %289 = vst [vmem:[#allocation3] sm:$0x1] (!%p284_p9), %v4392_v0 }
  0x13   : > { %s4462_s28 = scalar_lea.vmem %s5446_s0, %s4028_s25 }
  0x19 PF: > { %v4070_v1 = vld [vmem:[%s5447_s1 + $0x40] sm:$0xff]   ;;  %v4072_v3 = vld [vmem:[%s5447_s1 + $0x48] sm:$0xff]   ;;  %v4074_v5 = vld [vmem:[%s5447_s1 + $0x50] sm:$0xff]   ;;  %p3327_p10 = scmp.ne.s32.totalorder %s4378_s16, 0 }
  0x1a   : > { %v4071_v2 = vld [vmem:[%s5447_s1] sm:$0xff]   ;;  %3492 = vmatprep.subr.bf16.mxu0 %v4070_v1  ;;  %4012 = vmatprep.subr.bf16.mxu1 %v4070_v1  ;;  %v4073_v4 = vld [vmem:[%s5447_s1 + $0x8] sm:$0xff]   ;;  %v4075_v6 = vld [vmem:[%s5447_s1 + $0x10] sm:$0xff]  }
  0x1b   : > { %3493 = vmatpush3.bf16.msra.mxu0 %v4071_v2  ;;  %4020 = vmatpush3.bf16.msra.mxu1 %v4071_v2  ;;  %v4076_v7 = vld [vmem:[%s5447_s1 + $0x58] sm:$0xff]   ;;  %v4078_v9 = vld [vmem:[%s5447_s1 + $0x60] sm:$0xff]   ;;  %v4080_v11 = vld [vmem:[%s5447_s1 + $0x68] sm:$0xff]  }
  0x1c   : > { %3494 = vmatprep.subr.bf16.mxu0 %v4072_v3  ;;  %4013 = vmatprep.subr.bf16.mxu1 %v4072_v3  ;;  %v4077_v8 = vld [vmem:[%s5447_s1 + $0x18] sm:$0xff]   ;;  %v4079_v10 = vld [vmem:[%s5447_s1 + $0x20] sm:$0xff]   ;;  %v4081_v14 = vld [vmem:[%s5447_s1 + $0x28] sm:$0xff]  }
  0x1d   : > { %v4088_v12 = vld [vmem:[%s4462_s28 + $0x4] ss:$36 sps:$4 sm:$0xff]   ;;  %v4082_v15 = vld [vmem:[%s5447_s1 + $0x70] sm:$0xff]   ;;  %v4084_v17 = vld [vmem:[%s5447_s1 + $0x78] sm:$0xff]  }
  0x1e   : > { %v4091_v13 = vld [vmem:[%s4462_s28 + $0x364] ss:$36 sps:$4 sm:$0xff]   ;;  %1794 = vmatprep.mubr.bf16.mxu0 %v4088_v12  ;;  %v4083_v16 = vld [vmem:[%s5447_s1 + $0x30] sm:$0xff]   ;;  %v4085_v18 = vld [vmem:[%s5447_s1 + $0x38] sm:$0xff]  }
  0x1f   : > { %3495 = vmatpush3.bf16.msra.mxu0 %v4073_v4  ;;  %4021 = vmatpush3.bf16.msra.mxu1 %v4073_v4  ;;  %v4092_v19 = vld [vmem:[%s5447_s1 + $0xc0] sm:$0xff]   ;;  %v4094_v24 = vld [vmem:[%s5447_s1 + $0xc8] sm:$0xff]   ;;  %v4104_v32 = vld [vmem:[%s5447_s1 + $0xd0] sm:$0xff]  }
  0x20   : > { %3496 = vmatprep.subr.bf16.mxu0 %v4074_v5  ;;  %4014 = vmatprep.subr.bf16.mxu1 %v4074_v5  ;;  %v4086_v20 = vld [vmem:[%s4462_s28] ss:$36 sps:$4 sm:$0xff]   ;;  %v4098_v26 = vld [vmem:[%s4462_s28 + $0x4c] ss:$36 sps:$4 sm:$0xff]   ;;  %v4106_v35 = vld [vmem:[%s5447_s1 + $0xd8] sm:$0xff]  }
  0x21   : > { %1890 = vmatprep.mubr.bf16.mxu1 %v4091_v13  ;;  %v4089_v21 = vld [vmem:[%s4462_s28 + $0x360] ss:$36 sps:$4 sm:$0xff]   ;;  %v4100_v27 = vld [vmem:[%s4462_s28 + $0x3ac] ss:$36 sps:$4 sm:$0xff]   ;;  %v4108_v36 = vld [vmem:[%s4462_s28 + $0x94] ss:$36 sps:$4 sm:$0xff]  }
  0x22   : > { %v4095_v22 = vld [vmem:[%s5447_s1 + $0x140] sm:$0xff]   ;;  %v4096_v28 = vld [vmem:[%s5447_s1 + $0x88] sm:$0xff]   ;;  %v4105_v33 = vld [vmem:[%s5447_s1 + $0x90] sm:$0xff]  }
  0x23   : > { %3497 = vmatpush3.bf16.msra.mxu0 %v4075_v6  ;;  %4022 = vmatpush3.bf16.msra.mxu1 %v4075_v6  ;;  %v4093_v23 = vld [vmem:[%s5447_s1 + $0x80] sm:$0xff]   ;;  %v4115_v29 = vld [vmem:[%s5447_s1 + $0x148] sm:$0xff]   ;;  %v4110_v37 = vld [vmem:[%s4462_s28 + $0x3f4] ss:$36 sps:$4 sm:$0xff]  }
  0x24   : > { %3498 = vmatprep.subr.bf16.mxu0 %v4076_v7  ;;  %4015 = vmatprep.subr.bf16.mxu1 %v4076_v7  ;;  %v4097_v25 = vld [vmem:[%s5447_s1 + $0x100] sm:$0xff]   ;;  %v4102_v30 = vld [vmem:[%s4462_s28 + $0x48] ss:$36 sps:$4 sm:$0xff]   ;;  %v4107_v38 = vld [vmem:[%s5447_s1 + $0x98] sm:$0xff]  }
  0x25   : > { %v4103_v31 = vld [vmem:[%s4462_s28 + $0x3a8] ss:$36 sps:$4 sm:$0xff]   ;;  %v4112_v39 = vld [vmem:[%s4462_s28 + $0x90] ss:$36 sps:$4 sm:$0xff]   ;;  %v4114_v41 = vld [vmem:[%s5447_s1 + $0xe0] sm:$0xff]  }
  0x26   : > { %v4117_v34 = vld [vmem:[%s5447_s1 + $0x108] sm:$0xff]   ;;  %v4113_v40 = vld [vmem:[%s4462_s28 + $0x3f0] ss:$36 sps:$4 sm:$0xff]   ;;  %v4116_v42 = vld [vmem:[%s5447_s1 + $0xa0] sm:$0xff]  }
  0x27   : > { %3499 = vmatpush3.bf16.msra.mxu0 %v4077_v8  ;;  %4023 = vmatpush3.bf16.msra.mxu1 %v4077_v8  ;;  %v4118_v43 = vld [vmem:[%s5447_s1 + $0xe8] sm:$0xff]   ;;  %v4129_v44 = vld [vmem:[%s5447_s1 + $0x150] sm:$0xff]   ;;  %v4120_v45 = vld [vmem:[%s4462_s28 + $0xdc] ss:$36 sps:$4 sm:$0xff]  }
  0x28   : > { %3500 = vmatprep.subr.bf16.mxu0 %v4078_v9  ;;  %4016 = vmatprep.subr.bf16.mxu1 %v4078_v9  ;;  %v4122_v46 = vld [vmem:[%s4462_s28 + $0x43c] ss:$36 sps:$4 sm:$0xff]   ;;  %v4131_v47 = vld [vmem:[%s5447_s1 + $0x110] sm:$0xff]   ;;  %v4119_v48 = vld [vmem:[%s5447_s1 + $0xa8] sm:$0xff]  }
  0x29   : > { %v4126_v49 = vld [vmem:[%s5447_s1 + $0xf0] sm:$0xff]   ;;  %v4124_v50 = vld [vmem:[%s4462_s28 + $0xd8] ss:$36 sps:$4 sm:$0xff]   ;;  %v4132_v54 = vld [vmem:[%s4462_s28 + $0x124] ss:$36 sps:$4 sm:$0xff]  }
  0x2a   : > { %v4125_v51 = vld [vmem:[%s4462_s28 + $0x438] ss:$36 sps:$4 sm:$0xff]   ;;  %v4127_v52 = vld [vmem:[%s5447_s1 + $0xb0] sm:$0xff]   ;;  %v4134_v59 = vld [vmem:[%s4462_s28 + $0x8] ss:$36 sps:$4 sm:$0xff]  }
  0x2b   : > { %3501 = vmatpush3.bf16.msra.mxu0 %v4079_v10  ;;  %4024 = vmatpush3.bf16.msra.mxu1 %v4079_v10  ;;  %v4128_v53 = vld [vmem:[%s5447_s1 + $0xf8] sm:$0xff]   ;;  %v4136_v55 = vld [vmem:[%s4462_s28 + $0xc] ss:$36 sps:$4 sm:$0xff]   ;;  %v4137_v60 = vld [vmem:[%s4462_s28 + $0x120] ss:$36 sps:$4 sm:$0xff]  }
  0x2c   : > { %3502 = vmatprep.subr.bf16.mxu0 %v4080_v11  ;;  %4017 = vmatprep.subr.bf16.mxu1 %v4080_v11  ;;  %v4146_v56 = vld [vmem:[%s5447_s1 + $0x158] sm:$0xff]   ;;  %v4138_v61 = vld [vmem:[%s5447_s1 + $0x1c0] sm:$0xff]   ;;  %v4140_v63 = vld [vmem:[%s4462_s28 + $0x16c] ss:$36 sps:$4 sm:$0xff]  }
  0x2d   : > { %v4147_v57 = vld [vmem:[%s5447_s1 + $0x118] sm:$0xff]   ;;  %v4139_v62 = vld [vmem:[%s5447_s1 + $0x180] sm:$0xff]   ;;  %v4154_v2 = vld [vmem:[%s5447_s1 + $0x1c8] sm:$0xff]  }
  0x2e   : > { %v4130_v58 = vld [vmem:[%s5447_s1 + $0xb8] sm:$0xff]   ;;  %v4156_v1 = vld [vmem:[%s5447_s1 + $0x160] sm:$0xff]   ;;  %v4155_v4 = vld [vmem:[%s5447_s1 + $0x188] sm:$0xff]  }
  0x2f   : > { %3503 = vmatpush3.bf16.msra.mxu0 %v4081_v14  ;;  %4025 = vmatpush3.bf16.msra.mxu1 %v4081_v14  ;;  %v4142_v0 = vld [vmem:[%s4462_s28 + $0x54] ss:$36 sps:$4 sm:$0xff]   ;;  %v4157_v3 = vld [vmem:[%s5447_s1 + $0x120] sm:$0xff]   ;;  %v4144_v5 = vld [vmem:[%s4462_s28 + $0x168] ss:$36 sps:$4 sm:$0xff]  }
  0x30   : > { %3504 = vmatprep.subr.bf16.mxu0 %v4082_v15  ;;  %4018 = vmatprep.subr.bf16.mxu1 %v4082_v15  ;;  %v4145_v6 = vld [vmem:[%s4462_s28 + $0x50] ss:$36 sps:$4 sm:$0xff]   ;;  %v4150_v8 = vld [vmem:[%s4462_s28 + $0x9c] ss:$36 sps:$4 sm:$0xff]   ;;  %v4170_v9 = vld [vmem:[%s5447_s1 + $0x168] sm:$0xff]  }
  0x31   : > { %v4148_v7 = vld [vmem:[%s4462_s28 + $0x1b4] ss:$36 sps:$4 sm:$0xff]   ;;  %v4172_v11 = vld [vmem:[%s5447_s1 + $0x128] sm:$0xff]   ;;  %v4158_v15 = vld [vmem:[%s4462_s28 + $0x1fc] ss:$36 sps:$4 sm:$0xff]  }
  0x32   : > { %v4171_v10 = vld [vmem:[%s5447_s1 + $0x1d0] sm:$0xff]   ;;  %v4153_v14 = vld [vmem:[%s4462_s28 + $0x98] ss:$36 sps:$4 sm:$0xff]  }
  0x33   : > { %3505 = vmatpush3.bf16.msra.mxu0 %v4083_v16  ;;  %4026 = vmatpush3.bf16.msra.mxu1 %v4083_v16  ;;  %v4173_v12 = vld [vmem:[%s5447_s1 + $0x190] sm:$0xff]  }
  0x34   : > { %3506 = vmatprep.subr.bf16.mxu0 %v4084_v17  ;;  %4019 = vmatprep.subr.bf16.mxu1 %v4084_v17  ;;  %v4152_v13 = vld [vmem:[%s4462_s28 + $0x1b0] ss:$36 sps:$4 sm:$0xff]  }
  0x35   : > { %v4180_v16 = vld [vmem:[%s5447_s1 + $0x170] sm:$0xff]  }
  0x36   : > { %v4181_v17 = vld [vmem:[%s5447_s1 + $0x130] sm:$0xff]  }
  0x37   : > { %3507 = vmatpush3.bf16.msra.mxu0 %v4085_v18  ;;  %4027 = vmatpush3.bf16.msra.mxu1 %v4085_v18  ;;  %v4160_v18 = vld [vmem:[%s4462_s28 + $0xe4] ss:$36 sps:$4 sm:$0xff]  }
  0x38   : > { %3604 = vmatprep.subr.bf16.mxu1 %v4092_v19  ;;  %3716 = vmatprep.subr.bf16.mxu0 %v4095_v22  ;;  %v4188_v19 = vld [vmem:[%s5447_s1 + $0x1d8] sm:$0xff]   ;;  %v4163_v22 = vld [vmem:[%s4462_s28 + $0xe0] ss:$36 sps:$4 sm:$0xff]  }
  0x3a   : > { %1795 = vmatmul.mubr.bf16.vlgmr.msra.gmra.mrb[0].mxu0 %v4086_v20  ;;  %1891 = vmatmul.mubr.bf16.vlgmr.msra.gmra.mrb[0].mxu1 %v4089_v21  ;;  %v4189_v20 = vld [vmem:[%s5447_s1 + $0x198] sm:$0xff]  }
  0x3b   : > { %3605 = vmatpush3.bf16.msra.mxu1 %v4093_v23  ;;  %3717 = vmatpush3.bf16.msra.mxu0 %v4097_v25  ;;  %v4162_v21 = vld [vmem:[%s4462_s28 + $0x1f8] ss:$36 sps:$4 sm:$0xff]   ;;  %v4164_v23 = vld [vmem:[%s4462_s28 + $0x244] ss:$36 sps:$4 sm:$0xff]  }
  0x3c   : > { %3606 = vmatprep.subr.bf16.mxu1 %v4094_v24  ;;  %1802 = vmatprep.mubr.bf16.mxu0 %v4098_v26  ;;  %v4166_v24 = vld [vmem:[%s4462_s28 + $0x12c] ss:$36 sps:$4 sm:$0xff]   ;;  %v4196_v25 = vld [vmem:[%s5447_s1 + $0x178] sm:$0xff]  }
  0x3d   : > { %1898 = vmatprep.mubr.bf16.mxu1 %v4100_v27  ;;  %3718 = vmatprep.subr.bf16.mxu0 %v4115_v29  ;;  %v4197_v26 = vld [vmem:[%s5447_s1 + $0x138] sm:$0xff]   ;;  %v4204_v27 = vld [vmem:[%s5447_s1 + $0x1e0] sm:$0xff]  }
  0x3e   : > { %v4205_v29 = vld [vmem:[%s5447_s1 + $0x1a0] sm:$0xff]  }
  0x3f   : > { %3607 = vmatpush3.bf16.msra.mxu1 %v4096_v28  ;;  %3719 = vmatpush3.bf16.msra.mxu0 %v4117_v34  ;;  %v4168_v28 = vld [vmem:[%s4462_s28 + $0x240] ss:$36 sps:$4 sm:$0xff]   ;;  %v4219_v34 = vld [vmem:[%s5447_s1 + $0x1e8] sm:$0xff]  }
  0x40   : > { %3608 = vmatprep.subr.bf16.mxu1 %v4104_v32  ;;  %3720 = vmatprep.subr.bf16.mxu0 %v4129_v44  ;;  %v4174_v32 = vld [vmem:[%s4462_s28 + $0x28c] ss:$36 sps:$4 sm:$0xff]   ;;  %v4190_v44 = vld [vmem:[%s4462_s28 + $0x31c] ss:$36 sps:$4 sm:$0xff]  }
  0x42   : > { %1803 = vmatmul.mubr.bf16.gmra.mrb[4].mxu0 %v4102_v30  ;;  %1899 = vmatmul.mubr.bf16.gmra.mrb[4].mxu1 %v4103_v31  ;;  %v4206_v30 = vld [vmem:[%s5447_s1 + $0x200] sm:$0xff]   ;;  %v4169_v31 = vld [vmem:[%s4462_s28 + $0x128] ss:$36 sps:$4 sm:$0xff]  }
  0x43   : > { %3609 = vmatpush3.bf16.msra.mxu1 %v4105_v33  ;;  %1810 = vmatprep.mubr.bf16.mxu0 %v4108_v36  ;;  %v4176_v33 = vld [vmem:[%s4462_s28 + $0x174] ss:$36 sps:$4 sm:$0xff]   ;;  %v4220_v36 = vld [vmem:[%s5447_s1 + $0x1a8] sm:$0xff]  }
  0x44   : > { %3610 = vmatprep.subr.bf16.mxu1 %v4106_v35  ;;  %1906 = vmatprep.mubr.bf16.mxu1 %v4110_v37  ;;  %v4178_v35 = vld [vmem:[%s4462_s28 + $0x288] ss:$36 sps:$4 sm:$0xff]   ;;  %v4179_v37 = vld [vmem:[%s4462_s28 + $0x170] ss:$36 sps:$4 sm:$0xff]  }
  0x45   : > { %3721 = vmatpush3.bf16.msra.mxu0 %v4131_v47  ;;  %v4195_v47 = vld [vmem:[%s4462_s28 + $0x200] ss:$36 sps:$4 sm:$0xff]  }
  0x46   : > { %3722 = vmatprep.subr.bf16.mxu0 %v4146_v56  ;;  %v4221_v56 = vld [vmem:[%s5447_s1 + $0x208] sm:$0xff]  }
  0x47   : > { %3611 = vmatpush3.bf16.msra.mxu1 %v4107_v38  ;;  %v4182_v38 = vld [vmem:[%s4462_s28 + $0x2d4] ss:$36 sps:$4 sm:$0xff]  }
  0x48   : > { %3612 = vmatprep.subr.bf16.mxu1 %v4114_v41  ;;  %v4187_v41 = vld [vmem:[%s4462_s28 + $0x1b8] ss:$36 sps:$4 sm:$0xff]  }
  0x49   : > { %3723 = vmatpush3.bf16.msra.mxu0 %v4147_v57  ;;  %v4236_v57 = vld [vmem:[%s5447_s1 + $0x210] sm:$0xff]  }
  0x4a   : > { %1811 = vmatmul.mubr.bf16.gmra.mrb[8].mxu0 %v4112_v39  ;;  %1907 = vmatmul.mubr.bf16.gmra.mrb[8].mxu1 %v4113_v40  ;;  %v4184_v39 = vld [vmem:[%s4462_s28 + $0x1bc] ss:$36 sps:$4 sm:$0xff]   ;;  %v4186_v40 = vld [vmem:[%s4462_s28 + $0x2d0] ss:$36 sps:$4 sm:$0xff]  }
  0x4b   : > { %3613 = vmatpush3.bf16.msra.mxu1 %v4116_v42  ;;  %1818 = vmatprep.mubr.bf16.mxu0 %v4120_v45  ;;  %v4234_v42 = vld [vmem:[%s5447_s1 + $0x1f0] sm:$0xff]   ;;  %v4192_v45 = vld [vmem:[%s4462_s28 + $0x204] ss:$36 sps:$4 sm:$0xff]  }
  0x4c   : > { %3614 = vmatprep.subr.bf16.mxu1 %v4118_v43  ;;  %1914 = vmatprep.mubr.bf16.mxu1 %v4122_v46  ;;  %v4235_v43 = vld [vmem:[%s5447_s1 + $0x1b0] sm:$0xff]   ;;  %v4194_v46 = vld [vmem:[%s4462_s28 + $0x318] ss:$36 sps:$4 sm:$0xff]  }
  0x4d   : > { %3724 = vmatprep.subr.bf16.mxu0 %v4156_v1  ;;  %v4218_v1 = vld [vmem:[%s4462_s28 + $0xa0] ss:$36 sps:$4 sm:$0xff]  }
  0x4e   : > { %3725 = vmatpush3.bf16.msra.mxu0 %v4157_v3  ;;  %v4224_v3 = vld [vmem:[%s4462_s28 + $0xec] ss:$36 sps:$4 sm:$0xff]  }
  0x4f   : > { %3615 = vmatpush3.bf16.msra.mxu1 %v4119_v48  ;;  %3726 = vmatprep.subr.bf16.mxu0 %v4170_v9  ;;  %v4249_v48 = vld [vmem:[%s5447_s1 + $0x1f8] sm:$0xff]  }
  0x50   : > { %3616 = vmatprep.subr.bf16.mxu1 %v4126_v49  ;;  %v4250_v49 = vld [vmem:[%s5447_s1 + $0x1b8] sm:$0xff]  }
  0x51   : > { %v4230_v9 = vld [vmem:[%s4462_s28 + $0x134] ss:$36 sps:$4 sm:$0xff]  }
  0x52   : > { %1819 = vmatmul.mubr.bf16.gmra.mrb[12].mxu0 %v4124_v50  ;;  %1915 = vmatmul.mubr.bf16.gmra.mrb[12].mxu1 %v4125_v51  ;;  %v4198_v50 = vld [vmem:[%s4462_s28 + $0x24c] ss:$36 sps:$4 sm:$0xff]   ;;  %v4202_v51 = vld [vmem:[%s4462_s28 + $0x14] ss:$36 sps:$4 sm:$0xff]  }
  0x53   : > { %3617 = vmatpush3.bf16.msra.mxu1 %v4127_v52  ;;  %1826 = vmatprep.mubr.bf16.mxu0 %v4132_v54  ;;  %v4200_v52 = vld [vmem:[%s4462_s28 + $0x10] ss:$36 sps:$4 sm:$0xff]  }
  0x54   : > { %3618 = vmatprep.subr.bf16.mxu1 %v4128_v53  ;;  %1955 = vmatprep.mubr.bf16.mxu1 %v4136_v55  ;;  %v4203_v53 = vld [vmem:[%s4462_s28 + $0x248] ss:$36 sps:$4 sm:$0xff]   ;;  %v4207_v54 = vld [vmem:[%s4462_s28 + $0x294] ss:$36 sps:$4 sm:$0xff]   ;;  %v4209_v55 = vld [vmem:[%s4462_s28 + $0x5c] ss:$36 sps:$4 sm:$0xff]  }
  0x55   : > { %3727 = vmatpush3.bf16.msra.mxu0 %v4172_v11  ;;  %v4232_v11 = vld [vmem:[%s4462_s28 + $0x368] ss:$36 sps:$4 sm:$0xff]  }
  0x56   : > { %3728 = vmatprep.subr.bf16.mxu0 %v4180_v16  ;;  %v4242_v16 = vld [vmem:[%s4462_s28 + $0x178] ss:$36 sps:$4 sm:$0xff]  }
  0x57   : > { %3619 = vmatpush3.bf16.msra.mxu1 %v4130_v58  ;;  %v4211_v58 = vld [vmem:[%s4462_s28 + $0x290] ss:$36 sps:$4 sm:$0xff]  }
  0x58   : > { %3828 = vmatprep.subr.bf16.mxu1 %v4138_v61  ;;  %v4215_v61 = vld [vmem:[%s4462_s28 + $0xa4] ss:$36 sps:$4 sm:$0xff]  }
  0x59   : > { %3729 = vmatpush3.bf16.msra.mxu0 %v4181_v17  ;;  %v4243_v17 = vld [vmem:[%s4462_s28 + $0x3fc] ss:$36 sps:$4 sm:$0xff]  }
  0x5a   : > { %1827 = vmatmul.mubr.bf16.gmra.mrb[16].mxu0 %v4137_v60  ;;  %1956 = vmatmul.mubr.bf16.vlgmr.msra.gmra.mrb[16].mxu1 %v4134_v59  ;;  %v4212_v59 = vld [vmem:[%s4462_s28 + $0x58] ss:$36 sps:$4 sm:$0xff]  }
  0x5b   : > { %3829 = vmatpush3.bf16.msra.mxu1 %v4139_v62  ;;  %1834 = vmatprep.mubr.bf16.mxu0 %v4140_v63  ;;  %v4213_v60 = vld [vmem:[%s4462_s28 + $0x2dc] ss:$36 sps:$4 sm:$0xff]  }
  0x5c   : > { %1963 = vmatprep.mubr.bf16.mxu1 %v4142_v0  ;;  %3830 = vmatprep.subr.bf16.mxu1 %v4154_v2  ;;  %v4251_v62 = vld [vmem:[%s5447_s1 + $0x218] sm:$0xff]   ;;  %v4264_v63 = vld [vmem:[%s5447_s1 + $0x220] sm:$0xff]  }
  0x5d   : > { %3730 = vmatprep.subr.bf16.mxu0 %v4196_v25  ;;  %v4217_v0 = vld [vmem:[%s4462_s28 + $0x2d8] ss:$36 sps:$4 sm:$0xff]   ;;  %v4222_v2 = vld [vmem:[%s4462_s28 + $0x324] ss:$36 sps:$4 sm:$0xff]  }
  0x5e   : > { %3731 = vmatpush3.bf16.msra.mxu0 %v4197_v26  ;;  %v4258_v25 = vld [vmem:[%s4462_s28 + $0x254] ss:$36 sps:$4 sm:$0xff]   ;;  %v4262_v26 = vld [vmem:[%s4462_s28 + $0x1c] ss:$36 sps:$4 sm:$0xff]  }
  0x5f   : > { %3831 = vmatpush3.bf16.msra.mxu1 %v4155_v4  ;;  %3964 = vmatprep.subr.bf16.mxu0 %v4206_v30  ;;  %v4277_v4 = vld [vmem:[%s5447_s1 + $0x228] sm:$0xff]  }
  0x60   : > { %3832 = vmatprep.subr.bf16.mxu1 %v4171_v10  ;;  %v4303_v10 = vld [vmem:[%s5447_s1 + $0x238] sm:$0xff]  }
  0x62   : > { %1835 = vmatmul.mubr.bf16.gmra.mrb[20].mxu0 %v4144_v5  ;;  %1964 = vmatmul.mubr.bf16.gmra.mrb[20].mxu1 %v4145_v6  ;;  %v4226_v5 = vld [vmem:[%s4462_s28 + $0x320] ss:$36 sps:$4 sm:$0xff]   ;;  %v4227_v6 = vld [vmem:[%s4462_s28 + $0xe8] ss:$36 sps:$4 sm:$0xff]  }
  0x63   : > { %1842 = vmatprep.mubr.bf16.mxu0 %v4148_v7  ;;  %1971 = vmatprep.mubr.bf16.mxu1 %v4150_v8  ;;  %v4290_v7 = vld [vmem:[%s5447_s1 + $0x230] sm:$0xff]  }
  0x64   : > { %3833 = vmatpush3.bf16.msra.mxu1 %v4173_v12  ;;  %v4228_v8 = vld [vmem:[%s4462_s28 + $0x36c] ss:$36 sps:$4 sm:$0xff]  }
  0x65   : > { %3834 = vmatprep.subr.bf16.mxu1 %v4188_v19  ;;  %v4233_v12 = vld [vmem:[%s4462_s28 + $0x130] ss:$36 sps:$4 sm:$0xff]   ;;  %v4247_v19 = vld [vmem:[%s4462_s28 + $0x3f8] ss:$36 sps:$4 sm:$0xff]  }
  0x68   : > { %3835 = vmatpush3.bf16.msra.mxu1 %v4189_v20  ;;  %v4248_v20 = vld [vmem:[%s4462_s28 + $0x1c0] ss:$36 sps:$4 sm:$0xff]  }
  0x69   : > { %3836 = vmatprep.subr.bf16.mxu1 %v4204_v27  ;;  %v4260_v27 = vld [vmem:[%s4462_s28 + $0x18] ss:$36 sps:$4 sm:$0xff]  }
  0x6a   : > { %1843 = vmatmul.mubr.bf16.gmra.mrb[24].mxu0 %v4152_v13  ;;  %1972 = vmatmul.mubr.bf16.gmra.mrb[24].mxu1 %v4153_v14  ;;  %v4237_v13 = vld [vmem:[%s4462_s28 + $0x3b4] ss:$36 sps:$4 sm:$0xff]   ;;  %v4239_v14 = vld [vmem:[%s4462_s28 + $0x17c] ss:$36 sps:$4 sm:$0xff]  }
  0x6b   : > { %1850 = vmatprep.mubr.bf16.mxu0 %v4158_v15  ;;  %1979 = vmatprep.mubr.bf16.mxu1 %v4160_v18  ;;  %v4241_v15 = vld [vmem:[%s4462_s28 + $0x3b0] ss:$36 sps:$4 sm:$0xff]   ;;  %v4245_v18 = vld [vmem:[%s4462_s28 + $0x1c4] ss:$36 sps:$4 sm:$0xff]  }
  0x6c   : > { %3837 = vmatpush3.bf16.msra.mxu1 %v4205_v29  ;;  %v4265_v29 = vld [vmem:[%s4462_s28 + $0x29c] ss:$36 sps:$4 sm:$0xff]  }
  0x6d   : > { %3838 = vmatprep.subr.bf16.mxu1 %v4219_v34  ;;  %v4273_v34 = vld [vmem:[%s4462_s28 + $0xac] ss:$36 sps:$4 sm:$0xff]  }
  0x70   : > { %3839 = vmatpush3.bf16.msra.mxu1 %v4220_v36  ;;  %v4276_v36 = vld [vmem:[%s4462_s28 + $0xa8] ss:$36 sps:$4 sm:$0xff]  }
  0x71   : > { %3840 = vmatprep.subr.bf16.mxu1 %v4234_v42  ;;  %v4286_v42 = vld [vmem:[%s4462_s28 + $0x13c] ss:$36 sps:$4 sm:$0xff]  }
  0x72   : > { %1851 = vmatmul.mubr.bf16.gmra.mrb[28].mxu0 %v4162_v21  ;;  %1980 = vmatmul.mubr.bf16.gmra.mrb[28].mxu1 %v4163_v22  ;;  %v4252_v21 = vld [vmem:[%s4462_s28 + $0x444] ss:$36 sps:$4 sm:$0xff]   ;;  %v4254_v22 = vld [vmem:[%s4462_s28 + $0x20c] ss:$36 sps:$4 sm:$0xff]  }
  0x73   : > { %1858 = vmatprep.mubr.bf16.mxu0 %v4164_v23  ;;  %1987 = vmatprep.mubr.bf16.mxu1 %v4166_v24  ;;  %v4256_v23 = vld [vmem:[%s4462_s28 + $0x440] ss:$36 sps:$4 sm:$0xff]   ;;  %v4257_v24 = vld [vmem:[%s4462_s28 + $0x208] ss:$36 sps:$4 sm:$0xff]  }
  0x74   : > { %3841 = vmatpush3.bf16.msra.mxu1 %v4235_v43  ;;  %v4288_v43 = vld [vmem:[%s4462_s28 + $0x370] ss:$36 sps:$4 sm:$0xff]  }
  0x75   : > { %3842 = vmatprep.subr.bf16.mxu1 %v4249_v48  ;;  %v4296_v48 = vld [vmem:[%s4462_s28 + $0x180] ss:$36 sps:$4 sm:$0xff]  }
  0x78   : > { %3843 = vmatpush3.bf16.msra.mxu1 %v4250_v49  ;;  %v4297_v49 = vld [vmem:[%s4462_s28 + $0x404] ss:$36 sps:$4 sm:$0xff]  }
  0x7a   : > { %1859 = vmatmul.mubr.bf16.gmra.mrb[32].mxu0 %v4168_v28  ;;  %1988 = vmatmul.mubr.bf16.gmra.mrb[32].mxu1 %v4169_v31  ;;  %v4263_v28 = vld [vmem:[%s4462_s28 + $0x250] ss:$36 sps:$4 sm:$0xff]   ;;  %v4269_v31 = vld [vmem:[%s4462_s28 + $0x298] ss:$36 sps:$4 sm:$0xff]  }
  0x7b   : > { %1866 = vmatprep.mubr.bf16.mxu0 %v4174_v32  ;;  %1995 = vmatprep.mubr.bf16.mxu1 %v4176_v33  ;;  %v4270_v32 = vld [vmem:[%s4462_s28 + $0x60] ss:$36 sps:$4 sm:$0xff]  }
  0x7c   : > { %v4271_v33 = vld [vmem:[%s4462_s28 + $0x2e4] ss:$36 sps:$4 sm:$0xff]  }
  0x82   : > { %1867 = vmatmul.mubr.bf16.gmra.mrb[36].mxu0 %v4178_v35  ;;  %1996 = vmatmul.mubr.bf16.gmra.mrb[36].mxu1 %v4179_v37  ;;  %v4275_v35 = vld [vmem:[%s4462_s28 + $0x2e0] ss:$36 sps:$4 sm:$0xff]   ;;  %v4278_v37 = vld [vmem:[%s4462_s28 + $0x32c] ss:$36 sps:$4 sm:$0xff]  }
  0x83   : > { %1874 = vmatprep.mubr.bf16.mxu0 %v4182_v38  ;;  %2003 = vmatprep.mubr.bf16.mxu1 %v4184_v39  ;;  %v4280_v38 = vld [vmem:[%s4462_s28 + $0xf4] ss:$36 sps:$4 sm:$0xff]   ;;  %v4282_v39 = vld [vmem:[%s4462_s28 + $0x328] ss:$36 sps:$4 sm:$0xff]  }
  0x8a   : > { %1875 = vmatmul.mubr.bf16.gmra.mrb[40].mxu0 %v4186_v40  ;;  %2004 = vmatmul.mubr.bf16.gmra.mrb[40].mxu1 %v4187_v41  ;;  %v4283_v40 = vld [vmem:[%s4462_s28 + $0xf0] ss:$36 sps:$4 sm:$0xff]  }
  0x8b   : > { %1882 = vmatprep.mubr.bf16.mxu0 %v4190_v44  ;;  %2011 = vmatprep.mubr.bf16.mxu1 %v4192_v45  ;;  %v4284_v41 = vld [vmem:[%s4462_s28 + $0x374] ss:$36 sps:$4 sm:$0xff]   ;;  %v4291_v45 = vld [vmem:[%s4462_s28 + $0x3bc] ss:$36 sps:$4 sm:$0xff]  }
  0x8c   : > { %v4289_v44 = vld [vmem:[%s4462_s28 + $0x138] ss:$36 sps:$4 sm:$0xff]  }
  0x92   : > { %1883 = vmatmul.mubr.bf16.gmra.mrb[44].mxu0 %v4194_v46  ;;  %2012 = vmatmul.mubr.bf16.gmra.mrb[44].mxu1 %v4195_v47  ;;  %v4293_v46 = vld [vmem:[%s4462_s28 + $0x184] ss:$36 sps:$4 sm:$0xff]   ;;  %v4295_v47 = vld [vmem:[%s4462_s28 + $0x3b8] ss:$36 sps:$4 sm:$0xff]  }
  0x93   : > { %2019 = vmatprep.mubr.bf16.mxu1 %v4198_v50  ;;  %2116 = vmatprep.mubr.bf16.mxu0 %v4202_v51  ;;  %v4299_v50 = vld [vmem:[%s4462_s28 + $0x1cc] ss:$36 sps:$4 sm:$0xff]   ;;  %v4301_v51 = vld [vmem:[%s4462_s28 + $0x400] ss:$36 sps:$4 sm:$0xff]  }
  0x9a   : > { %2020 = vmatmul.mubr.bf16.gmra.mrb[48].mxu1 %v4203_v53  ;;  %2117 = vmatmul.mubr.bf16.vlgmr.msra.gmra.mrb[48].mxu0 %v4200_v52  ;;  %v4302_v52 = vld [vmem:[%s4462_s28 + $0x1c8] ss:$36 sps:$4 sm:$0xff]  }
  0x9b   : > { %3965 = vmatpush3.bf16.msra.mxu0 %v4206_v30  ;;  %2027 = vmatprep.mubr.bf16.mxu1 %v4207_v54  ;;  %v4267_v30 = vld [vmem:[%s4462_s28 + $0x64] ss:$36 sps:$4 sm:$0xff]   ;;  %v4304_v53 = vld [vmem:[%s4462_s28 + $0x44c] ss:$36 sps:$4 sm:$0xff]   ;;  %v4306_v54 = vld [vmem:[%s4462_s28 + $0x214] ss:$36 sps:$4 sm:$0xff]  }
  0x9c   : > { %2124 = vmatprep.mubr.bf16.mxu0 %v4209_v55  ;;  %3966 = vmatprep.subr.bf16.mxu0 %v4221_v56 }
  0x9f   : > { %3967 = vmatpush3.bf16.msra.mxu0 %v4221_v56 }
  0xa0   : > { %3968 = vmatprep.subr.bf16.mxu0 %v4236_v57 }
  0xa2   : > { %2028 = vmatmul.mubr.bf16.gmra.mrb[52].mxu1 %v4211_v58  ;;  %2125 = vmatmul.mubr.bf16.gmra.mrb[52].mxu0 %v4212_v59  ;;  %v4308_v59 = vld [vmem:[%s4462_s28 + $0x448] ss:$36 sps:$4 sm:$0xff]  }
  0xa3   : > { %2035 = vmatprep.mubr.bf16.mxu1 %v4213_v60  ;;  %2132 = vmatprep.mubr.bf16.mxu0 %v4215_v61  ;;  %v4309_v60 = vld [vmem:[%s4462_s28 + $0x210] ss:$36 sps:$4 sm:$0xff]  }
  0xa4   : > { %3969 = vmatpush3.bf16.msra.mxu0 %v4236_v57 }
  0xa5   : > { %3970 = vmatprep.subr.bf16.mxu0 %v4251_v62 }
  0xa8   : > { %3971 = vmatpush3.bf16.msra.mxu0 %v4251_v62 }
  0xa9   : > { %3972 = vmatprep.subr.bf16.mxu0 %v4264_v63 }
  0xaa   : > { %2036 = vmatmul.mubr.bf16.gmra.mrb[56].mxu1 %v4217_v0  ;;  %2133 = vmatmul.mubr.bf16.gmra.mrb[56].mxu0 %v4218_v1  ;;  %v4310_v1 = vld [vmem:[%s4462_s28 + $0x25c] ss:$36 sps:$4 sm:$0xff]  }
  0xab   : > { %2043 = vmatprep.mubr.bf16.mxu1 %v4222_v2  ;;  %2140 = vmatprep.mubr.bf16.mxu0 %v4224_v3  ;;  %v4312_v2 = vld [vmem:[%s4462_s28 + $0x20] ss:$36 sps:$4 sm:$0xff]  }
  0xac   : > { %3973 = vmatpush3.bf16.msra.mxu0 %v4264_v63 }
  0xad   : > { %3974 = vmatprep.subr.bf16.mxu0 %v4277_v4 }
  0xb0   : > { %3975 = vmatpush3.bf16.msra.mxu0 %v4277_v4 }
  0xb1   : > { %3976 = vmatprep.subr.bf16.mxu0 %v4290_v7 }
  0xb2   : > { %2044 = vmatmul.mubr.bf16.gmra.mrb[60].mxu1 %v4226_v5  ;;  %2141 = vmatmul.mubr.bf16.gmra.mrb[60].mxu0 %v4227_v6 }
  0xb3   : > { %2051 = vmatprep.mubr.bf16.mxu1 %v4228_v8  ;;  %2148 = vmatprep.mubr.bf16.mxu0 %v4230_v9 }
  0xb4   : > { %3977 = vmatpush3.bf16.msra.mxu0 %v4290_v7 }
  0xb5   : > { %3978 = vmatprep.subr.bf16.mxu0 %v4303_v10 }
  0xb8   : > { %3979 = vmatpush3.bf16.msra.mxu0 %v4303_v10 }
  0xba   : > { %2052 = vmatmul.mubr.bf16.gmra.mrb[64].mxu1 %v4232_v11  ;;  %2149 = vmatmul.mubr.bf16.gmra.mrb[64].mxu0 %v4233_v12  ;;  %v4313_v11 = vld [vmem:[%s4462_s28 + $0x258] ss:$36 sps:$4 sm:$0xff]   ;;  %v4314_v12 = vld [vmem:[%s4462_s28 + $0x68] ss:$36 sps:$4 sm:$0xff]  }
  0xbb   : > { %2059 = vmatprep.mubr.bf16.mxu1 %v4237_v13  ;;  %2156 = vmatprep.mubr.bf16.mxu0 %v4239_v14 }
  0xc2   : > { %2060 = vmatmul.mubr.bf16.gmra.mrb[68].mxu1 %v4241_v15  ;;  %2157 = vmatmul.mubr.bf16.gmra.mrb[68].mxu0 %v4242_v16 }
  0xc3   : > { %2067 = vmatprep.mubr.bf16.mxu1 %v4243_v17  ;;  %2164 = vmatprep.mubr.bf16.mxu0 %v4245_v18  ;;  %v4315_v17 = vld [vmem:[%s4462_s28 + $0x2a4] ss:$36 sps:$4 sm:$0xff]   ;;  %v4317_v18 = vld [vmem:[%s4462_s28 + $0xb0] ss:$36 sps:$4 sm:$0xff]  }
  0xca   : > { %2068 = vmatmul.mubr.bf16.gmra.mrb[72].mxu1 %v4247_v19  ;;  %2165 = vmatmul.mubr.bf16.gmra.mrb[72].mxu0 %v4248_v20 }
  0xcb   : > { %2075 = vmatprep.mubr.bf16.mxu1 %v4252_v21  ;;  %2172 = vmatprep.mubr.bf16.mxu0 %v4254_v22 }
  0xd2   : > { %2076 = vmatmul.mubr.bf16.gmra.mrb[76].mxu1 %v4256_v23  ;;  %2173 = vmatmul.mubr.bf16.gmra.mrb[76].mxu0 %v4257_v24 }
  0xd3   : > { %2180 = vmatprep.mubr.bf16.mxu0 %v4258_v25  ;;  %2277 = vmatprep.mubr.bf16.mxu1 %v4262_v26 }
  0xda   : > { %2181 = vmatmul.mubr.bf16.gmra.mrb[80].mxu0 %v4263_v28  ;;  %2278 = vmatmul.mubr.bf16.vlgmr.msra.gmra.mrb[80].mxu1 %v4260_v27  ;;  %v4318_v27 = vld [vmem:[%s4462_s28 + $0x2a0] ss:$36 sps:$4 sm:$0xff]   ;;  %v4319_v28 = vld [vmem:[%s4462_s28 + $0xf8] ss:$36 sps:$4 sm:$0xff]  }
  0xdb   : > { %2188 = vmatprep.mubr.bf16.mxu0 %v4265_v29  ;;  %2285 = vmatprep.mubr.bf16.mxu1 %v4267_v30 }
  0xe2   : > { %2189 = vmatmul.mubr.bf16.gmra.mrb[84].mxu0 %v4269_v31  ;;  %2286 = vmatmul.mubr.bf16.gmra.mrb[84].mxu1 %v4270_v32 }
  0xe3   : > { %2196 = vmatprep.mubr.bf16.mxu0 %v4271_v33  ;;  %2293 = vmatprep.mubr.bf16.mxu1 %v4273_v34  ;;  %v4320_v33 = vld [vmem:[%s4462_s28 + $0x2ec] ss:$36 sps:$4 sm:$0xff]   ;;  %v4322_v34 = vld [vmem:[%s4462_s28 + $0x140] ss:$36 sps:$4 sm:$0xff]  }
  0xea   : > { %2197 = vmatmul.mubr.bf16.gmra.mrb[88].mxu0 %v4275_v35  ;;  %2294 = vmatmul.mubr.bf16.gmra.mrb[88].mxu1 %v4276_v36 }
  0xeb   : > { %2204 = vmatprep.mubr.bf16.mxu0 %v4278_v37  ;;  %2301 = vmatprep.mubr.bf16.mxu1 %v4280_v38 }
  0xf2   : > { %2205 = vmatmul.mubr.bf16.gmra.mrb[92].mxu0 %v4282_v39  ;;  %2302 = vmatmul.mubr.bf16.gmra.mrb[92].mxu1 %v4283_v40 }
  0xf3   : > { %2212 = vmatprep.mubr.bf16.mxu0 %v4284_v41  ;;  %2309 = vmatprep.mubr.bf16.mxu1 %v4286_v42 }
  0xfa   : > { %2213 = vmatmul.mubr.bf16.gmra.mrb[96].mxu0 %v4288_v43  ;;  %2310 = vmatmul.mubr.bf16.gmra.mrb[96].mxu1 %v4289_v44  ;;  %v4323_v43 = vld [vmem:[%s4462_s28 + $0x2e8] ss:$36 sps:$4 sm:$0xff]  }
  0xfb   : > { %2220 = vmatprep.mubr.bf16.mxu0 %v4291_v45  ;;  %2317 = vmatprep.mubr.bf16.mxu1 %v4293_v46  ;;  %v4324_v44 = vld [vmem:[%s4462_s28 + $0x188] ss:$36 sps:$4 sm:$0xff]  }
 0x102   : > { %2221 = vmatmul.mubr.bf16.gmra.mrb[100].mxu0 %v4295_v47  ;;  %2318 = vmatmul.mubr.bf16.gmra.mrb[100].mxu1 %v4296_v48 }
 0x103   : > { %2228 = vmatprep.mubr.bf16.mxu0 %v4297_v49  ;;  %2325 = vmatprep.mubr.bf16.mxu1 %v4299_v50  ;;  %v4325_v49 = vld [vmem:[%s4462_s28 + $0x334] ss:$36 sps:$4 sm:$0xff]  }
 0x104   : > { %v4327_v50 = vld [vmem:[%s4462_s28 + $0x1d0] ss:$36 sps:$4 sm:$0xff]  }
 0x10a   : > { %2229 = vmatmul.mubr.bf16.gmra.mrb[104].mxu0 %v4301_v51  ;;  %2326 = vmatmul.mubr.bf16.gmra.mrb[104].mxu1 %v4302_v52 }
 0x10b   : > { %2236 = vmatprep.mubr.bf16.mxu0 %v4304_v53  ;;  %2333 = vmatprep.mubr.bf16.mxu1 %v4306_v54 }
 0x10d   : > { %v3580_v55 = vpop.f32.mrb[0].mxu1  ;;  %v3508_v56 = vpop.f32.mrb[0].mxu0 }
 0x10e   : > { %v3581_v57 = vpop.f32.mrb[1].mxu1  ;;  %v3509_v58 = vpop.f32.mrb[1].mxu0 }
 0x10f   : > { %v4797_v61 = vadd.f32 %v3581_v57, %v3580_v55  ;;  %v3583_v62 = vpop.f32.mrb[2].mxu1  ;;  %v4799_v63 = vadd.f32 %v3509_v58, %v3508_v56  ;;  %v3511_v0 = vpop.f32.mrb[2].mxu0 }
 0x110   : > { %v3584_v3 = vpop.f32.mrb[3].mxu1  ;;  %v3512_v4 = vpop.f32.mrb[3].mxu0 }
 0x111   : > { %v4803_v5 = vadd.f32 %v3584_v3, %v3583_v62  ;;  %v4805_v6 = vadd.f32 %v3512_v4, %v3511_v0  ;;  %v4330_v3 = vld [vmem:[%s4462_s28 + $0x37c] ss:$36 sps:$4 sm:$0xff]  }
 0x112   : > { %2237 = vmatmul.mubr.bf16.gmra.mrb[108].mxu0 %v4308_v59  ;;  %2334 = vmatmul.mubr.bf16.gmra.mrb[108].mxu1 %v4309_v60  ;;  %v4328_v59 = vld [vmem:[%s4462_s28 + $0x330] ss:$36 sps:$4 sm:$0xff]   ;;  %v4329_v60 = vld [vmem:[%s4462_s28 + $0x218] ss:$36 sps:$4 sm:$0xff]   ;;  %v4332_v4 = vld [vmem:[%s4462_s28 + $0x260] ss:$36 sps:$4 sm:$0xff]  }
 0x113   : > { %2341 = vmatprep.mubr.bf16.mxu1 %v4310_v1  ;;  %3980 = vmatprep.mubr.bf16.mxu0 %v4312_v2 }
 0x115   : > { %v3586_v7 = vpop.f32.mrb[4].mxu1  ;;  %v3514_v8 = vpop.f32.mrb[4].mxu0 }
 0x116   : > { %v3587_v9 = vpop.f32.mrb[5].mxu1  ;;  %v3515_v10 = vpop.f32.mrb[5].mxu0 }
 0x117   : > { %v4809_v13 = vadd.f32 %v3587_v9, %v3586_v7  ;;  %v3589_v14 = vpop.f32.mrb[6].mxu1  ;;  %v4811_v15 = vadd.f32 %v3515_v10, %v3514_v8  ;;  %v3517_v16 = vpop.f32.mrb[6].mxu0 }
 0x118   : > { %v3590_v19 = vpop.f32.mrb[7].mxu1  ;;  %v3518_v20 = vpop.f32.mrb[7].mxu0 }
 0x119   : > { %v4815_v21 = vadd.f32 %v3590_v19, %v3589_v14  ;;  %v4817_v22 = vadd.f32 %v3518_v20, %v3517_v16  ;;  %v4333_v19 = vld [vmem:[%s4462_s28 + $0x378] ss:$36 sps:$4 sm:$0xff]   ;;  %v4334_v20 = vld [vmem:[%s4462_s28 + $0x2a8] ss:$36 sps:$4 sm:$0xff]  }
 0x11a   : > { %2342 = vmatmul.mubr.bf16.gmra.mrb[112].mxu1 %v4313_v11  ;;  %3981 = vmatmul.mubr.bf16.vlgmr.msra.gmra.mrb[112].mxu0 %v4314_v12 }
 0x11b   : > { %2349 = vmatprep.mubr.bf16.mxu1 %v4315_v17  ;;  %3984 = vmatprep.mubr.bf16.mxu0 %v4317_v18 }
 0x11d   : > { %v3592_v23 = vpop.f32.mrb[8].mxu1  ;;  %v3520_v24 = vpop.f32.mrb[8].mxu0 }
 0x11e   : > { %v3593_v25 = vpop.f32.mrb[9].mxu1  ;;  %v3521_v26 = vpop.f32.mrb[9].mxu0 }
 0x11f   : > { %v4821_v29 = vadd.f32 %v3593_v25, %v3592_v23  ;;  %v3595_v30 = vpop.f32.mrb[10].mxu1  ;;  %v4823_v31 = vadd.f32 %v3521_v26, %v3520_v24  ;;  %v3523_v32 = vpop.f32.mrb[10].mxu0  ;;  %v4335_v26 = vld [vmem:[%s4462_s28 + $0x3c4] ss:$36 sps:$4 sm:$0xff]  }
 0x120   : > { %v3596_v35 = vpop.f32.mrb[11].mxu1  ;;  %v3524_v36 = vpop.f32.mrb[11].mxu0 }
 0x121   : > { %v4827_v37 = vadd.f32 %v3596_v35, %v3595_v30  ;;  %v4829_v38 = vadd.f32 %v3524_v36, %v3523_v32 }
 0x122   : > { %2350 = vmatmul.mubr.bf16.gmra.mrb[116].mxu1 %v4318_v27  ;;  %3985 = vmatmul.mubr.bf16.gmra.mrb[116].mxu0 %v4319_v28  ;;  %v4337_v27 = vld [vmem:[%s4462_s28 + $0x2f0] ss:$36 sps:$4 sm:$0xff]  }
 0x123   : > { %2357 = vmatprep.mubr.bf16.mxu1 %v4320_v33  ;;  %3988 = vmatprep.mubr.bf16.mxu0 %v4322_v34 }
 0x125   : > { %v3598_v39 = vpop.f32.mrb[12].mxu1  ;;  %v3526_v40 = vpop.f32.mrb[12].mxu0 }
 0x126   : > { %v3599_v41 = vpop.f32.mrb[13].mxu1  ;;  %v3527_v42 = vpop.f32.mrb[13].mxu0 }
 0x127   : > { %v4833_v45 = vadd.f32 %v3599_v41, %v3598_v39  ;;  %v3601_v46 = vpop.f32.mrb[14].mxu1  ;;  %v4835_v47 = vadd.f32 %v3527_v42, %v3526_v40  ;;  %v3529_v48 = vpop.f32.mrb[14].mxu0  ;;  %v4338_v41 = vld [vmem:[%s4462_s28 + $0x3c0] ss:$36 sps:$4 sm:$0xff]   ;;  %v4339_v42 = vld [vmem:[%s4462_s28 + $0x338] ss:$36 sps:$4 sm:$0xff]  }
 0x128   : > { %v3602_v51 = vpop.f32.mrb[15].mxu1  ;;  %v3530_v52 = vpop.f32.mrb[15].mxu0 }
 0x129   : > { %v4839_v53 = vadd.f32 %v3602_v51, %v3601_v46  ;;  %v4841_v54 = vadd.f32 %v3530_v52, %v3529_v48  ;;  %v4340_v48 = vld [vmem:[%s4462_s28 + $0x40c] ss:$36 sps:$4 sm:$0xff]  }
 0x12a   : > { %2358 = vmatmul.mubr.bf16.gmra.mrb[120].mxu1 %v4323_v43  ;;  %3989 = vmatmul.mubr.bf16.gmra.mrb[120].mxu0 %v4324_v44 }
 0x12b   : > { %2365 = vmatprep.mubr.bf16.mxu1 %v4325_v49  ;;  %3992 = vmatprep.mubr.bf16.mxu0 %v4327_v50  ;;  %v4342_v49 = vld [vmem:[%s4462_s28 + $0x380] ss:$36 sps:$4 sm:$0xff]  }
 0x12d   : > { %v3620_v55 = vpop.f32.mrb[16].mxu1  ;;  %v3532_v56 = vpop.f32.mrb[16].mxu0 }
 0x12e   : > { %v3621_v57 = vpop.f32.mrb[17].mxu1  ;;  %v3533_v58 = vpop.f32.mrb[17].mxu0 }
 0x12f   : > { %v3622_v62 = vadd.f32 %v3621_v57, %v3620_v55  ;;  %v3623_v0 = vpop.f32.mrb[18].mxu1  ;;  %v4845_v1 = vadd.f32 %v3533_v58, %v3532_v56  ;;  %v3535_v2 = vpop.f32.mrb[18].mxu0 }
 0x130   : > { %v3624_v7 = vpop.f32.mrb[19].mxu1  ;;  %v3536_v8 = vpop.f32.mrb[19].mxu0 }
 0x131   : > { %v4850_v9 = vadd.f32 %v3622_v62, %v4799_v63  ;;  %v3625_v10 = vadd.f32 %v3624_v7, %v3623_v0  ;;  %v4852_v11 = vadd.f32 %v3536_v8, %v3535_v2  ;;  %v4343_v62 = vld [vmem:[%s4462_s28 + $0x408] ss:$36 sps:$4 sm:$0xff]   ;;  %v4345_v7 = vld [vmem:[%s4462_s28 + $0x454] ss:$36 sps:$4 sm:$0xff]  }
 0x132   : > { %2366 = vmatmul.mubr.bf16.gmra.mrb[124].mxu1 %v4328_v59  ;;  %3993 = vmatmul.mubr.bf16.gmra.mrb[124].mxu0 %v4329_v60  ;;  %v4344_v0 = vld [vmem:[%s4462_s28 + $0x3c8] ss:$36 sps:$4 sm:$0xff]   ;;  %v4347_v8 = vld [vmem:[%s4462_s28 + $0x410] ss:$36 sps:$4 sm:$0xff]  }
 0x133   : > { %v4855_v12 = vadd.f32 %v3625_v10, %v4805_v6  ;;  %2373 = vmatprep.mubr.bf16.mxu1 %v4330_v3  ;;  %3996 = vmatprep.mubr.bf16.mxu0 %v4332_v4 }
 0x135   : > { %v3626_v14 = vpop.f32.mrb[20].mxu1  ;;  %v3538_v16 = vpop.f32.mrb[20].mxu0 }
 0x136   : > { %v3627_v17 = vpop.f32.mrb[21].mxu1  ;;  %v3539_v18 = vpop.f32.mrb[21].mxu0 }
 0x137   : > { %v3628_v63 = vadd.f32 %v3627_v17, %v3626_v14  ;;  %v3629_v23 = vpop.f32.mrb[22].mxu1  ;;  %v4859_v24 = vadd.f32 %v3539_v18, %v3538_v16  ;;  %v3541_v25 = vpop.f32.mrb[22].mxu0 }
 0x138   : > { %v3630_v28 = vpop.f32.mrb[23].mxu1  ;;  %v3542_v6 = vpop.f32.mrb[23].mxu0 }
 0x139   : > { %v4864_v30 = vadd.f32 %v3628_v63, %v4811_v15  ;;  %v3631_v32 = vadd.f32 %v3630_v28, %v3629_v23  ;;  %v4866_v33 = vadd.f32 %v3542_v6, %v3541_v25  ;;  %v4348_v25 = vld [vmem:[%s4462_s28 + $0x450] ss:$36 sps:$4 sm:$0xff]  }
 0x13a   : > { %2374 = vmatmul.mubr.bf16.gmra.mrb[128].mxu1 %v4333_v19  ;;  %3997 = vmatmul.mubr.bf16.gmra.mrb[128].mxu0 %v4334_v20 }
 0x13b   : > { %v4869_v34 = vadd.f32 %v3631_v32, %v4817_v22  ;;  %2381 = vmatprep.mubr.bf16.mxu1 %v4335_v26  ;;  %4000 = vmatprep.mubr.bf16.mxu0 %v4337_v27  ;;  %v4349_v26 = vld [vmem:[%s4462_s28 + $0x458] ss:$36 sps:$4 sm:$0xff]  }
 0x13d   : > { %v3632_v35 = vpop.f32.mrb[24].mxu1  ;;  %v3544_v36 = vpop.f32.mrb[24].mxu0 }
 0x13e   : > { %v3633_v39 = vpop.f32.mrb[25].mxu1  ;;  %v3545_v40 = vpop.f32.mrb[25].mxu0 }
 0x13f   : > { %v3634_v15 = vadd.f32 %v3633_v39, %v3632_v35  ;;  %v3635_v43 = vpop.f32.mrb[26].mxu1  ;;  %v4873_v44 = vadd.f32 %v3545_v40, %v3544_v36  ;;  %v3547_v46 = vpop.f32.mrb[26].mxu0 }
 0x140   : > { %v3636_v50 = vpop.f32.mrb[27].mxu1  ;;  %v3548_v22 = vpop.f32.mrb[27].mxu0 }
 0x141   : > { %v4878_v51 = vadd.f32 %v3634_v15, %v4823_v31  ;;  %v3637_v52 = vadd.f32 %v3636_v50, %v3635_v43  ;;  %v4880_v55 = vadd.f32 %v3548_v22, %v3547_v46 }
 0x142   : > { %2382 = vmatmul.mubr.bf16.gmra.mrb[132].mxu1 %v4338_v41  ;;  %4001 = vmatmul.mubr.bf16.gmra.mrb[132].mxu0 %v4339_v42 }
 0x143   : > { %v4883_v56 = vadd.f32 %v3637_v52, %v4829_v38  ;;  %2389 = vmatprep.mubr.bf16.mxu1 %v4340_v48  ;;  %4004 = vmatprep.mubr.bf16.mxu0 %v4342_v49 }
 0x145   : > { %v3638_v57 = vpop.f32.mrb[28].mxu1  ;;  %v3550_v58 = vpop.f32.mrb[28].mxu0 }
 0x146   : > { %v3639_v59 = vpop.f32.mrb[29].mxu1  ;;  %v3551_v60 = vpop.f32.mrb[29].mxu0 }
 0x147   : > { %v3640_v31 = vadd.f32 %v3639_v59, %v3638_v57  ;;  %v3641_v2 = vpop.f32.mrb[30].mxu1  ;;  %v4887_v3 = vadd.f32 %v3551_v60, %v3550_v58  ;;  %v3553_v4 = vpop.f32.mrb[30].mxu0 }
 0x148   : > { %v3642_v10 = vpop.f32.mrb[31].mxu1  ;;  %v3554_v38 = vpop.f32.mrb[31].mxu0 }
 0x149   : > { %v4892_v14 = vadd.f32 %v3640_v31, %v4835_v47  ;;  %v3643_v16 = vadd.f32 %v3642_v10, %v3641_v2  ;;  %v4894_v17 = vadd.f32 %v3554_v38, %v3553_v4 }
 0x14a   : > { %2390 = vmatmul.mubr.bf16.gmra.mrb[136].mxu1 %v4343_v62  ;;  %4005 = vmatmul.mubr.bf16.gmra.mrb[136].mxu0 %v4344_v0 }
 0x14b   : > { %v4897_v18 = vadd.f32 %v3643_v16, %v4841_v54  ;;  %2397 = vmatprep.mubr.bf16.mxu1 %v4345_v7  ;;  %4008 = vmatprep.mubr.bf16.mxu0 %v4347_v8 }
 0x14d   : > { %v3644_v19 = vpop.f32.mrb[32].mxu1  ;;  %v3556_v20 = vpop.f32.mrb[32].mxu0 }
 0x14e   : > { %v3645_v63 = vpop.f32.mrb[33].mxu1  ;;  %v3557_v23 = vpop.f32.mrb[33].mxu0 }
 0x14f   : > { %v3646_v27 = vadd.f32 %v3645_v63, %v3644_v19  ;;  %v3647_v28 = vpop.f32.mrb[34].mxu1  ;;  %v3558_v47 = vadd.f32 %v3557_v23, %v3556_v20  ;;  %v3559_v6 = vpop.f32.mrb[34].mxu0 }
 0x150   : > { %v3648_v32 = vpop.f32.mrb[35].mxu1  ;;  %v3560_v35 = vpop.f32.mrb[35].mxu0 }
 0x151   : > { %v4902_v36 = vadd.f32 %v3646_v27, %v4845_v1  ;;  %v3649_v39 = vadd.f32 %v3648_v32, %v3647_v28  ;;  %v3561_v54 = vadd.f32 %v3560_v35, %v3559_v6 }
 0x152   : > { %2398 = vmatmul.mubr.bf16.gmra.mrb[140].mxu1 %v4348_v25  ;;  %4009 = vmatmul.mubr.bf16.gmra.mrb[140].mxu0 %v4349_v26 }
 0x153   : > { %v4905_v40 = vadd.f32 %v3649_v39, %v4852_v11 }
 0x155   : > { %v3650_v41 = vpop.f32.mrb[36].mxu1  ;;  %v3562_v42 = vpop.f32.mrb[36].mxu0 }
 0x156   : > { %v3651_v15 = vpop.f32.mrb[37].mxu1  ;;  %v3563_v43 = vpop.f32.mrb[37].mxu0 }
 0x157   : > { %v3652_v46 = vadd.f32 %v3651_v15, %v3650_v41  ;;  %v3653_v48 = vpop.f32.mrb[38].mxu1  ;;  %v3564_v49 = vadd.f32 %v3563_v43, %v3562_v42  ;;  %v3565_v50 = vpop.f32.mrb[38].mxu0 }
 0x158   : > { %v3654_v22 = vpop.f32.mrb[39].mxu1  ;;  %v3566_v52 = vpop.f32.mrb[39].mxu0 }
 0x159   : > { %v4908_v1 = vadd.f32 %v3652_v46, %v4859_v24  ;;  %v3655_v57 = vadd.f32 %v3654_v22, %v3653_v48  ;;  %v3567_v58 = vadd.f32 %v3566_v52, %v3565_v50 }
 0x15b   : > { %v4911_v59 = vadd.f32 %v3655_v57, %v4866_v33 }
 0x15d   : > { %v3656_v11 = vpop.f32.mrb[40].mxu1  ;;  %v3568_v60 = vpop.f32.mrb[40].mxu0 }
 0x15e   : > { %v3657_v62 = vpop.f32.mrb[41].mxu1  ;;  %v3569_v0 = vpop.f32.mrb[41].mxu0 }
 0x15f   : > { %v3658_v31 = vadd.f32 %v3657_v62, %v3656_v11  ;;  %v3659_v2 = vpop.f32.mrb[42].mxu1  ;;  %v4913_v4 = vadd.f32 %v3569_v0, %v3568_v60  ;;  %v3571_v7 = vpop.f32.mrb[42].mxu0 }
 0x160   : > { %v3660_v8 = vpop.f32.mrb[43].mxu1  ;;  %v3572_v10 = vpop.f32.mrb[43].mxu0 }
 0x161   : > { %v4916_v38 = vadd.f32 %v3658_v31, %v4873_v44  ;;  %v3661_v24 = vadd.f32 %v3660_v8, %v3659_v2  ;;  %v3573_v16 = vadd.f32 %v3572_v10, %v3571_v7 }
 0x163   : > { %v4919_v19 = vadd.f32 %v3661_v24, %v4880_v55 }
 0x165   : > { %v3662_v33 = vpop.f32.mrb[44].mxu1  ;;  %v3574_v20 = vpop.f32.mrb[44].mxu0 }
 0x166   : > { %v3663_v63 = vpop.f32.mrb[45].mxu1  ;;  %v3575_v23 = vpop.f32.mrb[45].mxu0 }
 0x167   : > { %v3664_v25 = vadd.f32 %v3663_v63, %v3662_v33  ;;  %v3665_v26 = vpop.f32.mrb[46].mxu1  ;;  %v4921_v27 = vadd.f32 %v3575_v23, %v3574_v20  ;;  %v3577_v28 = vpop.f32.mrb[46].mxu0 }
 0x168   : > { %v3666_v6 = vpop.f32.mrb[47].mxu1  ;;  %v3578_v32 = vpop.f32.mrb[47].mxu0 }
 0x169   : > { %v4924_v35 = vadd.f32 %v3664_v25, %v4887_v3  ;;  %v3667_v44 = vadd.f32 %v3666_v6, %v3665_v26  ;;  %v4926_v39 = vadd.f32 %v3578_v32, %v3577_v28 }
 0x16b   : > { %v4929_v55 = vadd.f32 %v3667_v44, %v4894_v17 }
 0x16d   : > { %v3668_v41 = vpop.f32.mrb[48].mxu1  ;;  %v3732_v42 = vpop.f32.mrb[48].mxu0 }
 0x16e   : > { %v3669_v15 = vpop.f32.mrb[49].mxu1  ;;  %v3733_v43 = vpop.f32.mrb[49].mxu0 }
 0x16f   : > { %v3670_v46 = vadd.f32 %v3669_v15, %v3668_v41  ;;  %v3734_v48 = vadd.f32 %v3733_v43, %v3732_v42  ;;  %v3671_v50 = vpop.f32.mrb[50].mxu1  ;;  %v3735_v22 = vpop.f32.mrb[50].mxu0 }
 0x170   : > { %v3672_v52 = vpop.f32.mrb[51].mxu1  ;;  %v3736_v57 = vpop.f32.mrb[51].mxu0 }
 0x171   : > { %v4931_v11 = vadd.f32 %v3670_v46, %v3558_v47  ;;  %v4934_v3 = vadd.f32 %v3734_v48, %v4850_v9  ;;  %v3673_v60 = vadd.f32 %v3672_v52, %v3671_v50  ;;  %v3737_v62 = vadd.f32 %v3736_v57, %v3735_v22 }
 0x173   : > { %v4936_v0 = vadd.f32 %v3673_v60, %v3561_v54  ;;  %v4939_v17 = vadd.f32 %v3737_v62, %v4855_v12 }
 0x175   : > { %v3674_v31 = vpop.f32.mrb[52].mxu1  ;;  %v3738_v2 = vpop.f32.mrb[52].mxu0 }
 0x176   : > { %v3675_v7 = vpop.f32.mrb[53].mxu1  ;;  %v3739_v8 = vpop.f32.mrb[53].mxu0 }
 0x177   : > { %v3676_v10 = vadd.f32 %v3675_v7, %v3674_v31  ;;  %v3740_v24 = vadd.f32 %v3739_v8, %v3738_v2  ;;  %v3677_v33 = vpop.f32.mrb[54].mxu1  ;;  %v3741_v20 = vpop.f32.mrb[54].mxu0 }
 0x178   : > { %v3678_v47 = vpop.f32.mrb[55].mxu1  ;;  %v3742_v63 = vpop.f32.mrb[55].mxu0 }
 0x179   : > { %v4941_v23 = vadd.f32 %v3676_v10, %v3564_v49  ;;  %v4944_v9 = vadd.f32 %v3740_v24, %v4864_v30  ;;  %v3679_v54 = vadd.f32 %v3678_v47, %v3677_v33  ;;  %v3743_v25 = vadd.f32 %v3742_v63, %v3741_v20 }
 0x17b   : > { %v4946_v26 = vadd.f32 %v3679_v54, %v3567_v58  ;;  %v4949_v12 = vadd.f32 %v3743_v25, %v4869_v34 }
 0x17d   : > { %v3680_v28 = vpop.f32.mrb[56].mxu1  ;;  %v3744_v6 = vpop.f32.mrb[56].mxu0 }
 0x17e   : > { %v3681_v32 = vpop.f32.mrb[57].mxu1  ;;  %v3745_v44 = vpop.f32.mrb[57].mxu0 }
 0x17f   : > { %v3682_v41 = vadd.f32 %v3681_v32, %v3680_v28  ;;  %v3746_v42 = vadd.f32 %v3745_v44, %v3744_v6  ;;  %v3683_v15 = vpop.f32.mrb[58].mxu1  ;;  %v3747_v43 = vpop.f32.mrb[58].mxu0 }
 0x180   : > { %v3684_v49 = vpop.f32.mrb[59].mxu1  ;;  %v3748_v46 = vpop.f32.mrb[59].mxu0 }
 0x181   : > { %v4952_v30 = vadd.f32 %v3682_v41, %v4913_v4  ;;  %v4955_v48 = vadd.f32 %v3746_v42, %v4878_v51  ;;  %v3685_v58 = vadd.f32 %v3684_v49, %v3683_v15  ;;  %v3749_v50 = vadd.f32 %v3748_v46, %v3747_v43 }
 0x183   : > { %v4957_v34 = vadd.f32 %v3685_v58, %v3573_v16  ;;  %v4960_v22 = vadd.f32 %v3749_v50, %v4883_v56 }
 0x185   : > { %v3686_v52 = vpop.f32.mrb[60].mxu1  ;;  %v3750_v57 = vpop.f32.mrb[60].mxu0 }
 0x186   : > { %v3687_v60 = vpop.f32.mrb[61].mxu1  ;;  %v3751_v62 = vpop.f32.mrb[61].mxu0 }
 0x187   : > { %v3688_v31 = vadd.f32 %v3687_v60, %v3686_v52  ;;  %v3752_v2 = vadd.f32 %v3751_v62, %v3750_v57  ;;  %v3689_v7 = vpop.f32.mrb[62].mxu1  ;;  %v3753_v8 = vpop.f32.mrb[62].mxu0 }
 0x188   : > { %v3690_v4 = vpop.f32.mrb[63].mxu1  ;;  %v3754_v10 = vpop.f32.mrb[63].mxu0 }
 0x189   : > { %v4963_v51 = vadd.f32 %v3688_v31, %v4921_v27  ;;  %v4966_v24 = vadd.f32 %v3752_v2, %v4892_v14  ;;  %v3691_v16 = vadd.f32 %v3690_v4, %v3689_v7  ;;  %v3755_v33 = vadd.f32 %v3754_v10, %v3753_v8 }
 0x18b   : > { %v4969_v56 = vadd.f32 %v3691_v16, %v4926_v39  ;;  %v4972_v20 = vadd.f32 %v3755_v33, %v4897_v18 }
 0x18d   : > { %v3692_v47 = vpop.f32.mrb[64].mxu1  ;;  %v3756_v63 = vpop.f32.mrb[64].mxu0 }
 0x18e   : > { %v3693_v54 = vpop.f32.mrb[65].mxu1  ;;  %v3757_v25 = vpop.f32.mrb[65].mxu0 }
 0x18f   : > { %v3694_v28 = vadd.f32 %v3693_v54, %v3692_v47  ;;  %v3758_v6 = vadd.f32 %v3757_v25, %v3756_v63  ;;  %v3695_v32 = vpop.f32.mrb[66].mxu1  ;;  %v3759_v27 = vpop.f32.mrb[66].mxu0 }
 0x190   : > { %v3696_v44 = vpop.f32.mrb[67].mxu1  ;;  %v3760_v41 = vpop.f32.mrb[67].mxu0 }
 0x191   : > { %v4975_v14 = vadd.f32 %v3694_v28, %v4797_v61  ;;  %v4978_v42 = vadd.f32 %v3758_v6, %v4902_v36  ;;  %v3697_v39 = vadd.f32 %v3696_v44, %v3695_v32  ;;  %v3761_v15 = vadd.f32 %v3760_v41, %v3759_v27 }
 0x193   : > { %v4981_v18 = vadd.f32 %v3697_v39, %v4803_v5  ;;  %v4984_v43 = vadd.f32 %v3761_v15, %v4905_v40 }
 0x195   : > { %v3698_v49 = vpop.f32.mrb[68].mxu1  ;;  %v3762_v46 = vpop.f32.mrb[68].mxu0 }
 0x196   : > { %v3699_v58 = vpop.f32.mrb[69].mxu1  ;;  %v3763_v50 = vpop.f32.mrb[69].mxu0 }
 0x197   : > { %v3700_v52 = vadd.f32 %v3699_v58, %v3698_v49  ;;  %v3764_v57 = vadd.f32 %v3763_v50, %v3762_v46  ;;  %v3701_v60 = vpop.f32.mrb[70].mxu1  ;;  %v3765_v61 = vpop.f32.mrb[70].mxu0 }
 0x198   : > { %v3702_v62 = vpop.f32.mrb[71].mxu1  ;;  %v3766_v31 = vpop.f32.mrb[71].mxu0 }
 0x199   : > { %v4987_v36 = vadd.f32 %v3700_v52, %v4809_v13  ;;  %v4990_v2 = vadd.f32 %v3764_v57, %v4908_v1  ;;  %v3703_v5 = vadd.f32 %v3702_v62, %v3701_v60  ;;  %v3767_v7 = vadd.f32 %v3766_v31, %v3765_v61 }
 0x19b   : > { %v4993_v40 = vadd.f32 %v3703_v5, %v4815_v21  ;;  %v4996_v8 = vadd.f32 %v3767_v7, %v4911_v59 }
 0x19d   : > { %v3704_v4 = vpop.f32.mrb[72].mxu1  ;;  %v3768_v10 = vpop.f32.mrb[72].mxu0 }
 0x19e   : > { %v3705_v16 = vpop.f32.mrb[73].mxu1  ;;  %v3769_v33 = vpop.f32.mrb[73].mxu0 }
 0x19f   : > { %v3706_v47 = vadd.f32 %v3705_v16, %v3704_v4  ;;  %v3770_v63 = vadd.f32 %v3769_v33, %v3768_v10  ;;  %v3707_v54 = vpop.f32.mrb[74].mxu1  ;;  %v3771_v13 = vpop.f32.mrb[74].mxu0 }
 0x1a0   : > { %v3708_v25 = vpop.f32.mrb[75].mxu1  ;;  %v3772_v28 = vpop.f32.mrb[75].mxu0 }
 0x1a1   : > { %v4999_v1 = vadd.f32 %v3706_v47, %v4821_v29  ;;  %v5002_v6 = vadd.f32 %v3770_v63, %v4916_v38  ;;  %v3709_v21 = vadd.f32 %v3708_v25, %v3707_v54  ;;  %v3773_v32 = vadd.f32 %v3772_v28, %v3771_v13 }
 0x1a3   : > { %v5005_v59 = vadd.f32 %v3709_v21, %v4827_v37  ;;  %v5008_v27 = vadd.f32 %v3773_v32, %v4919_v19 }
 0x1a5   : > { %v3710_v44 = vpop.f32.mrb[76].mxu1  ;;  %v3774_v41 = vpop.f32.mrb[76].mxu0 }
 0x1a6   : > { %v3711_v39 = vpop.f32.mrb[77].mxu1  ;;  %v3775_v15 = vpop.f32.mrb[77].mxu0 }
 0x1a7   : > { %v3712_v49 = vadd.f32 %v3711_v39, %v3710_v44  ;;  %v3776_v46 = vadd.f32 %v3775_v15, %v3774_v41  ;;  %v3713_v58 = vpop.f32.mrb[78].mxu1  ;;  %v3777_v29 = vpop.f32.mrb[78].mxu0 }
 0x1a8   : > { %v3714_v50 = vpop.f32.mrb[79].mxu1  ;;  %v3778_v52 = vpop.f32.mrb[79].mxu0 }
 0x1a9   : > { %v5011_v38 = vadd.f32 %v3712_v49, %v4833_v45  ;;  %v5014_v57 = vadd.f32 %v3776_v46, %v4924_v35  ;;  %v3715_v37 = vadd.f32 %v3714_v50, %v3713_v58  ;;  %v3779_v60 = vadd.f32 %v3778_v52, %v3777_v29 }
 0x1ab   : > { %v5017_v19 = vadd.f32 %v3715_v37, %v4839_v53  ;;  %v5020_v61 = vadd.f32 %v3779_v60, %v4929_v55 }
 0x1ad   : > { %v3780_v62 = vpop.f32.mrb[80].mxu0  ;;  %v3844_v31 = vpop.f32.mrb[80].mxu1 }
 0x1ae   : > { %v3781_v5 = vpop.f32.mrb[81].mxu0  ;;  %v3845_v7 = vpop.f32.mrb[81].mxu1 }
 0x1af   : > { %v3782_v4 = vadd.f32 %v3781_v5, %v3780_v62  ;;  %v3846_v10 = vadd.f32 %v3845_v7, %v3844_v31  ;;  %v3783_v16 = vpop.f32.mrb[82].mxu0  ;;  %v3847_v45 = vpop.f32.mrb[82].mxu1 }
 0x1b0   : > { %v3784_v33 = vpop.f32.mrb[83].mxu0  ;;  %v3848_v47 = vpop.f32.mrb[83].mxu1 }
 0x1b1   : > { %v5023_v35 = vadd.f32 %v3782_v4, %v4931_v11  ;;  %v3785_v63 = vadd.f32 %v3784_v33, %v3783_v16  ;;  %v3849_v54 = vadd.f32 %v3848_v47, %v3847_v45  ;;  %v5026_v53 = vadd.f32 %v3846_v10, %v4934_v3 }
 0x1b3   : > { %v5029_v55 = vadd.f32 %v3785_v63, %v4936_v0  ;;  %v5032_v13 = vadd.f32 %v3849_v54, %v4939_v17 }
 0x1b5   : > { %v3786_v25 = vpop.f32.mrb[84].mxu0  ;;  %v3850_v28 = vpop.f32.mrb[84].mxu1 }
 0x1b6   : > { %v3787_v21 = vpop.f32.mrb[85].mxu0  ;;  %v3851_v32 = vpop.f32.mrb[85].mxu1 }
 0x1b7   : > { %v3788_v44 = vadd.f32 %v3787_v21, %v3786_v25  ;;  %v3852_v41 = vadd.f32 %v3851_v32, %v3850_v28  ;;  %v3789_v39 = vpop.f32.mrb[86].mxu0  ;;  %v3853_v11 = vpop.f32.mrb[86].mxu1 }
 0x1b8   : > { %v3790_v15 = vpop.f32.mrb[87].mxu0  ;;  %v3854_v49 = vpop.f32.mrb[87].mxu1 }
 0x1b9   : > { %v5035_v46 = vadd.f32 %v3788_v44, %v4941_v23  ;;  %v3791_v3 = vadd.f32 %v3790_v15, %v3789_v39  ;;  %v3855_v58 = vadd.f32 %v3854_v49, %v3853_v11  ;;  %v5038_v0 = vadd.f32 %v3852_v41, %v4944_v9 }
 0x1bb   : > { %v5041_v17 = vadd.f32 %v3791_v3, %v4946_v26  ;;  %v5044_v29 = vadd.f32 %v3855_v58, %v4949_v12 }
 0x1bd   : > { %v3792_v50 = vpop.f32.mrb[88].mxu0  ;;  %v3856_v52 = vpop.f32.mrb[88].mxu1 }
 0x1be   : > { %v3793_v37 = vpop.f32.mrb[89].mxu0  ;;  %v3857_v60 = vpop.f32.mrb[89].mxu1 }
 0x1bf   : > { %v3794_v62 = vadd.f32 %v3793_v37, %v3792_v50  ;;  %v3858_v31 = vadd.f32 %v3857_v60, %v3856_v52  ;;  %v3795_v5 = vpop.f32.mrb[90].mxu0  ;;  %v3859_v23 = vpop.f32.mrb[90].mxu1 }
 0x1c0   : > { %v3796_v7 = vpop.f32.mrb[91].mxu0  ;;  %v3860_v4 = vpop.f32.mrb[91].mxu1 }
 0x1c1   : > { %v5047_v10 = vadd.f32 %v3794_v62, %v4952_v30  ;;  %v3797_v9 = vadd.f32 %v3796_v7, %v3795_v5  ;;  %v3861_v16 = vadd.f32 %v3860_v4, %v3859_v23  ;;  %v5050_v26 = vadd.f32 %v3858_v31, %v4955_v48 }
 0x1c3   : > { %v5053_v12 = vadd.f32 %v3797_v9, %v4957_v34  ;;  %v5056_v45 = vadd.f32 %v3861_v16, %v4960_v22 }
 0x1c5   : > { %v3798_v33 = vpop.f32.mrb[92].mxu0  ;;  %v3862_v47 = vpop.f32.mrb[92].mxu1 }
 0x1c6   : > { %v3799_v63 = vpop.f32.mrb[93].mxu0  ;;  %v3863_v54 = vpop.f32.mrb[93].mxu1 }
 0x1c7   : > { %v3800_v25 = vadd.f32 %v3799_v63, %v3798_v33  ;;  %v3864_v28 = vadd.f32 %v3863_v54, %v3862_v47  ;;  %v3801_v21 = vpop.f32.mrb[94].mxu0  ;;  %v3865_v30 = vpop.f32.mrb[94].mxu1 }
 0x1c8   : > { %v3802_v32 = vpop.f32.mrb[95].mxu0  ;;  %v3866_v44 = vpop.f32.mrb[95].mxu1 }
 0x1c9   : > { %v5059_v41 = vadd.f32 %v3800_v25, %v4963_v51  ;;  %v3803_v48 = vadd.f32 %v3802_v32, %v3801_v21  ;;  %v3867_v39 = vadd.f32 %v3866_v44, %v3865_v30  ;;  %v5062_v34 = vadd.f32 %v3864_v28, %v4966_v24 }
 0x1cb   : > { %v5065_v22 = vadd.f32 %v3803_v48, %v4969_v56  ;;  %v5068_v11 = vadd.f32 %v3867_v39, %v4972_v20 }
 0x1cd   : > { %v3804_v15 = vpop.f32.mrb[96].mxu0  ;;  %v3868_v49 = vpop.f32.mrb[96].mxu1 }
 0x1ce   : > { %v3805_v3 = vpop.f32.mrb[97].mxu0  ;;  %v3869_v58 = vpop.f32.mrb[97].mxu1 }
 0x1cf   : > { %v3806_v50 = vadd.f32 %v3805_v3, %v3804_v15  ;;  %v3870_v52 = vadd.f32 %v3869_v58, %v3868_v49  ;;  %v3807_v37 = vpop.f32.mrb[98].mxu0  ;;  %v3871_v51 = vpop.f32.mrb[98].mxu1 }
 0x1d0   : > { %v3808_v60 = vpop.f32.mrb[99].mxu0  ;;  %v3872_v62 = vpop.f32.mrb[99].mxu1 }
 0x1d1   : > { %v5071_v31 = vadd.f32 %v3806_v50, %v4975_v14  ;;  %v3809_v24 = vadd.f32 %v3808_v60, %v3807_v37  ;;  %v3873_v5 = vadd.f32 %v3872_v62, %v3871_v51  ;;  %v5074_v56 = vadd.f32 %v3870_v52, %v4978_v42 }
 0x1d3   : > { %v5077_v20 = vadd.f32 %v3809_v24, %v4981_v18  ;;  %v5080_v23 = vadd.f32 %v3873_v5, %v4984_v43 }
 0x1d5   : > { %v3810_v7 = vpop.f32.mrb[100].mxu0  ;;  %v3874_v4 = vpop.f32.mrb[100].mxu1 }
 0x1d6   : > { %v3811_v9 = vpop.f32.mrb[101].mxu0  ;;  %v3875_v16 = vpop.f32.mrb[101].mxu1 }
 0x1d7   : > { %v3812_v33 = vadd.f32 %v3811_v9, %v3810_v7  ;;  %v3876_v47 = vadd.f32 %v3875_v16, %v3874_v4  ;;  %v3813_v63 = vpop.f32.mrb[102].mxu0  ;;  %v3877_v14 = vpop.f32.mrb[102].mxu1 }
 0x1d8   : > { %v3814_v54 = vpop.f32.mrb[103].mxu0  ;;  %v3878_v25 = vpop.f32.mrb[103].mxu1 }
 0x1d9   : > { %v5083_v28 = vadd.f32 %v3812_v33, %v4987_v36  ;;  %v3815_v42 = vadd.f32 %v3814_v54, %v3813_v63  ;;  %v3879_v21 = vadd.f32 %v3878_v25, %v3877_v14  ;;  %v5086_v18 = vadd.f32 %v3876_v47, %v4990_v2 }
 0x1db   : > { %v5089_v43 = vadd.f32 %v3815_v42, %v4993_v40  ;;  %v5092_v30 = vadd.f32 %v3879_v21, %v4996_v8 }
 0x1dd   : > { %v3816_v32 = vpop.f32.mrb[104].mxu0  ;;  %v3880_v44 = vpop.f32.mrb[104].mxu1 }
 0x1de   : > { %v3817_v48 = vpop.f32.mrb[105].mxu0  ;;  %v3881_v39 = vpop.f32.mrb[105].mxu1 }
 0x1df   : > { %v3818_v15 = vadd.f32 %v3817_v48, %v3816_v32  ;;  %v3882_v49 = vadd.f32 %v3881_v39, %v3880_v44  ;;  %v3819_v3 = vpop.f32.mrb[106].mxu0  ;;  %v3883_v36 = vpop.f32.mrb[106].mxu1 }
 0x1e0   : > { %v3820_v58 = vpop.f32.mrb[107].mxu0  ;;  %v3884_v50 = vpop.f32.mrb[107].mxu1 }
 0x1e1   : > { %v5095_v52 = vadd.f32 %v3818_v15, %v4999_v1  ;;  %v3821_v2 = vadd.f32 %v3820_v58, %v3819_v3  ;;  %v3885_v37 = vadd.f32 %v3884_v50, %v3883_v36  ;;  %v5098_v40 = vadd.f32 %v3882_v49, %v5002_v6 }
 0x1e3   : > { %v5101_v8 = vadd.f32 %v3821_v2, %v5005_v59  ;;  %v5104_v51 = vadd.f32 %v3885_v37, %v5008_v27 }
 0x1e5   : > { %v3822_v60 = vpop.f32.mrb[108].mxu0  ;;  %v3886_v62 = vpop.f32.mrb[108].mxu1 }
 0x1e6   : > { %v3823_v24 = vpop.f32.mrb[109].mxu0  ;;  %v3887_v5 = vpop.f32.mrb[109].mxu1 }
 0x1e7   : > { %v3824_v7 = vadd.f32 %v3823_v24, %v3822_v60  ;;  %v3888_v4 = vadd.f32 %v3887_v5, %v3886_v62  ;;  %v3825_v9 = vpop.f32.mrb[110].mxu0  ;;  %v3889_v1 = vpop.f32.mrb[110].mxu1 }
 0x1e8   : > { %v3826_v16 = vpop.f32.mrb[111].mxu0  ;;  %v3890_v33 = vpop.f32.mrb[111].mxu1 }
 0x1e9   : > { %v5107_v47 = vadd.f32 %v3824_v7, %v5011_v38  ;;  %v3827_v6 = vadd.f32 %v3826_v16, %v3825_v9  ;;  %v3891_v63 = vadd.f32 %v3890_v33, %v3889_v1  ;;  %v2336_v59 = vadd.f32 %v3888_v4, %v5014_v57 }
 0x1eb   : > { %v5111_v27 = vadd.f32 %v3827_v6, %v5017_v19  ;;  %v2339_v14 = vadd.f32 %v3891_v63, %v5020_v61 }
 0x1ed   : > { %v3892_v54 = vpop.f32.mrb[112].mxu1  ;;  %v3982_v25 = vpop.f32.mrb[112].mxu0 }
 0x1ee   : > { %v5115_v42 = vadd.f32 %v3982_v25, %v5038_v0  ;;  %v3893_v21 = vpop.f32.mrb[113].mxu1  ;;  %v2440_v32 = vpop.f32.mrb[113].mxu0 }
 0x1ef   : > { %v3894_v44 = vadd.f32 %v3893_v21, %v3892_v54  ;;  %v5118_v38 = vadd.f32 %v2440_v32, %v5026_v53  ;;  %v3895_v48 = vpop.f32.mrb[114].mxu1  ;;  %v3983_v39 = vpop.f32.mrb[114].mxu0 }
 0x1f0   : > { %v5121_v57 = vadd.f32 %v3983_v39, %v5044_v29  ;;  %v3896_v19 = vpop.f32.mrb[115].mxu1  ;;  %v2443_v15 = vpop.f32.mrb[115].mxu0 }
 0x1f1   : > { %v3897_v49 = vadd.f32 %v3896_v19, %v3895_v48  ;;  %v5124_v61 = vadd.f32 %v2443_v15, %v5032_v13  ;;  %v2344_v0 = vadd.f32 %v3894_v44, %v5023_v35 }
 0x1f3   : > { %v2347_v3 = vadd.f32 %v3897_v49, %v5029_v55 }
 0x1f5   : > { %v3898_v36 = vpop.f32.mrb[116].mxu1  ;;  %v3986_v58 = vpop.f32.mrb[116].mxu0 }
 0x1f6   : > { %v5129_v53 = vadd.f32 %v3986_v58, %v5062_v34  ;;  %v3899_v50 = vpop.f32.mrb[117].mxu1  ;;  %v2456_v2 = vpop.f32.mrb[117].mxu0 }
 0x1f7   : > { %v3900_v37 = vadd.f32 %v3899_v50, %v3898_v36  ;;  %v5132_v29 = vadd.f32 %v2456_v2, %v5050_v26  ;;  %v3901_v60 = vpop.f32.mrb[118].mxu1  ;;  %v3987_v62 = vpop.f32.mrb[118].mxu0 }
 0x1f8   : > { %v5135_v13 = vadd.f32 %v3987_v62, %v5068_v11  ;;  %v3902_v24 = vpop.f32.mrb[119].mxu1  ;;  %v2459_v35 = vpop.f32.mrb[119].mxu0 }
 0x1f9   : > { %v3903_v5 = vadd.f32 %v3902_v24, %v3901_v60  ;;  %v5138_v55 = vadd.f32 %v2459_v35, %v5056_v45  ;;  %v2352_v34 = vadd.f32 %v3900_v37, %v5035_v46 }
 0x1fb   : > { %v2355_v7 = vadd.f32 %v3903_v5, %v5041_v17 }
 0x1fd   : > { %v3904_v4 = vpop.f32.mrb[120].mxu1  ;;  %v3990_v9 = vpop.f32.mrb[120].mxu0 }
 0x1fe   : > { %v5143_v26 = vadd.f32 %v3990_v9, %v5086_v18  ;;  %v3905_v1 = vpop.f32.mrb[121].mxu1  ;;  %v2472_v16 = vpop.f32.mrb[121].mxu0 }
 0x1ff   : > { %v3906_v33 = vadd.f32 %v3905_v1, %v3904_v4  ;;  %v5146_v11 = vadd.f32 %v2472_v16, %v5074_v56  ;;  %v3907_v6 = vpop.f32.mrb[122].mxu1  ;;  %v3991_v63 = vpop.f32.mrb[122].mxu0 }
 0x200   : > { %v5149_v45 = vadd.f32 %v3991_v63, %v5092_v30  ;;  %v3908_v54 = vpop.f32.mrb[123].mxu1  ;;  %v2475_v46 = vpop.f32.mrb[123].mxu0 }
 0x201   : > { %v3909_v25 = vadd.f32 %v3908_v54, %v3907_v6  ;;  %v5152_v17 = vadd.f32 %v2475_v46, %v5080_v23  ;;  %v2360_v18 = vadd.f32 %v3906_v33, %v5047_v10 }
 0x203   : > { %v2363_v21 = vadd.f32 %v3909_v25, %v5053_v12 }
 0x205   : > { %v3910_v32 = vpop.f32.mrb[124].mxu1  ;;  %v3994_v44 = vpop.f32.mrb[124].mxu0 }
 0x206   : > { %v5156_v48 = vadd.f32 %v3994_v44, %v2336_v59  ;;  %v3911_v56 = vpop.f32.mrb[125].mxu1  ;;  %v2488_v39 = vpop.f32.mrb[125].mxu0 }
 0x207   : > { %v3912_v19 = vadd.f32 %v3911_v56, %v3910_v32  ;;  %v5159_v30 = vadd.f32 %v2488_v39, %v5098_v40  ;;  %v3913_v15 = vpop.f32.mrb[126].mxu1  ;;  %v3995_v49 = vpop.f32.mrb[126].mxu0 }
 0x208   : > { %v5161_v36 = vadd.f32 %v3995_v49, %v2339_v14  ;;  %v3914_v23 = vpop.f32.mrb[127].mxu1  ;;  %v2491_v58 = vpop.f32.mrb[127].mxu0 }
 0x209   : > { %v3915_v50 = vadd.f32 %v3914_v23, %v3913_v15  ;;  %v5164_v10 = vadd.f32 %v2491_v58, %v5104_v51  ;;  %v2368_v12 = vadd.f32 %v3912_v19, %v5059_v41 }
 0x20b   : > { %v2371_v59 = vadd.f32 %v3915_v50, %v5065_v22 }
 0x20d   : > { %v3916_v2 = vpop.f32.mrb[128].mxu1  ;;  %v3998_v37 = vpop.f32.mrb[128].mxu0 }
 0x20e   : > { %v5168_v60 = vadd.f32 %v3998_v37, %v2352_v34  ;;  %v3917_v40 = vpop.f32.mrb[129].mxu1  ;;  %v2504_v62 = vpop.f32.mrb[129].mxu0 }
 0x20f   : > { %v3918_v24 = vadd.f32 %v3917_v40, %v3916_v2  ;;  %v5170_v35 = vadd.f32 %v2504_v62, %v2344_v0  ;;  %v3919_v14 = vpop.f32.mrb[130].mxu1  ;;  %v3999_v5 = vpop.f32.mrb[130].mxu0 }
 0x210   : > { %v5172_v4 = vadd.f32 %v3999_v5, %v2355_v7  ;;  %v3920_v9 = vpop.f32.mrb[131].mxu1  ;;  %v2507_v51 = vpop.f32.mrb[131].mxu0 }
 0x211   : > { %v3921_v1 = vadd.f32 %v3920_v9, %v3919_v14  ;;  %v5174_v16 = vadd.f32 %v2507_v51, %v2347_v3  ;;  %v2376_v41 = vadd.f32 %v3918_v24, %v5071_v31 }
 0x213   : > { %v2379_v22 = vadd.f32 %v3921_v1, %v5077_v20 }
 0x215   : > { %v3922_v34 = vpop.f32.mrb[132].mxu1  ;;  %v4002_v33 = vpop.f32.mrb[132].mxu0 }
 0x216   : > { %v5178_v6 = vadd.f32 %v4002_v33, %v2368_v12  ;;  %v3923_v63 = vpop.f32.mrb[133].mxu1  ;;  %v2520_v0 = vpop.f32.mrb[133].mxu0 }
 0x217   : > { %v3924_v54 = vadd.f32 %v3923_v63, %v3922_v34  ;;  %v5180_v46 = vadd.f32 %v2520_v0, %v2360_v18  ;;  %v3925_v7 = vpop.f32.mrb[134].mxu1  ;;  %v4003_v25 = vpop.f32.mrb[134].mxu0 }
 0x218   : > { %v5182_v32 = vadd.f32 %v4003_v25, %v2371_v59  ;;  %v3926_v44 = vpop.f32.mrb[135].mxu1  ;;  %v2523_v3 = vpop.f32.mrb[135].mxu0  ;;  %v2571_v25 = vadd.f32 (!%p3327_p10), %v5124_v61, %v5118_v38 }
 0x219   : > { %v3927_v56 = vadd.f32 %v3926_v44, %v3925_v7  ;;  %v5184_v39 = vadd.f32 %v2523_v3, %v2363_v21  ;;  %v2384_v31 = vadd.f32 %v3924_v54, %v5083_v28 }
 0x21a   : > { %v2572_v44 = vadd.f32 (!%p3327_p10), %v2571_v25, %v5115_v42  ;;  %v2622_v25 = vmul.f32 (!%p3327_p10), %v5149_v45, %v5149_v45 }
 0x21b   : > { %v2387_v20 = vadd.f32 %v3927_v56, %v5089_v43  ;;  %v2612_v56 = vmul.f32 (!%p3327_p10), %v5124_v61, %v5124_v61 }
 0x21c   : > { %v2573_v3 = vadd.f32 (!%p3327_p10), %v2572_v44, %v5121_v57 }
 0x21d   : > { %v3928_v19 = vpop.f32.mrb[136].mxu1  ;;  %v4006_v15 = vpop.f32.mrb[136].mxu0 }
 0x21e   : > { %v5188_v49 = vadd.f32 %v4006_v15, %v2384_v31  ;;  %v3929_v23 = vpop.f32.mrb[137].mxu1  ;;  %v2536_v18 = vpop.f32.mrb[137].mxu0  ;;  %v2613_v31 = vmul.f32 (!%p3327_p10), %v5115_v42, %v5115_v42 }
 0x21f   : > { %v3930_v58 = vadd.f32 %v3929_v23, %v3928_v19  ;;  %v5190_v50 = vadd.f32 %v2536_v18, %v2376_v41  ;;  %v3931_v12 = vpop.f32.mrb[138].mxu1  ;;  %v4007_v59 = vpop.f32.mrb[138].mxu0  ;;  %v2614_v19 = vmul.f32 (!%p3327_p10), %v5121_v57, %v5121_v57  ;;  %v2615_v18 = vmul.f32 (!%p3327_p10), %v5132_v29, %v5132_v29 }
 0x220   : > { %v5192_v2 = vadd.f32 %v4007_v59, %v2387_v20  ;;  %v3932_v37 = vpop.f32.mrb[139].mxu1  ;;  %v2539_v21 = vpop.f32.mrb[139].mxu0  ;;  %v2616_v59 = vmul.f32 (!%p3327_p10), %v5138_v55, %v5138_v55 }
 0x221   : > { %v3933_v40 = vadd.f32 %v3932_v37, %v3931_v12  ;;  %v5194_v62 = vadd.f32 %v2539_v21, %v2379_v22  ;;  %v2392_v28 = vadd.f32 %v3930_v58, %v5095_v52 }
 0x223   : > { %v2395_v43 = vadd.f32 %v3933_v40, %v5101_v8  ;;  %v2617_v40 = vmul.f32 (!%p3327_p10), %v5129_v53, %v5129_v53 }
 0x225   : > { %v3934_v24 = vpop.f32.mrb[140].mxu1  ;;  %v4010_v14 = vpop.f32.mrb[140].mxu0 }
 0x226   : > { %v3935_v5 = vpop.f32.mrb[141].mxu1  ;;  %v2552_v9 = vpop.f32.mrb[141].mxu0 }
 0x227   : > { %v3936_v51 = vadd.f32 %v3935_v5, %v3934_v24  ;;  %v5198_v1 = vadd.f32 %v2552_v9, %v2392_v28  ;;  %v3937_v41 = vpop.f32.mrb[142].mxu1  ;;  %v4011_v34 = vpop.f32.mrb[142].mxu0  ;;  %2569 = sbr.rel (%p3327_p10) target bundleno = 632 (0x278), region = 44  ;;  %v2618_v24 = vmul.f32 (!%p3327_p10), %v5135_v13, %v5135_v13  ;;  %v2619_v9 = vmul.f32 (!%p3327_p10), %v5146_v11, %v5146_v11 }
 0x228   : > { %v3938_v33 = vpop.f32.mrb[143].mxu1  ;;  %v2555_v63 = vpop.f32.mrb[143].mxu0 }
 0x229   : > { %v2400_v0 = vadd.f32 %v3936_v51, %v5107_v47  ;;  %v3939_v54 = vadd.f32 %v3938_v33, %v3937_v41  ;;  %v5201_v22 = vadd.f32 %v2555_v63, %v2395_v43  ;;  %v2611_v47 = vmul.f32 (!%p3327_p10), %v5118_v38, %v5118_v38 }
 0x22b   : > { %v5203_v7 = vadd.f32 %v4010_v14, %v2400_v0  ;;  %v2403_v52 = vadd.f32 %v3939_v54, %v5111_v27  ;;  %v2574_v27 = vadd.f32 (!%p3327_p10), %v2573_v3, %v5132_v29  ;;  %v2643_v15 = vadd.f32 (!%p3327_p10), %v2612_v56, %v2611_v47 }
 0x22c   : > { %v2621_v0 = vmul.f32 (!%p3327_p10), %v5143_v26, %v5143_v26  ;;  %v2623_v47 = vmul.f32 (!%p3327_p10), %v5159_v30, %v5159_v30 }
 0x22d   : > { %v5206_v8 = vadd.f32 %v4011_v34, %v2403_v52  ;;  %v2575_v20 = vadd.f32 (!%p3327_p10), %v2574_v27, %v5138_v55  ;;  %v2644_v58 = vadd.f32 (!%p3327_p10), %v2643_v15, %v2613_v31  ;;  %v2620_v34 = vmul.f32 (!%p3327_p10), %v5152_v17, %v5152_v17 }
 0x22e   : > { %v2624_v31 = vmul.f32 %v5164_v10, %v5164_v10  ;;  %v2625_v15 = vmul.f32 %v5156_v48, %v5156_v48 }
 0x22f   : > { %v2576_v23 = vadd.f32 %v2575_v20, %v5129_v53  ;;  %v2645_v37 = vadd.f32 %v2644_v58, %v2614_v19  ;;  %v2626_v58 = vmul.f32 %v5161_v36, %v5161_v36 }
 0x231   : > { %v2577_v12 = vadd.f32 %v2576_v23, %v5135_v13  ;;  %v2646_v28 = vadd.f32 %v2645_v37, %v2615_v18  ;;  %v2627_v37 = vmul.f32 %v5170_v35, %v5170_v35 }
 0x233   : > { %v2578_v21 = vadd.f32 %v2577_v12, %v5146_v11  ;;  %v2647_v14 = vadd.f32 %v2646_v28, %v2616_v59  ;;  %v2628_v28 = vmul.f32 %v5174_v16, %v5174_v16 }
 0x235   : > { %v2579_v43 = vadd.f32 %v2578_v21, %v5152_v17  ;;  %v2648_v51 = vadd.f32 %v2647_v14, %v2617_v40  ;;  %v2629_v14 = vmul.f32 %v5168_v60, %v5168_v60 }
 0x237   : > { %v2580_v5 = vadd.f32 %v2579_v43, %v5143_v26  ;;  %v2649_v33 = vadd.f32 %v2648_v51, %v2618_v24  ;;  %v2630_v51 = vmul.f32 %v5172_v4, %v5172_v4 }
 0x239   : > { %v2581_v41 = vadd.f32 %v2580_v5, %v5149_v45  ;;  %v2650_v54 = vadd.f32 %v2649_v33, %v2619_v9  ;;  %v2631_v33 = vmul.f32 %v5180_v46, %v5180_v46 }
 0x23b   : > { %v2582_v63 = vadd.f32 %v2581_v41, %v5159_v30  ;;  %v2651_v44 = vadd.f32 %v2650_v54, %v2620_v34  ;;  %v2632_v54 = vmul.f32 %v5184_v39, %v5184_v39 }
 0x23d   : > { %v2583_v52 = vadd.f32 %v2582_v63, %v5164_v10  ;;  %v2652_v56 = vadd.f32 %v2651_v44, %v2621_v0  ;;  %v2633_v44 = vmul.f32 %v5178_v6, %v5178_v6 }
 0x23f   : > { %v2584_v3 = vadd.f32 %v2583_v52, %v5156_v48  ;;  %v2653_v20 = vadd.f32 %v2652_v56, %v2622_v25  ;;  %v2634_v56 = vmul.f32 %v5182_v32, %v5182_v32 }
 0x241   : > { %v2585_v27 = vadd.f32 %v2584_v3, %v5161_v36  ;;  %v2654_v23 = vadd.f32 %v2653_v20, %v2623_v47  ;;  %v2635_v20 = vmul.f32 %v5190_v50, %v5190_v50 }
 0x243   : > { %v2586_v19 = vadd.f32 %v2585_v27, %v5170_v35  ;;  %v2655_v12 = vadd.f32 %v2654_v23, %v2624_v31  ;;  %v2636_v23 = vmul.f32 %v5194_v62, %v5194_v62 }
 0x245   : > { %v2587_v18 = vadd.f32 %v2586_v19, %v5174_v16  ;;  %v2656_v21 = vadd.f32 %v2655_v12, %v2625_v15  ;;  %v2637_v12 = vmul.f32 %v5188_v49, %v5188_v49 }
 0x247   : > { %v2588_v59 = vadd.f32 %v2587_v18, %v5168_v60  ;;  %v2657_v43 = vadd.f32 %v2656_v21, %v2626_v58  ;;  %v2638_v21 = vmul.f32 %v5192_v2, %v5192_v2 }
 0x249   : > { %v2589_v40 = vadd.f32 %v2588_v59, %v5172_v4  ;;  %v2658_v5 = vadd.f32 %v2657_v43, %v2627_v37  ;;  %v2639_v43 = vmul.f32 %v5198_v1, %v5198_v1 }
 0x24b   : > { %v2590_v24 = vadd.f32 %v2589_v40, %v5180_v46  ;;  %v2659_v41 = vadd.f32 %v2658_v5, %v2628_v28  ;;  %v2640_v5 = vmul.f32 %v5201_v22, %v5201_v22 }
 0x24d   : > { %v2591_v9 = vadd.f32 %v2590_v24, %v5184_v39  ;;  %v2660_v63 = vadd.f32 %v2659_v41, %v2629_v14  ;;  %v2641_v41 = vmul.f32 %v5203_v7, %v5203_v7 }
 0x24f   : > { %v2592_v34 = vadd.f32 %v2591_v9, %v5178_v6  ;;  %v2661_v52 = vadd.f32 %v2660_v63, %v2630_v51  ;;  %v2642_v63 = vmul.f32 %v5206_v8, %v5206_v8 }
 0x251   : > { %v2593_v0 = vadd.f32 %v2592_v34, %v5182_v32  ;;  %v2662_v3 = vadd.f32 %v2661_v52, %v2631_v33 }
 0x253   : > { %v2594_v25 = vadd.f32 %v2593_v0, %v5190_v50  ;;  %v2663_v27 = vadd.f32 %v2662_v3, %v2632_v54 }
 0x255   : > { %v2595_v47 = vadd.f32 %v2594_v25, %v5194_v62  ;;  %v2664_v19 = vadd.f32 %v2663_v27, %v2633_v44 }
 0x257   : > { %v2596_v31 = vadd.f32 %v2595_v47, %v5188_v49  ;;  %v2665_v18 = vadd.f32 %v2664_v19, %v2634_v56  ;;  %v2570_v47 = vld [vmem:[#allocation2] sm:$0x1] }
 0x259   : > { %v2597_v15 = vadd.f32 %v2596_v31, %v5192_v2  ;;  %v2666_v59 = vadd.f32 %v2665_v18, %v2635_v20  ;;  %v2610_v18 = vld [vmem:[#allocation3] sm:$0x1] }
 0x25b   : > { %v2598_v58 = vadd.f32 %v2597_v15, %v5198_v1  ;;  %v2667_v40 = vadd.f32 %v2666_v59, %v2636_v23 }
 0x25d   : > { %v2599_v37 = vadd.f32 %v2598_v58, %v5201_v22  ;;  %v2668_v24 = vadd.f32 %v2667_v40, %v2637_v12 }
 0x25f   : > { %v2600_v28 = vadd.f32 %v2599_v37, %v5203_v7  ;;  %v2669_v9 = vadd.f32 %v2668_v24, %v2638_v21 }
 0x261   : > { %v2601_v14 = vadd.f32 %v2600_v28, %v5206_v8  ;;  %v2670_v34 = vadd.f32 %v2669_v9, %v2639_v43 }
 0x263   : > { %v2602_v51 = vrot.slane %v2601_v14, 4  ;;  %v2671_v0 = vadd.f32 %v2670_v34, %v2640_v5 }
 0x265   : > { %v2603_v33 = vadd.f32 %v2602_v51, %v2601_v14  ;;  %v2672_v52 = vadd.f32 %v2671_v0, %v2641_v41 }
 0x267   : > { %v2604_v54 = vrot.slane %v2603_v33, 2  ;;  %v2673_v44 = vadd.f32 %v2672_v52, %v2642_v63 }
 0x269   : > { %v2605_v25 = vadd.f32 %v2604_v54, %v2603_v33  ;;  %v2674_v56 = vrot.slane %v2673_v44, 4 }
 0x26b   : > { %v2606_v3 = vrot.slane %v2605_v25, 1  ;;  %v2675_v31 = vadd.f32 %v2674_v56, %v2673_v44 }
 0x26d   : > { %v2607_v27 = vadd.f32 %v2606_v3, %v2605_v25  ;;  %v2676_v19 = vrot.slane %v2675_v31, 2 }
 0x26f   : > { %v2608_v20 = vadd.f32 %v2607_v27, %v2570_v47  ;;  %v2677_v15 = vadd.f32 %v2676_v19, %v2675_v31 }
 0x271   : > { %2609 = vst [vmem:[#allocation2] sm:$0x1] %v2608_v20  ;;  %v2678_v23 = vrot.slane %v2677_v15, 1 }
 0x273   : > { %v2679_v58 = vadd.f32 %v2678_v23, %v2677_v15 }
 0x275   : > { %v2680_v12 = vadd.f32 %v2679_v58, %v2610_v18 }
 0x277   : > { %2681 = vst [vmem:[#allocation3] sm:$0x1] %v2680_v12 }
 0x278 PF: > { %p2682_p11 = scmp.eq.s32.totalorder %s4378_s16, 1 }
 0x27a   : > { %p2683_p12 = pnand %p2682_p11, %p283_p7 }
 0x27b   : > { %v2687_v59 = vld [vmem:[#allocation2] sm:$0x1] (!%p2683_p12) }
 0x27c   : > { %2686 = sbr.rel (%p2683_p12) target bundleno = 665 (0x299), region = 48  ;;  %v2688_v21 = vmul.f32 (!%p2683_p12), 0.001953125, %v2687_v59  ;;  %v2694_v5 = vld [vmem:[%s5448_s2] sm:$0x1] (!%p2683_p12) }
 0x27d   : > { %v2698_v41 = vld [vmem:[%s5449_s3] sm:$0x1] (!%p2683_p12) }
 0x27e   : > { %v2689_v37 = vld [vmem:[#allocation3] sm:$0x1] (!%p2683_p12)  ;;  %v2691_v28 = vmul.f32 (!%p2683_p12), %v2688_v21, %v2688_v21 }
 0x27f   : > { %v2690_v40 = vmul.f32 (!%p2683_p12), 0.001953125, %v2689_v37 }
 0x281   : > { %v2692_v43 = vsub.f32 (!%p2683_p12), %v2690_v40, %v2691_v28 }
 0x283   : > { %v2693_v24 = vmax.f32 %v2692_v43, 0.0 }
 0x285   : > { %v2695_v14 = vadd.f32 1e-05, %v2693_v24 }
 0x287   : > { %4350 = vrsqrt.f32 %v2695_v14 }
 0x291   : > { %v4351_v9 = vpop.eup %4350 }
 0x292   : > { %v2697_v51 = vmul.f32 %v4351_v9, %v2694_v5 }
 0x294   : > { %v2699_v34 = vmul.f32 %v2697_v51, %v2688_v21  ;;  %2702 = vst [vmem:[#allocation2] sm:$0x1] %v2697_v51 }
 0x296   : > { %v2700_v33 = vsub.f32 %v2698_v41, %v2699_v34 }
 0x298   : > { %2701 = vst [vmem:[#allocation3] sm:$0x1] %v2700_v33 }
 0x299 PF: > { %p3328_p13 = scmp.ne.s32.totalorder %s4378_s16, 1 }
 0x29b   : > { %2705 = sbr.rel (%p3328_p13) target bundleno = 701 (0x2bd), region = 52  ;;  %v5315_v63 = vld [vmem:[#allocation2] ss:$0 sm:$0xff] (!%p3328_p13) }
 0x29c   : > { %v2713_v54 = vmul.f32 (!%p3328_p13), %v5315_v63, %v5118_v38  ;;  %v2714_v52 = vmul.f32 (!%p3328_p13), %v5315_v63, %v5124_v61  ;;  %v2715_v25 = vmul.f32 (!%p3328_p13), %v5315_v63, %v5115_v42  ;;  %v2716_v44 = vmul.f32 (!%p3328_p13), %v5315_v63, %v5121_v57 }
 0x29d   : > { %v2717_v3 = vmul.f32 (!%p3328_p13), %v5315_v63, %v5132_v29  ;;  %v2718_v47 = vmul.f32 (!%p3328_p13), %v5315_v63, %v5138_v55  ;;  %v2719_v56 = vmul.f32 (!%p3328_p13), %v5315_v63, %v5129_v53  ;;  %v2720_v38 = vmul.f32 (!%p3328_p13), %v5315_v63, %v5135_v13 }
 0x29e   : > { %v2721_v21 = vmul.f32 (!%p3328_p13), %v5315_v63, %v5146_v11  ;;  %v2722_v40 = vmul.f32 (!%p3328_p13), %v5315_v63, %v5152_v17  ;;  %v2723_v24 = vmul.f32 (!%p3328_p13), %v5315_v63, %v5143_v26  ;;  %v2724_v14 = vmul.f32 (!%p3328_p13), %v5315_v63, %v5149_v45 }
 0x29f   : > { %v5317_v0 = vld [vmem:[#allocation3] ss:$0 sm:$0xff] (!%p3328_p13)  ;;  %v2725_v11 = vmul.f32 (!%p3328_p13), %v5315_v63, %v5159_v30  ;;  %v2726_v17 = vmul.f32 (!%p3328_p13), %v5315_v63, %v5164_v10  ;;  %v2727_v45 = vmul.f32 (!%p3328_p13), %v5315_v63, %v5156_v48  ;;  %v2728_v41 = vmul.f32 (!%p3328_p13), %v5315_v63, %v5161_v36 }
 0x2a0   : > { %v2752_v61 = vadd.f32 (!%p3328_p13), %v5317_v0, %v2713_v54  ;;  %v2753_v27 = vadd.f32 (!%p3328_p13), %v5317_v0, %v2714_v52  ;;  %v2754_v42 = vadd.f32 (!%p3328_p13), %v5317_v0, %v2715_v25  ;;  %v2755_v57 = vadd.f32 (!%p3328_p13), %v5317_v0, %v2716_v44 }
 0x2a1   : > { %v2756_v31 = vadd.f32 (!%p3328_p13), %v5317_v0, %v2717_v3  ;;  %v2757_v29 = vadd.f32 (!%p3328_p13), %v5317_v0, %v2718_v47  ;;  %v2758_v55 = vadd.f32 (!%p3328_p13), %v5317_v0, %v2719_v56  ;;  %v2759_v20 = vadd.f32 (!%p3328_p13), %v5317_v0, %v2720_v38 }
 0x2a2   : > { %v2784_v53 = vmax.f32 %v2752_v61, 0.0  ;;  %v2785_v19 = vmax.f32 %v2753_v27, 0.0  ;;  %v2786_v13 = vmax.f32 %v2754_v42, 0.0  ;;  %v2787_v15 = vmax.f32 %v2755_v57, 0.0 }
 0x2a3   : > { %v2788_v23 = vmax.f32 %v2756_v31, 0.0  ;;  %v2789_v18 = vmax.f32 %v2757_v29, 0.0  ;;  %v2790_v58 = vmax.f32 %v2758_v55, 0.0  ;;  %v2791_v12 = vmax.f32 %v2759_v20, 0.0 }
 0x2a4   : > { %v3400_v59 = vpack.c.bf16 %v2785_v19, %v2784_v53  ;;  %v3405_v37 = vpack.c.bf16 %v2787_v15, %v2786_v13  ;;  %v2760_v5 = vadd.f32 %v5317_v0, %v2721_v21  ;;  %v2761_v9 = vadd.f32 %v5317_v0, %v2722_v40 }
 0x2a5   : > { %v3410_v28 = vpack.c.bf16 %v2789_v18, %v2788_v23  ;;  %v3415_v43 = vpack.c.bf16 %v2791_v12, %v2790_v58  ;;  %v2762_v51 = vadd.f32 %v5317_v0, %v2723_v24  ;;  %v2763_v26 = vadd.f32 %v5317_v0, %v2724_v14 }
 0x2a6   : > { %3401 = vst [vmem:[%s4467_s6] sm:$0xff] %v3400_v59   ;;  %3477 = vst [vmem:[%s4467_s6 + $0x8] sm:$0xff] %v3405_v37   ;;  %v2792_v34 = vmax.f32 %v2760_v5, 0.0  ;;  %v2793_v33 = vmax.f32 %v2761_v9, 0.0  ;;  %v2764_v30 = vadd.f32 %v5317_v0, %v2725_v11  ;;  %v2765_v54 = vadd.f32 %v5317_v0, %v2726_v17 }
 0x2a7   : > { %3478 = vst [vmem:[%s4467_s6 + $0x10] sm:$0xff] %v3410_v28   ;;  %3479 = vst [vmem:[%s4467_s6 + $0x18] sm:$0xff] %v3415_v43   ;;  %v2794_v10 = vmax.f32 %v2762_v51, 0.0  ;;  %v2795_v52 = vmax.f32 %v2763_v26, 0.0  ;;  %v2766_v25 = vadd.f32 %v5317_v0, %v2727_v45  ;;  %v2767_v44 = vadd.f32 %v5317_v0, %v2728_v41 }
 0x2a8   : > { %v3420_v3 = vpack.c.bf16 %v2793_v33, %v2792_v34  ;;  %v2796_v47 = vmax.f32 %v2764_v30, 0.0  ;;  %v2797_v48 = vmax.f32 %v2765_v54, 0.0  ;;  %v2729_v36 = vmul.f32 %v5315_v63, %v5170_v35 }
 0x2a9   : > { %v3425_v56 = vpack.c.bf16 %v2795_v52, %v2794_v10  ;;  %v2798_v38 = vmax.f32 %v2766_v25, 0.0  ;;  %v2799_v61 = vmax.f32 %v2767_v44, 0.0  ;;  %v2730_v27 = vmul.f32 %v5315_v63, %v5174_v16 }
 0x2aa   : > { %3480 = vst [vmem:[%s4467_s6 + $0x20] sm:$0xff] %v3420_v3   ;;  %v3430_v42 = vpack.c.bf16 %v2797_v48, %v2796_v47  ;;  %v2768_v57 = vadd.f32 %v5317_v0, %v2729_v36  ;;  %v2731_v31 = vmul.f32 %v5315_v63, %v5168_v60  ;;  %v2732_v29 = vmul.f32 %v5315_v63, %v5172_v4 }
 0x2ab   : > { %3481 = vst [vmem:[%s4467_s6 + $0x28] sm:$0xff] %v3425_v56   ;;  %v3435_v55 = vpack.c.bf16 %v2799_v61, %v2798_v38  ;;  %v2769_v35 = vadd.f32 %v5317_v0, %v2730_v27  ;;  %v2733_v20 = vmul.f32 %v5315_v63, %v5180_v46  ;;  %v2734_v16 = vmul.f32 %v5315_v63, %v5184_v39 }
 0x2ac   : > { %3482 = vst [vmem:[%s4467_s6 + $0x30] sm:$0xff] %v3430_v42   ;;  %v2800_v53 = vmax.f32 %v2768_v57, 0.0  ;;  %v2770_v19 = vadd.f32 %v5317_v0, %v2731_v31  ;;  %v2771_v13 = vadd.f32 %v5317_v0, %v2732_v29  ;;  %v2735_v60 = vmul.f32 %v5315_v63, %v5178_v6 }
 0x2ad   : > { %3483 = vst [vmem:[%s4467_s6 + $0x38] sm:$0xff] %v3435_v55   ;;  %v2801_v4 = vmax.f32 %v2769_v35, 0.0  ;;  %v2772_v15 = vadd.f32 %v5317_v0, %v2733_v20  ;;  %v2773_v23 = vadd.f32 %v5317_v0, %v2734_v16  ;;  %v2736_v46 = vmul.f32 %v5315_v63, %v5182_v32 }
 0x2ae   : > { %v2802_v39 = vmax.f32 %v2770_v19, 0.0  ;;  %v2803_v18 = vmax.f32 %v2771_v13, 0.0  ;;  %v2774_v58 = vadd.f32 %v5317_v0, %v2735_v60  ;;  %v2737_v12 = vmul.f32 %v5315_v63, %v5190_v50 }
 0x2af   : > { %v3440_v59 = vpack.c.bf16 %v2801_v4, %v2800_v53  ;;  %v2804_v6 = vmax.f32 %v2772_v15, 0.0  ;;  %v2805_v37 = vmax.f32 %v2773_v23, 0.0  ;;  %v2775_v21 = vadd.f32 %v5317_v0, %v2736_v46 }
 0x2b0   : > { %v3445_v40 = vpack.c.bf16 %v2803_v18, %v2802_v39  ;;  %v2806_v28 = vmax.f32 %v2774_v58, 0.0  ;;  %v2738_v43 = vmul.f32 %v5315_v63, %v5194_v62  ;;  %v2776_v32 = vadd.f32 %v5317_v0, %v2737_v12 }
 0x2b1   : > { %3484 = vst [vmem:[%s4467_s6 + $0x40] sm:$0xff] %v3440_v59   ;;  %v3450_v24 = vpack.c.bf16 %v2805_v37, %v2804_v6  ;;  %v2807_v14 = vmax.f32 %v2775_v21, 0.0  ;;  %v2739_v5 = vmul.f32 %v5315_v63, %v5188_v49  ;;  %v2740_v50 = vmul.f32 %v5315_v63, %v5192_v2 }
 0x2b2   : > { %3485 = vst [vmem:[%s4467_s6 + $0x48] sm:$0xff] %v3445_v40   ;;  %v2777_v9 = vadd.f32 %v5317_v0, %v2738_v43  ;;  %v2808_v11 = vmax.f32 %v2776_v32, 0.0  ;;  %v2741_v17 = vmul.f32 %v5315_v63, %v5198_v1  ;;  %v2742_v62 = vmul.f32 %v5315_v63, %v5201_v22 }
 0x2b3   : > { %3486 = vst [vmem:[%s4467_s6 + $0x50] sm:$0xff] %v3450_v24   ;;  %v3455_v51 = vpack.c.bf16 %v2807_v14, %v2806_v28  ;;  %v2778_v26 = vadd.f32 %v5317_v0, %v2739_v5  ;;  %v2779_v49 = vadd.f32 %v5317_v0, %v2740_v50  ;;  %v2743_v2 = vmul.f32 %v5315_v63, %v5203_v7 }
 0x2b4   : > { %v2809_v45 = vmax.f32 %v2777_v9, 0.0  ;;  %v2780_v41 = vadd.f32 %v5317_v0, %v2741_v17  ;;  %v2781_v34 = vadd.f32 %v5317_v0, %v2742_v62  ;;  %v2744_v1 = vmul.f32 %v5315_v63, %v5206_v8 }
 0x2b5   : > { %3487 = vst [vmem:[%s4467_s6 + $0x58] sm:$0xff] %v3455_v51   ;;  %v2810_v22 = vmax.f32 %v2778_v26, 0.0  ;;  %v2811_v33 = vmax.f32 %v2779_v49, 0.0  ;;  %v2782_v30 = vadd.f32 %v5317_v0, %v2743_v2 }
 0x2b6   : > { %v3460_v54 = vpack.c.bf16 %v2809_v45, %v2808_v11  ;;  %v2812_v10 = vmax.f32 %v2780_v41, 0.0  ;;  %v2813_v52 = vmax.f32 %v2781_v34, 0.0  ;;  %v2783_v7 = vadd.f32 %v5317_v0, %v2744_v1 }
 0x2b7   : > { %v3465_v25 = vpack.c.bf16 %v2811_v33, %v2810_v22  ;;  %v2814_v44 = vmax.f32 %v2782_v30, 0.0 }
 0x2b8   : > { %3488 = vst [vmem:[%s4467_s6 + $0x60] sm:$0xff] %v3460_v54   ;;  %v3470_v3 = vpack.c.bf16 %v2813_v52, %v2812_v10  ;;  %v2815_v47 = vmax.f32 %v2783_v7, 0.0 }
 0x2b9   : > { %3489 = vst [vmem:[%s4467_s6 + $0x68] sm:$0xff] %v3465_v25  }
 0x2ba   : > { %3490 = vst [vmem:[%s4467_s6 + $0x70] sm:$0xff] %v3470_v3   ;;  %v3475_v48 = vpack.c.bf16 %v2815_v47, %v2814_v44 }
 0x2bc   : > { %3491 = vst [vmem:[%s4467_s6 + $0x78] sm:$0xff] %v3475_v48  }
 0x2bd PF: > { %s14_s19 = sadd.s32 1, %s4390_s19   ;;  %s5451_s15 = smov %s4382_s17 }
 0x2be   : > { %p11_p0 = scmp.ge.s32.totalorder %s14_s19, 6   ;;  %s5452_s16 = smov %s4386_s18 }
 0x2bf   : > { %s5453_s17 = smov %s5456_s20  ;;  %s5454_s18 = smov %s5460_s21 }
 0x2c0   :  { %13 = sbr.rel (!%p11_p0) target bundleno = 3 (0x3), region = 91 }

</bundles_post_ra>
